<compile_context>
chip_gen: v7x
topology: tpu7x:2x2x1
jax: 0.10.0
libtpu: 0.0.40
codegen_flags: <defaults>
</compile_context>

<pallas_src>
import jax
import jax.numpy as jnp
from jax.experimental import pallas as pl
from jax.experimental.pallas import tpu as pltpu


def _round_up(x, m):
    return (x + m - 1) // m * m


def _round_down(x, m):
    return x // m * m


def _mlp_kernel(x_ref, w1_ref, b1_ref, w2_ref, b2_ref,
                w3_ref, b3_ref, w4_ref, b4_ref, o_ref):
    # Layer 1: cast the f32 x tile to bf16 here (VPU has slack under the MXU),
    # MXU dot with f32 accumulation.  Dropout = identity in eval mode.
    x = x_ref[...].astype(jnp.bfloat16)
    h = jnp.dot(x, w1_ref[...], preferred_element_type=jnp.float32)
    h = jnp.maximum(h + b1_ref[...], 0.0)
    # Layer 2: 1024 -> 256
    h = jnp.dot(h.astype(jnp.bfloat16), w2_ref[...],
                preferred_element_type=jnp.float32)
    h = jnp.maximum(h + b2_ref[...], 0.0)
    # Layer 3: 256 -> 64
    h = jnp.dot(h.astype(jnp.bfloat16), w3_ref[...],
                preferred_element_type=jnp.float32)
    h = jnp.maximum(h + b3_ref[...], 0.0)
    # Layer 4: 64 -> 1 on the VPU (mul) + XLU (row reduce).
    logits = jnp.sum(h * w4_ref[...], axis=-1, keepdims=True) + b4_ref[...]
    o_ref[...] = jax.nn.sigmoid(logits)


def _choose_tile_b(batch, *, max_tile=512):
    """Rows per grid step.

    * multiple of 8 and never larger than the (>=8-row) batch, so the batch
      block never exceeds the array,
    * >= 2 grid steps once batch > 128 so v7x's two TensorCores both get work,
    * capped at max_tile to amortize per-step overhead while keeping the VMEM
      footprint small on every generation (v5e/v6e/v7x).
    """
    if batch <= 8:
        return 8
    n_tiles = 1 if batch <= 128 else max(2, -(-batch // max_tile))
    tile = _round_up(-(-batch // n_tiles), 8)
    return max(8, min(tile, _round_down(batch, 8)))


def prepare_params(params):
    """One-time, parameter-load-time conversion to kernel-ready layouts.

    bf16 W1..W3 (MXU operands), f32 row-shaped biases, f32 row for the final
    64->1 layer.  Do NOT call this per forward step.
    """
    w1, b1, w2, b2, w3, b3, w4, b4 = params   # weights stored [in, out]
    return (
        w1.astype(jnp.bfloat16), b1.reshape(1, -1).astype(jnp.float32),
        w2.astype(jnp.bfloat16), b2.reshape(1, -1).astype(jnp.float32),
        w3.astype(jnp.bfloat16), b3.reshape(1, -1).astype(jnp.float32),
        w4.reshape(1, -1).astype(jnp.float32),
        b4.reshape(1, -1).astype(jnp.float32),
    )


def prompt_classifier_forward(x, prepared, *, tile_b=None):
    """x: [B, input_size] float32. Returns [B, 1] float32 (sigmoid probs)."""
    w1b, b1r, w2b, b2r, w3b, b3r, w4r, b4r = prepared
    B, F = x.shape
    H1 = w1b.shape[1]   # 1024
    H2 = w2b.shape[1]   # 256
    H3 = w3b.shape[1]   # 64
    H4 = b4r.shape[1]   # 1

    # Sublane alignment only: pad at most 7 rows (no-op when B % 8 == 0).
    B_in = _round_up(max(B, 8), 8)
    x_in = x if B_in == B else jnp.pad(x, ((0, B_in - B), (0, 0)))

    if tile_b is None:
        tile_b = _choose_tile_b(B_in)
    assert tile_b % 8 == 0 and tile_b <= B_in

    num_tiles = pl.cdiv(B_in, tile_b)        # last block may overhang B_in
    rows_total = num_tiles * tile_b          # overhang rows sliced off below

    # Constant index_map -> weights/biases stay VMEM-resident across steps.
    full = lambda shape: pl.BlockSpec(shape, lambda i: (0, 0))

    flops = 2 * rows_total * (F * H1 + H1 * H2 + H2 * H3 + H3 * H4)
    weight_bytes = (w1b.size + w2b.size + w3b.size) * 2 \
        + (w4r.size + b1r.size + b2r.size + b3r.size + b4r.size) * 4
    bytes_accessed = B_in * F * 4 + weight_bytes + rows_total * H4 * 4

    # VMEM budget from the actual footprint (double-buffered operands + live
    # f32/bf16 intermediates), with headroom — not a flat 32 MiB.
    x_tile_bytes = tile_b * F * 4
    out_tile_bytes = tile_b * H4 * 4
    act_bytes = tile_b * (H1 * 6 + H2 * 6 + H3 * 4)
    footprint = 2 * (weight_bytes + x_tile_bytes + out_tile_bytes) + act_bytes
    vmem_limit = int(min(max(footprint + (4 << 20), 16 << 20), 64 << 20))

    out = pl.pallas_call(
        _mlp_kernel,
        out_shape=jax.ShapeDtypeStruct((rows_total, H4), jnp.float32),
        grid=(num_tiles,),
        in_specs=[
            pl.BlockSpec((tile_b, F), lambda i: (i, 0)),   # x tile (f32)
            full((F, H1)),  full((1, H1)),                 # W1, b1
            full((H1, H2)), full((1, H2)),                 # W2, b2
            full((H2, H3)), full((1, H3)),                 # W3, b3
            full((1, H3)),  full((1, H4)),                 # W4 (row), b4
        ],
        out_specs=pl.BlockSpec((tile_b, H4), lambda i: (i, 0)),
        compiler_params=pltpu.CompilerParams(
            dimension_semantics=("parallel",),
            vmem_limit_bytes=vmem_limit,
        ),
        cost_estimate=pl.CostEstimate(
            flops=flops, transcendentals=2 * rows_total,
            bytes_accessed=bytes_accessed),
    )(x_in, w1b, b1r, w2b, b2r, w3b, b3r, w4r, b4r)

    return out[:B]


def init_params(key, input_size=1024):
    """Deterministic synthetic parameters matching the module's shapes.

    PyTorch-Linear-style uniform(-1/sqrt(fan_in), 1/sqrt(fan_in)) init.
    Weights are stored [in, out] (transpose of nn.Linear's [out, in]).
    """
    dims = [(input_size, 1024), (1024, 256), (256, 64), (64, 1)]
    params = []
    for (fan_in, fan_out) in dims:
        key, kw, kb = jax.random.split(key, 3)
        bound = 1.0 / jnp.sqrt(float(fan_in))
        w = jax.random.uniform(kw, (fan_in, fan_out), jnp.float32,
                               minval=-bound, maxval=bound)
        b = jax.random.uniform(kb, (fan_out,), jnp.float32,
                               minval=-bound, maxval=bound)
        params += [w, b]
    return tuple(params)


def _reference_forward_bf16(x, params):
    """Mirror of the kernel's bf16-operand / f32-accumulate arithmetic."""
    w1, b1, w2, b2, w3, b3, w4, b4 = params
    bf = lambda a: a.astype(jnp.bfloat16)
    h = jnp.maximum(jnp.dot(bf(x), bf(w1), preferred_element_type=jnp.float32)
                    + b1, 0.0)
    h = jnp.maximum(jnp.dot(bf(h), bf(w2), preferred_element_type=jnp.float32)
                    + b2, 0.0)
    h = jnp.maximum(jnp.dot(bf(h), bf(w3), preferred_element_type=jnp.float32)
                    + b3, 0.0)
    logits = jnp.sum(h * w4.reshape(1, -1), axis=-1, keepdims=True) \
        + b4.reshape(1, -1)
    return jax.nn.sigmoid(logits)


def _reference_forward_f32(x, params):
    """Pure-f32 reference of the original module (eval mode)."""
    w1, b1, w2, b2, w3, b3, w4, b4 = params
    hp = jnp.float32
    h = jnp.maximum(jnp.dot(x, w1, precision="highest",
                            preferred_element_type=hp) + b1, 0.0)
    h = jnp.maximum(jnp.dot(h, w2, precision="highest",
                            preferred_element_type=hp) + b2, 0.0)
    h = jnp.maximum(jnp.dot(h, w3, precision="highest",
                            preferred_element_type=hp) + b3, 0.0)
    return jax.nn.sigmoid(jnp.dot(h, w4, precision="highest",
                                  preferred_element_type=hp) + b4)


if __name__ == "__main__":
    key = jax.random.PRNGKey(0)
    key, kx = jax.random.split(key)

    input_size = 1024
    batch = 37   # small, not a multiple of 8/tile: exercises the ragged grid
    x = jax.random.normal(kx, (batch, input_size), jnp.float32)

    params = init_params(key, input_size=input_size)
    prepped = prepare_params(params)          # one-time bf16 weight cast

    fwd = jax.jit(lambda xx: prompt_classifier_forward(xx, prepped))
    out = jax.block_until_ready(fwd(x))

    assert out.shape == (batch, 1)
    assert bool(jnp.all(jnp.isfinite(out)))

    ref_bf16 = _reference_forward_bf16(x, params)
    ref_f32 = _reference_forward_f32(x, params)
    assert jnp.allclose(out, ref_bf16, atol=1e-3, rtol=1e-3), \
        "mismatch vs bf16-arithmetic reference"
    assert jnp.allclose(out, ref_f32, atol=2e-2, rtol=2e-2), \
        "mismatch vs f32 module reference"

    print("KERNEL_OK")
</pallas_src>

<mosaic_0001>
module attributes {stable_mosaic.version = 11 : i64} {
  func.func @_mlp_kernel(%arg0: i32, %arg1: memref<40x1024xf32, #tpu.memory_space<vmem>>, %arg2: memref<1024x1024xbf16, #tpu.memory_space<vmem>>, %arg3: memref<1x1024xf32, #tpu.memory_space<vmem>>, %arg4: memref<1024x256xbf16, #tpu.memory_space<vmem>>, %arg5: memref<1x256xf32, #tpu.memory_space<vmem>>, %arg6: memref<256x64xbf16, #tpu.memory_space<vmem>>, %arg7: memref<1x64xf32, #tpu.memory_space<vmem>>, %arg8: memref<1x64xf32, #tpu.memory_space<vmem>>, %arg9: memref<1x1xf32, #tpu.memory_space<vmem>>, %arg10: memref<40x1xf32, #tpu.memory_space<vmem>>) attributes {dimension_semantics = [#tpu.dimension_semantics<parallel>], iteration_bounds = array<i64: 1>, scalar_prefetch = 0 : i64, scratch_operands = 0 : i64, tpu.core_type = #tpu.core_type<tc>, window_params = [{transform_indices = @transform_0, window_bounds = array<i64: 40, 1024>}, {pipeline_mode = #tpu.pipeline_mode<synchronous>, transform_indices = @transform_1, window_bounds = array<i64: 1024, 1024>}, {pipeline_mode = #tpu.pipeline_mode<synchronous>, transform_indices = @transform_2, window_bounds = array<i64: 1, 1024>}, {pipeline_mode = #tpu.pipeline_mode<synchronous>, transform_indices = @transform_3, window_bounds = array<i64: 1024, 256>}, {pipeline_mode = #tpu.pipeline_mode<synchronous>, transform_indices = @transform_4, window_bounds = array<i64: 1, 256>}, {pipeline_mode = #tpu.pipeline_mode<synchronous>, transform_indices = @transform_5, window_bounds = array<i64: 256, 64>}, {pipeline_mode = #tpu.pipeline_mode<synchronous>, transform_indices = @transform_6, window_bounds = array<i64: 1, 64>}, {pipeline_mode = #tpu.pipeline_mode<synchronous>, transform_indices = @transform_7, window_bounds = array<i64: 1, 64>}, {pipeline_mode = #tpu.pipeline_mode<synchronous>, transform_indices = @transform_8, window_bounds = array<i64: 1, 1>}, {transform_indices = @transform_9, window_bounds = array<i64: 40, 1>}]} {
    %c0 = arith.constant 0 : index
    %c0_0 = arith.constant 0 : index
    %0 = vector.load %arg1[%c0, %c0_0] : memref<40x1024xf32, #tpu.memory_space<vmem>>, vector<40x1024xf32>
    %1 = arith.truncf %0 : vector<40x1024xf32> to vector<40x1024xbf16>
    %c0_1 = arith.constant 0 : index
    %c0_2 = arith.constant 0 : index
    %2 = vector.load %arg2[%c0_1, %c0_2] : memref<1024x1024xbf16, #tpu.memory_space<vmem>>, vector<1024x1024xbf16>
    %cst = arith.constant dense<0.000000e+00> : vector<40x1024xf32>
    %3 = tpu.matmul %1, %2, %cst {dimension_numbers = #tpu.dot_dimension_numbers<[1], [0], [0], [1], [0, 0, 1, 1], [], []>} : vector<40x1024xbf16>, vector<1024x1024xbf16>, vector<40x1024xf32> -> vector<40x1024xf32>
    %c0_3 = arith.constant 0 : index
    %c0_4 = arith.constant 0 : index
    %4 = vector.load %arg3[%c0_3, %c0_4] : memref<1x1024xf32, #tpu.memory_space<vmem>>, vector<1x1024xf32>
    %5 = vector.broadcast %4 : vector<1x1024xf32> to vector<40x1024xf32>
    %6 = arith.addf %3, %5 : vector<40x1024xf32>
    %cst_5 = arith.constant 0.000000e+00 : f32
    %7 = vector.broadcast %cst_5 : f32 to vector<40x1024xf32>
    %8 = arith.maximumf %6, %7 : vector<40x1024xf32>
    %9 = arith.truncf %8 : vector<40x1024xf32> to vector<40x1024xbf16>
    %c0_6 = arith.constant 0 : index
    %c0_7 = arith.constant 0 : index
    %10 = vector.load %arg4[%c0_6, %c0_7] : memref<1024x256xbf16, #tpu.memory_space<vmem>>, vector<1024x256xbf16>
    %cst_8 = arith.constant dense<0.000000e+00> : vector<40x256xf32>
    %11 = tpu.matmul %9, %10, %cst_8 {dimension_numbers = #tpu.dot_dimension_numbers<[1], [0], [0], [1], [0, 0, 1, 1], [], []>} : vector<40x1024xbf16>, vector<1024x256xbf16>, vector<40x256xf32> -> vector<40x256xf32>
    %c0_9 = arith.constant 0 : index
    %c0_10 = arith.constant 0 : index
    %12 = vector.load %arg5[%c0_9, %c0_10] : memref<1x256xf32, #tpu.memory_space<vmem>>, vector<1x256xf32>
    %13 = vector.broadcast %12 : vector<1x256xf32> to vector<40x256xf32>
    %14 = arith.addf %11, %13 : vector<40x256xf32>
    %cst_11 = arith.constant 0.000000e+00 : f32
    %15 = vector.broadcast %cst_11 : f32 to vector<40x256xf32>
    %16 = arith.maximumf %14, %15 : vector<40x256xf32>
    %17 = arith.truncf %16 : vector<40x256xf32> to vector<40x256xbf16>
    %c0_12 = arith.constant 0 : index
    %c0_13 = arith.constant 0 : index
    %18 = vector.load %arg6[%c0_12, %c0_13] : memref<256x64xbf16, #tpu.memory_space<vmem>>, vector<256x64xbf16>
    %cst_14 = arith.constant dense<0.000000e+00> : vector<40x64xf32>
    %19 = tpu.matmul %17, %18, %cst_14 {dimension_numbers = #tpu.dot_dimension_numbers<[1], [0], [0], [1], [0, 0, 1, 1], [], []>} : vector<40x256xbf16>, vector<256x64xbf16>, vector<40x64xf32> -> vector<40x64xf32>
    %c0_15 = arith.constant 0 : index
    %c0_16 = arith.constant 0 : index
    %20 = vector.load %arg7[%c0_15, %c0_16] : memref<1x64xf32, #tpu.memory_space<vmem>>, vector<1x64xf32>
    %21 = vector.broadcast %20 : vector<1x64xf32> to vector<40x64xf32>
    %22 = arith.addf %19, %21 : vector<40x64xf32>
    %cst_17 = arith.constant 0.000000e+00 : f32
    %23 = vector.broadcast %cst_17 : f32 to vector<40x64xf32>
    %24 = arith.maximumf %22, %23 : vector<40x64xf32>
    %c0_18 = arith.constant 0 : index
    %c0_19 = arith.constant 0 : index
    %25 = vector.load %arg8[%c0_18, %c0_19] : memref<1x64xf32, #tpu.memory_space<vmem>>, vector<1x64xf32>
    %26 = vector.broadcast %25 : vector<1x64xf32> to vector<40x64xf32>
    %27 = arith.mulf %24, %26 : vector<40x64xf32>
    %cst_20 = arith.constant dense<0.000000e+00> : vector<40xf32>
    %28 = vector.multi_reduction <add>, %27, %cst_20 [1] : vector<40x64xf32> to vector<40xf32>
    %29 = vector.shape_cast %28 : vector<40xf32> to vector<40x1xf32>
    %c0_21 = arith.constant 0 : index
    %c0_22 = arith.constant 0 : index
    %30 = vector.load %arg9[%c0_21, %c0_22] : memref<1x1xf32, #tpu.memory_space<vmem>>, vector<1x1xf32>
    %31 = vector.broadcast %30 : vector<1x1xf32> to vector<40x1xf32>
    %32 = arith.addf %29, %31 : vector<40x1xf32>
    %33 = arith.negf %32 : vector<40x1xf32>
    %34 = math.exp %33 : vector<40x1xf32>
    %cst_23 = arith.constant 1.000000e+00 : f32
    %35 = vector.broadcast %cst_23 : f32 to vector<40x1xf32>
    %36 = arith.addf %35, %34 : vector<40x1xf32>
    %37 = arith.divf %35, %36 : vector<40x1xf32>
    %c0_24 = arith.constant 0 : index
    %c0_25 = arith.constant 0 : index
    %38 = vector.load %arg10[%c0_24, %c0_25] : memref<40x1xf32, #tpu.memory_space<vmem>>, vector<40x1xf32>
    tpu.vector_store %arg10[%c0_24, %c0_25], %37 {strides = array<i32>} : memref<40x1xf32, #tpu.memory_space<vmem>>, vector<40x1xf32>,
    return
  }
  func.func @transform_0(%arg0: i32) -> (i32, i32) {
    %c0_i32 = arith.constant 0 : i32
    %c0_i32_0 = arith.constant 0 : i32
    return %arg0, %c0_i32 : i32, i32
  }
  func.func @transform_1(%arg0: i32) -> (i32, i32) {
    %c0_i32 = arith.constant 0 : i32
    %c0_i32_0 = arith.constant 0 : i32
    %c0_i32_1 = arith.constant 0 : i32
    return %c0_i32, %c0_i32_0 : i32, i32
  }
  func.func @transform_2(%arg0: i32) -> (i32, i32) {
    %c0_i32 = arith.constant 0 : i32
    %c0_i32_0 = arith.constant 0 : i32
    %c0_i32_1 = arith.constant 0 : i32
    return %c0_i32, %c0_i32_0 : i32, i32
  }
  func.func @transform_3(%arg0: i32) -> (i32, i32) {
    %c0_i32 = arith.constant 0 : i32
    %c0_i32_0 = arith.constant 0 : i32
    %c0_i32_1 = arith.constant 0 : i32
    return %c0_i32, %c0_i32_0 : i32, i32
  }
  func.func @transform_4(%arg0: i32) -> (i32, i32) {
    %c0_i32 = arith.constant 0 : i32
    %c0_i32_0 = arith.constant 0 : i32
    %c0_i32_1 = arith.constant 0 : i32
    return %c0_i32, %c0_i32_0 : i32, i32
  }
  func.func @transform_5(%arg0: i32) -> (i32, i32) {
    %c0_i32 = arith.constant 0 : i32
    %c0_i32_0 = arith.constant 0 : i32
    %c0_i32_1 = arith.constant 0 : i32
    return %c0_i32, %c0_i32_0 : i32, i32
  }
  func.func @transform_6(%arg0: i32) -> (i32, i32) {
    %c0_i32 = arith.constant 0 : i32
    %c0_i32_0 = arith.constant 0 : i32
    %c0_i32_1 = arith.constant 0 : i32
    return %c0_i32, %c0_i32_0 : i32, i32
  }
  func.func @transform_7(%arg0: i32) -> (i32, i32) {
    %c0_i32 = arith.constant 0 : i32
    %c0_i32_0 = arith.constant 0 : i32
    %c0_i32_1 = arith.constant 0 : i32
    return %c0_i32, %c0_i32_0 : i32, i32
  }
  func.func @transform_8(%arg0: i32) -> (i32, i32) {
    %c0_i32 = arith.constant 0 : i32
    %c0_i32_0 = arith.constant 0 : i32
    %c0_i32_1 = arith.constant 0 : i32
    return %c0_i32, %c0_i32_0 : i32, i32
  }
  func.func @transform_9(%arg0: i32) -> (i32, i32) {
    %c0_i32 = arith.constant 0 : i32
    %c0_i32_0 = arith.constant 0 : i32
    return %arg0, %c0_i32 : i32, i32
  }
}

</mosaic_0001>

<bundles_post_ra>
// kernel: _lambda_.1
= control target key start
LH: loop header
LB: loop body
LE: loop exit
PB: predicated region body
PF: predicated region fallthrough
CT: control target
= control target key end

     0   :  { %vm5501_vm0 = vcmask 523264   ;;  %vm5559_vm1 = vcmask 7168   ;;  %s9169_s1 = inlined_call_operand.vmem [shape: bf16[1024,1024], index: 1, kind: input, shape index: {}]   ;;  %s9170_s0 = inlined_call_operand.vmem [shape: f32[40,1024], index: 0, kind: input, shape index: {}]   ;;  %s9171_s3 = inlined_call_operand.vmem [shape: bf16[1024,256], index: 3, kind: input, shape index: {}]   ;;  %s9172_s2 = inlined_call_operand.vmem [shape: f32[1,1024], index: 2, kind: input, shape index: {}]   ;;  %s9173_s5 = inlined_call_operand.vmem [shape: bf16[256,64], index: 5, kind: input, shape index: {}]   ;;  %s9174_s4 = inlined_call_operand.vmem [shape: f32[1,256], index: 4, kind: input, shape index: {}]   ;;  %s9175_s8 = inlined_call_operand.<no memory space> [shape: f32[1,1], index: 8, kind: input, shape index: {}]   ;;  %s9176_s6 = inlined_call_operand.vmem [shape: f32[1,64], index: 6, kind: input, shape index: {}]   ;;  %s9177_s7 = inlined_call_operand.vmem [shape: f32[1,64], index: 7, kind: input, shape index: {}]   ;;  %s9178_s9 = inlined_call_operand.vmem [shape: f32[40,1], index: 9, kind: output, shape index: {}]  }
   0x1   :  { %v99_v0 = vld [vmem:[%s9169_s1] sm:$0xff]  ;;  %v36_v53 = vld [vmem:[%s9170_s0 + $0x8] sm:$0xff] }
   0x2   :  { %v103_v1 = vld [vmem:[%s9169_s1 + $0x20] sm:$0xff]  ;;  %v44_v54 = vld [vmem:[%s9170_s0 + $0x48] sm:$0xff] }
   0x3   :  { %v355_v2 = vld [vmem:[%s9169_s1 + $0x800] sm:$0xff]  ;;  %v5570_v3 = vcombine.high %v99_v0, %v103_v1  ;;  %v5569_v5 = vcombine.low %v99_v0, %v103_v1  ;;  %v6886_v58 = vpack.c.bf16 %v44_v54, %v36_v53  ;;  %v40_v59 = vld [vmem:[%s9170_s0 + $0x28] sm:$0xff] }
   0x4   :  { %v359_v4 = vld [vmem:[%s9169_s1 + $0x820] sm:$0xff]  ;;  %v48_v62 = vld [vmem:[%s9170_s0 + $0x68] sm:$0xff] }
   0x5   :  { %v107_v6 = vld [vmem:[%s9169_s1 + $0x40] sm:$0xff]  ;;  %v5826_v8 = vcombine.high %v355_v2, %v359_v4  ;;  %v5825_v9 = vcombine.low %v355_v2, %v359_v4  ;;  %3213 = vmatprep.subr.bf16.mxu1 %v5570_v3  ;;  %3245 = vmatprep.mubr.bf16.mxu1 %v6886_v58  ;;  %v6901_v0 = vpack.c.bf16 %v48_v62, %v40_v59 }
   0x6   :  { %v111_v7 = vld [vmem:[%s9169_s1 + $0x60] sm:$0xff]  ;;  %3214 = vmatpush1.bf16.msra.mxu1 %v5569_v5 }
   0x7   :  { %v5578_v10 = vcombine.high %v107_v6, %v111_v7  ;;  %v363_v11 = vld [vmem:[%s9169_s1 + $0x840] sm:$0xff]  ;;  %3335 = vmatprep.subr.bf16.mxu0 %v5826_v8  ;;  %v5577_v18 = vcombine.low %v107_v6, %v111_v7  ;;  %3367 = vmatprep.mubr.bf16.mxu0 %v6901_v0 }
   0x8   :  { %v367_v12 = vld [vmem:[%s9169_s1 + $0x860] sm:$0xff]  ;;  %3336 = vmatpush1.bf16.msra.mxu0 %v5825_v9 }
   0x9   :  { %v115_v13 = vld [vmem:[%s9169_s1 + $0x80] sm:$0xff]  ;;  %v5834_v14 = vcombine.high %v363_v11, %v367_v12  ;;  %3215 = vmatprep.subr.bf16.mxu1 %v5578_v10  ;;  %v5833_v19 = vcombine.low %v363_v11, %v367_v12 }
   0xa   :  { %v119_v15 = vld [vmem:[%s9169_s1 + $0xa0] sm:$0xff]  ;;  %3216 = vmatpush1.bf16.msra.mxu1 %v5577_v18 }
   0xb   :  { %v371_v16 = vld [vmem:[%s9169_s1 + $0x880] sm:$0xff]  ;;  %v5586_v20 = vcombine.high %v115_v13, %v119_v15  ;;  %3337 = vmatprep.subr.bf16.mxu0 %v5834_v14  ;;  %v5585_v26 = vcombine.low %v115_v13, %v119_v15 }
   0xc   :  { %v375_v17 = vld [vmem:[%s9169_s1 + $0x8a0] sm:$0xff]  ;;  %3338 = vmatpush1.bf16.msra.mxu0 %v5833_v19 }
   0xd   :  { %v5842_v21 = vcombine.high %v371_v16, %v375_v17  ;;  %v123_v22 = vld [vmem:[%s9169_s1 + $0xc0] sm:$0xff]  ;;  %3217 = vmatprep.subr.bf16.mxu1 %v5586_v20  ;;  %v5841_v27 = vcombine.low %v371_v16, %v375_v17 }
   0xe   :  { %v127_v23 = vld [vmem:[%s9169_s1 + $0xe0] sm:$0xff]  ;;  %3218 = vmatpush1.bf16.msra.mxu1 %v5585_v26 }
   0xf   :  { %v379_v24 = vld [vmem:[%s9169_s1 + $0x8c0] sm:$0xff]  ;;  %v5594_v28 = vcombine.high %v123_v22, %v127_v23  ;;  %3339 = vmatprep.subr.bf16.mxu0 %v5842_v21  ;;  %v5593_v34 = vcombine.low %v123_v22, %v127_v23 }
  0x10   :  { %v383_v25 = vld [vmem:[%s9169_s1 + $0x8e0] sm:$0xff]  ;;  %3340 = vmatpush1.bf16.msra.mxu0 %v5841_v27 }
  0x11   :  { %v5850_v29 = vcombine.high %v379_v24, %v383_v25  ;;  %v131_v30 = vld [vmem:[%s9169_s1 + $0x100] sm:$0xff]  ;;  %3219 = vmatprep.subr.bf16.mxu1 %v5594_v28  ;;  %v5849_v35 = vcombine.low %v379_v24, %v383_v25 }
  0x12   :  { %v135_v31 = vld [vmem:[%s9169_s1 + $0x120] sm:$0xff]  ;;  %3220 = vmatpush1.bf16.msra.mxu1 %v5593_v34 }
  0x13   :  { %v387_v32 = vld [vmem:[%s9169_s1 + $0x900] sm:$0xff]  ;;  %v5602_v36 = vcombine.high %v131_v30, %v135_v31  ;;  %3341 = vmatprep.subr.bf16.mxu0 %v5850_v29  ;;  %v5601_v42 = vcombine.low %v131_v30, %v135_v31 }
  0x14   :  { %v391_v33 = vld [vmem:[%s9169_s1 + $0x920] sm:$0xff]  ;;  %3342 = vmatpush1.bf16.msra.mxu0 %v5849_v35 }
  0x15   :  { %v5858_v37 = vcombine.high %v387_v32, %v391_v33  ;;  %v139_v38 = vld [vmem:[%s9169_s1 + $0x140] sm:$0xff]  ;;  %3221 = vmatprep.subr.bf16.mxu1 %v5602_v36  ;;  %v5857_v43 = vcombine.low %v387_v32, %v391_v33 }
  0x16   :  { %v143_v39 = vld [vmem:[%s9169_s1 + $0x160] sm:$0xff]  ;;  %3222 = vmatpush1.bf16.msra.mxu1 %v5601_v42 }
  0x17   :  { %v395_v40 = vld [vmem:[%s9169_s1 + $0x940] sm:$0xff]  ;;  %v5610_v44 = vcombine.high %v139_v38, %v143_v39  ;;  %3343 = vmatprep.subr.bf16.mxu0 %v5858_v37  ;;  %v5609_v50 = vcombine.low %v139_v38, %v143_v39 }
  0x18   :  { %v399_v41 = vld [vmem:[%s9169_s1 + $0x960] sm:$0xff]  ;;  %3344 = vmatpush1.bf16.msra.mxu0 %v5857_v43 }
  0x19   :  { %v5866_v45 = vcombine.high %v395_v40, %v399_v41  ;;  %v147_v46 = vld [vmem:[%s9169_s1 + $0x180] sm:$0xff]  ;;  %3223 = vmatprep.subr.bf16.mxu1 %v5610_v44  ;;  %v5865_v51 = vcombine.low %v395_v40, %v399_v41 }
  0x1a   :  { %v151_v47 = vld [vmem:[%s9169_s1 + $0x1a0] sm:$0xff]  ;;  %3224 = vmatpush1.bf16.msra.mxu1 %v5609_v50 }
  0x1b   :  { %v403_v48 = vld [vmem:[%s9169_s1 + $0x980] sm:$0xff]  ;;  %v5618_v52 = vcombine.high %v147_v46, %v151_v47  ;;  %3345 = vmatprep.subr.bf16.mxu0 %v5866_v45  ;;  %v5617_v63 = vcombine.low %v147_v46, %v151_v47 }
  0x1c   :  { %v407_v49 = vld [vmem:[%s9169_s1 + $0x9a0] sm:$0xff]  ;;  %3346 = vmatpush1.bf16.msra.mxu0 %v5865_v51 }
  0x1d   :  { %v5874_v55 = vcombine.high %v403_v48, %v407_v49  ;;  %v155_v56 = vld [vmem:[%s9169_s1 + $0x1c0] sm:$0xff]  ;;  %3225 = vmatprep.subr.bf16.mxu1 %v5618_v52  ;;  %v5873_v1 = vcombine.low %v403_v48, %v407_v49 }
  0x1e   :  { %v159_v57 = vld [vmem:[%s9169_s1 + $0x1e0] sm:$0xff]  ;;  %3226 = vmatpush1.bf16.msra.mxu1 %v5617_v63 }
  0x1f   :  { %v411_v60 = vld [vmem:[%s9169_s1 + $0x9c0] sm:$0xff]  ;;  %v5626_v2 = vcombine.high %v155_v56, %v159_v57  ;;  %3347 = vmatprep.subr.bf16.mxu0 %v5874_v55  ;;  %v5625_v8 = vcombine.low %v155_v56, %v159_v57 }
  0x20   :  { %v415_v61 = vld [vmem:[%s9169_s1 + $0x9e0] sm:$0xff]  ;;  %3348 = vmatpush1.bf16.msra.mxu0 %v5873_v1 }
  0x21   :  { %v5882_v3 = vcombine.high %v411_v60, %v415_v61  ;;  %v163_v4 = vld [vmem:[%s9169_s1 + $0x200] sm:$0xff]  ;;  %3227 = vmatprep.subr.bf16.mxu1 %v5626_v2  ;;  %v5881_v9 = vcombine.low %v411_v60, %v415_v61 }
  0x22   :  { %v167_v5 = vld [vmem:[%s9169_s1 + $0x220] sm:$0xff]  ;;  %3228 = vmatpush1.bf16.msra.mxu1 %v5625_v8 }
  0x23   :  { %v419_v6 = vld [vmem:[%s9169_s1 + $0xa00] sm:$0xff]  ;;  %v5634_v10 = vcombine.high %v163_v4, %v167_v5  ;;  %3349 = vmatprep.subr.bf16.mxu0 %v5882_v3  ;;  %v5633_v16 = vcombine.low %v163_v4, %v167_v5 }
  0x24   :  { %v423_v7 = vld [vmem:[%s9169_s1 + $0xa20] sm:$0xff]  ;;  %3350 = vmatpush1.bf16.msra.mxu0 %v5881_v9 }
  0x25   :  { %v5890_v11 = vcombine.high %v419_v6, %v423_v7  ;;  %v171_v12 = vld [vmem:[%s9169_s1 + $0x240] sm:$0xff]  ;;  %3229 = vmatprep.subr.bf16.mxu1 %v5634_v10  ;;  %v5889_v17 = vcombine.low %v419_v6, %v423_v7 }
  0x26   :  { %v175_v13 = vld [vmem:[%s9169_s1 + $0x260] sm:$0xff]  ;;  %3230 = vmatpush1.bf16.msra.mxu1 %v5633_v16 }
  0x27   :  { %v427_v14 = vld [vmem:[%s9169_s1 + $0xa40] sm:$0xff]  ;;  %v5642_v18 = vcombine.high %v171_v12, %v175_v13  ;;  %3351 = vmatprep.subr.bf16.mxu0 %v5890_v11  ;;  %v5641_v24 = vcombine.low %v171_v12, %v175_v13 }
  0x28   :  { %v431_v15 = vld [vmem:[%s9169_s1 + $0xa60] sm:$0xff]  ;;  %3352 = vmatpush1.bf16.msra.mxu0 %v5889_v17 }
  0x29   :  { %v5898_v19 = vcombine.high %v427_v14, %v431_v15  ;;  %v179_v20 = vld [vmem:[%s9169_s1 + $0x280] sm:$0xff]  ;;  %3231 = vmatprep.subr.bf16.mxu1 %v5642_v18  ;;  %v5897_v25 = vcombine.low %v427_v14, %v431_v15 }
  0x2a   :  { %v183_v21 = vld [vmem:[%s9169_s1 + $0x2a0] sm:$0xff]  ;;  %3232 = vmatpush1.bf16.msra.mxu1 %v5641_v24  ;;  %v60_v24 = vld [vmem:[%s9170_s0 + $0xc8] sm:$0xff] }
  0x2b   :  { %v435_v22 = vld [vmem:[%s9169_s1 + $0xa80] sm:$0xff]  ;;  %v5650_v26 = vcombine.high %v179_v20, %v183_v21  ;;  %3353 = vmatprep.subr.bf16.mxu0 %v5898_v19  ;;  %v5649_v32 = vcombine.low %v179_v20, %v183_v21 }
  0x2c   :  { %v439_v23 = vld [vmem:[%s9169_s1 + $0xaa0] sm:$0xff]  ;;  %3354 = vmatpush1.bf16.msra.mxu0 %v5897_v25 }
  0x2d   :  { %v5906_v27 = vcombine.high %v435_v22, %v439_v23  ;;  %v187_v28 = vld [vmem:[%s9169_s1 + $0x2c0] sm:$0xff]  ;;  %3233 = vmatprep.subr.bf16.mxu1 %v5650_v26  ;;  %v5905_v33 = vcombine.low %v435_v22, %v439_v23  ;;  %v52_v23 = vld [vmem:[%s9170_s0 + $0x88] sm:$0xff] }
  0x2e   :  { %v191_v29 = vld [vmem:[%s9169_s1 + $0x2e0] sm:$0xff]  ;;  %3234 = vmatpush1.bf16.msra.mxu1 %v5649_v32 }
  0x2f   :  { %v443_v30 = vld [vmem:[%s9169_s1 + $0xac0] sm:$0xff]  ;;  %v5658_v34 = vcombine.high %v187_v28, %v191_v29  ;;  %3355 = vmatprep.subr.bf16.mxu0 %v5906_v27  ;;  %v5657_v40 = vcombine.low %v187_v28, %v191_v29  ;;  %v56_v27 = vld [vmem:[%s9170_s0 + $0xa8] sm:$0xff] }
  0x30   :  { %v447_v31 = vld [vmem:[%s9169_s1 + $0xae0] sm:$0xff]  ;;  %3356 = vmatpush1.bf16.msra.mxu0 %v5905_v33  ;;  %v64_v28 = vld [vmem:[%s9170_s0 + $0xe8] sm:$0xff] }
  0x31   :  { %v5914_v35 = vcombine.high %v443_v30, %v447_v31  ;;  %v195_v36 = vld [vmem:[%s9169_s1 + $0x300] sm:$0xff]  ;;  %3235 = vmatprep.subr.bf16.mxu1 %v5658_v34  ;;  %v5913_v41 = vcombine.low %v443_v30, %v447_v31  ;;  %v7058_v34 = vpack.c.bf16 %v60_v24, %v52_v23 }
  0x32   :  { %v199_v37 = vld [vmem:[%s9169_s1 + $0x320] sm:$0xff]  ;;  %3236 = vmatpush1.bf16.msra.mxu1 %v5657_v40 }
  0x33   :  { %v451_v38 = vld [vmem:[%s9169_s1 + $0xb00] sm:$0xff]  ;;  %v5666_v42 = vcombine.high %v195_v36, %v199_v37  ;;  %3357 = vmatprep.subr.bf16.mxu0 %v5914_v35  ;;  %v5665_v48 = vcombine.low %v195_v36, %v199_v37  ;;  %v7067_v37 = vpack.c.bf16 %v64_v28, %v56_v27 }
  0x34   :  { %v455_v39 = vld [vmem:[%s9169_s1 + $0xb20] sm:$0xff]  ;;  %3358 = vmatpush1.bf16.msra.mxu0 %v5913_v41 }
  0x35   :  { %v5922_v43 = vcombine.high %v451_v38, %v455_v39  ;;  %v203_v44 = vld [vmem:[%s9169_s1 + $0x340] sm:$0xff]  ;;  %3237 = vmatprep.subr.bf16.mxu1 %v5666_v42  ;;  %v5921_v49 = vcombine.low %v451_v38, %v455_v39 }
  0x36   :  { %v207_v45 = vld [vmem:[%s9169_s1 + $0x360] sm:$0xff]  ;;  %3238 = vmatpush1.bf16.msra.mxu1 %v5665_v48 }
  0x37   :  { %v459_v46 = vld [vmem:[%s9169_s1 + $0xb40] sm:$0xff]  ;;  %v5674_v50 = vcombine.high %v203_v44, %v207_v45  ;;  %3359 = vmatprep.subr.bf16.mxu0 %v5922_v43  ;;  %v5673_v56 = vcombine.low %v203_v44, %v207_v45 }
  0x38   :  { %v463_v47 = vld [vmem:[%s9169_s1 + $0xb60] sm:$0xff]  ;;  %3360 = vmatpush1.bf16.msra.mxu0 %v5921_v49 }
  0x39   :  { %v5930_v51 = vcombine.high %v459_v46, %v463_v47  ;;  %v211_v52 = vld [vmem:[%s9169_s1 + $0x380] sm:$0xff]  ;;  %3239 = vmatprep.subr.bf16.mxu1 %v5674_v50  ;;  %v5929_v57 = vcombine.low %v459_v46, %v463_v47 }
  0x3a   :  { %v215_v53 = vld [vmem:[%s9169_s1 + $0x3a0] sm:$0xff]  ;;  %3240 = vmatpush1.bf16.msra.mxu1 %v5673_v56 }
  0x3b   :  { %v467_v54 = vld [vmem:[%s9169_s1 + $0xb80] sm:$0xff]  ;;  %v5682_v59 = vcombine.high %v211_v52, %v215_v53  ;;  %3361 = vmatprep.subr.bf16.mxu0 %v5930_v51  ;;  %v5681_v2 = vcombine.low %v211_v52, %v215_v53  ;;  %v68_v51 = vld [vmem:[%s9170_s0 + $0x108] sm:$0xff] }
  0x3c   :  { %v471_v55 = vld [vmem:[%s9169_s1 + $0xba0] sm:$0xff]  ;;  %3362 = vmatpush1.bf16.msra.mxu0 %v5929_v57 }
  0x3d   :  { %v5938_v60 = vcombine.high %v467_v54, %v471_v55  ;;  %v219_v61 = vld [vmem:[%s9169_s1 + $0x3c0] sm:$0xff]  ;;  %3241 = vmatprep.subr.bf16.mxu1 %v5682_v59  ;;  %v5937_v3 = vcombine.low %v467_v54, %v471_v55  ;;  %v72_v54 = vld [vmem:[%s9170_s0 + $0x128] sm:$0xff] }
  0x3e   :  { %v223_v62 = vld [vmem:[%s9169_s1 + $0x3e0] sm:$0xff]  ;;  %3242 = vmatpush1.bf16.msra.mxu1 %v5681_v2 }
  0x3f   :  { %v475_v63 = vld [vmem:[%s9169_s1 + $0xbc0] sm:$0xff]  ;;  %v5690_v4 = vcombine.high %v219_v61, %v223_v62  ;;  %3363 = vmatprep.subr.bf16.mxu0 %v5938_v60  ;;  %v5689_v10 = vcombine.low %v219_v61, %v223_v62  ;;  %v7112_v61 = vpack.c.bf16 %v68_v51, %v68_v51 }
  0x40   :  { %v479_v1 = vld [vmem:[%s9169_s1 + $0xbe0] sm:$0xff]  ;;  %3364 = vmatpush1.bf16.msra.mxu0 %v5937_v3 }
  0x41   :  { %v5946_v5 = vcombine.high %v475_v63, %v479_v1  ;;  %v227_v6 = vld [vmem:[%s9169_s1 + $0x400] sm:$0xff]  ;;  %3243 = vmatprep.subr.bf16.mxu1 %v5690_v4  ;;  %v5945_v13 = vcombine.low %v475_v63, %v479_v1  ;;  %v7121_v1 = vpack.c.bf16 %v72_v54, %v72_v54 }
  0x42   :  { %v231_v7 = vld [vmem:[%s9169_s1 + $0x420] sm:$0xff]  ;;  %3244 = vmatpush1.bf16.msra.mxu1 %v5689_v10 }
  0x43   :  { %v483_v8 = vld [vmem:[%s9169_s1 + $0xc00] sm:$0xff]  ;;  %v5698_v14 = vcombine.high %v227_v6, %v231_v7  ;;  %3365 = vmatprep.subr.bf16.mxu0 %v5946_v5  ;;  %v5697_v25 = vcombine.low %v227_v6, %v231_v7 }
  0x44   :  { %v487_v9 = vld [vmem:[%s9169_s1 + $0xc20] sm:$0xff]  ;;  %3366 = vmatpush1.bf16.msra.mxu0 %v5945_v13  ;;  %v38_v13 = vld [vmem:[%s9170_s0 + $0x18] sm:$0xff] }
  0x45   :  { %v35_v11 = vld [vmem:[%s9170_s0] sm:$0xff]  ;;  %v5954_v17 = vcombine.high %v483_v8, %v487_v9  ;;  %3274 = vmatprep.subr.bf16.mxu1 %v5698_v14  ;;  %v5953_v29 = vcombine.low %v483_v8, %v487_v9  ;;  %v46_v14 = vld [vmem:[%s9170_s0 + $0x58] sm:$0xff] }
  0x46   :  { %v43_v12 = vld [vmem:[%s9170_s0 + $0x40] sm:$0xff] }
  0x47   :  { %v39_v15 = vld [vmem:[%s9170_s0 + $0x20] sm:$0xff]  ;;  %v7033_v21 = vpack.c.bf16 %v43_v12, %v35_v11  ;;  %3396 = vmatprep.subr.bf16.mxu0 %v5954_v17  ;;  %v42_v17 = vld [vmem:[%s9170_s0 + $0x38] sm:$0xff] }
  0x48   :  { %v47_v16 = vld [vmem:[%s9170_s0 + $0x60] sm:$0xff] }
  0x49   :  { %v235_v18 = vld [vmem:[%s9169_s1 + $0x440] sm:$0xff]  ;;  %v7044_v26 = vpack.c.bf16 %v47_v16, %v39_v15  ;;  %3246 = vmatmul.mubr.bf16.vlgmr.msra.gmra.mrb[0].mxu1 %v7033_v21 }
  0x4a   :  { %v239_v19 = vld [vmem:[%s9169_s1 + $0x460] sm:$0xff]  ;;  %3275 = vmatpush1.bf16.msra.mxu1 %v5697_v25  ;;  %3255 = vmatprep.mubr.bf16.mxu1 %v7058_v34  ;;  %v7166_v25 = vpack.c.bf16 %v46_v14, %v38_v13 }
  0x4b   :  { %v491_v20 = vld [vmem:[%s9169_s1 + $0xc40] sm:$0xff]  ;;  %v5706_v30 = vcombine.high %v235_v18, %v239_v19  ;;  %3368 = vmatmul.mubr.bf16.vlgmr.msra.gmra.mrb[0].mxu0 %v7044_v26  ;;  %v5705_v38 = vcombine.low %v235_v18, %v239_v19  ;;  %v50_v18 = vld [vmem:[%s9170_s0 + $0x78] sm:$0xff] }
  0x4c   :  { %v495_v22 = vld [vmem:[%s9169_s1 + $0xc60] sm:$0xff]  ;;  %3397 = vmatpush1.bf16.msra.mxu0 %v5953_v29  ;;  %3377 = vmatprep.mubr.bf16.mxu0 %v7067_v37  ;;  %v7175_v29 = vpack.c.bf16 %v50_v18, %v42_v17 }
  0x4d   :  { %v5962_v31 = vcombine.high %v491_v20, %v495_v22  ;;  %v243_v32 = vld [vmem:[%s9169_s1 + $0x480] sm:$0xff]  ;;  %3276 = vmatprep.subr.bf16.mxu1 %v5706_v30  ;;  %v5961_v41 = vcombine.low %v491_v20, %v495_v22 }
  0x4e   :  { %v247_v33 = vld [vmem:[%s9169_s1 + $0x4a0] sm:$0xff]  ;;  %3277 = vmatpush1.bf16.msra.mxu1 %v5705_v38 }
  0x4f   :  { %v499_v35 = vld [vmem:[%s9169_s1 + $0xc80] sm:$0xff]  ;;  %v5714_v42 = vcombine.high %v243_v32, %v247_v33  ;;  %3398 = vmatprep.subr.bf16.mxu0 %v5962_v31  ;;  %v5713_v52 = vcombine.low %v243_v32, %v247_v33 }
  0x50   :  { %v503_v36 = vld [vmem:[%s9169_s1 + $0xca0] sm:$0xff]  ;;  %3399 = vmatpush1.bf16.msra.mxu0 %v5961_v41 }
  0x51   :  { %v51_v39 = vld [vmem:[%s9170_s0 + $0x80] sm:$0xff]  ;;  %v5970_v45 = vcombine.high %v499_v35, %v503_v36  ;;  %3278 = vmatprep.subr.bf16.mxu1 %v5714_v42  ;;  %v5969_v55 = vcombine.low %v499_v35, %v503_v36 }
  0x52   :  { %v59_v40 = vld [vmem:[%s9170_s0 + $0xc0] sm:$0xff]  ;;  %3279 = vmatpush1.bf16.msra.mxu1 %v5713_v52 }
  0x53   :  { %v55_v43 = vld [vmem:[%s9170_s0 + $0xa0] sm:$0xff]  ;;  %v7095_v50 = vpack.c.bf16 %v59_v40, %v51_v39  ;;  %3400 = vmatprep.subr.bf16.mxu0 %v5970_v45 }
  0x54   :  { %v63_v44 = vld [vmem:[%s9170_s0 + $0xe0] sm:$0xff]  ;;  %3401 = vmatpush1.bf16.msra.mxu0 %v5969_v55 }
  0x55   :  { %v251_v46 = vld [vmem:[%s9169_s1 + $0x4c0] sm:$0xff]  ;;  %v7101_v53 = vpack.c.bf16 %v63_v44, %v55_v43  ;;  %3256 = vmatmul.mubr.bf16.gmra.mrb[4].mxu1 %v7095_v50 }
  0x56   :  { %v255_v47 = vld [vmem:[%s9169_s1 + $0x4e0] sm:$0xff]  ;;  %3265 = vmatprep.mubr.bf16.mxu1 %v7112_v61 }
  0x57   :  { %v507_v48 = vld [vmem:[%s9169_s1 + $0xcc0] sm:$0xff]  ;;  %v5722_v56 = vcombine.high %v251_v46, %v255_v47  ;;  %v5721_v2 = vcombine.low %v251_v46, %v255_v47  ;;  %3378 = vmatmul.mubr.bf16.gmra.mrb[4].mxu0 %v7101_v53 }
  0x58   :  { %v511_v49 = vld [vmem:[%s9169_s1 + $0xce0] sm:$0xff]  ;;  %3387 = vmatprep.mubr.bf16.mxu0 %v7121_v1 }
  0x59   :  { %v5978_v57 = vcombine.high %v507_v48, %v511_v49  ;;  %v259_v59 = vld [vmem:[%s9169_s1 + $0x500] sm:$0xff]  ;;  %3280 = vmatprep.subr.bf16.mxu1 %v5722_v56  ;;  %v5977_v4 = vcombine.low %v507_v48, %v511_v49 }
  0x5a   :  { %v263_v60 = vld [vmem:[%s9169_s1 + $0x520] sm:$0xff]  ;;  %3281 = vmatpush1.bf16.msra.mxu1 %v5721_v2 }
  0x5b   :  { %v515_v62 = vld [vmem:[%s9169_s1 + $0xd00] sm:$0xff]  ;;  %v5730_v5 = vcombine.high %v259_v59, %v263_v60  ;;  %3402 = vmatprep.subr.bf16.mxu0 %v5978_v57  ;;  %v5729_v15 = vcombine.low %v259_v59, %v263_v60 }
  0x5c   :  { %v519_v63 = vld [vmem:[%s9169_s1 + $0xd20] sm:$0xff]  ;;  %3403 = vmatpush1.bf16.msra.mxu0 %v5977_v4 }
  0x5d   :  { %v67_v3 = vld [vmem:[%s9170_s0 + $0x100] sm:$0xff]  ;;  %v5986_v7 = vcombine.high %v515_v62, %v519_v63  ;;  %3282 = vmatprep.subr.bf16.mxu1 %v5730_v5  ;;  %v5985_v19 = vcombine.low %v515_v62, %v519_v63 }
  0x5e   :  { %v71_v6 = vld [vmem:[%s9170_s0 + $0x120] sm:$0xff]  ;;  %v7143_v12 = vpack.c.bf16 %v67_v3, %v67_v3  ;;  %3283 = vmatpush1.bf16.msra.mxu1 %v5729_v15 }
  0x5f   :  { %v267_v8 = vld [vmem:[%s9169_s1 + $0x540] sm:$0xff]  ;;  %v7152_v16 = vpack.c.bf16 %v71_v6, %v71_v6  ;;  %3404 = vmatprep.subr.bf16.mxu0 %v5986_v7 }
  0x60   :  { %v271_v9 = vld [vmem:[%s9169_s1 + $0x560] sm:$0xff]  ;;  %3266 = vmatmul.mubr.bf16.gmra.mrb[8].mxu1 %v7143_v12  ;;  %3405 = vmatpush1.bf16.msra.mxu0 %v5985_v19 }
  0x61   :  { %v523_v10 = vld [vmem:[%s9169_s1 + $0xd40] sm:$0xff]  ;;  %v5738_v20 = vcombine.high %v267_v8, %v271_v9  ;;  %v5737_v30 = vcombine.low %v267_v8, %v271_v9  ;;  %3388 = vmatmul.mubr.bf16.gmra.mrb[8].mxu0 %v7152_v16  ;;  %3306 = vmatprep.mubr.bf16.mxu1 %v7166_v25 }
  0x62   :  { %v527_v11 = vld [vmem:[%s9169_s1 + $0xd60] sm:$0xff]  ;;  %3428 = vmatprep.mubr.bf16.mxu0 %v7175_v29 }
  0x63   :  { %v5994_v22 = vcombine.high %v523_v10, %v527_v11  ;;  %v275_v23 = vld [vmem:[%s9169_s1 + $0x580] sm:$0xff]  ;;  %3284 = vmatprep.subr.bf16.mxu1 %v5738_v20  ;;  %v5993_v31 = vcombine.low %v523_v10, %v527_v11 }
  0x64   :  { %v279_v24 = vld [vmem:[%s9169_s1 + $0x5a0] sm:$0xff]  ;;  %3285 = vmatpush1.bf16.msra.mxu1 %v5737_v30 }
  0x65   :  { %v531_v27 = vld [vmem:[%s9169_s1 + $0xd80] sm:$0xff]  ;;  %v5746_v32 = vcombine.high %v275_v23, %v279_v24  ;;  %3406 = vmatprep.subr.bf16.mxu0 %v5994_v22  ;;  %v5745_v40 = vcombine.low %v275_v23, %v279_v24 }
  0x66   :  { %v535_v28 = vld [vmem:[%s9169_s1 + $0xda0] sm:$0xff]  ;;  %3407 = vmatpush1.bf16.msra.mxu0 %v5993_v31 }
  0x67   :  { %v6002_v33 = vcombine.high %v531_v27, %v535_v28  ;;  %v283_v35 = vld [vmem:[%s9169_s1 + $0x5c0] sm:$0xff]  ;;  %3286 = vmatprep.subr.bf16.mxu1 %v5746_v32  ;;  %v6001_v41 = vcombine.low %v531_v27, %v535_v28 }
  0x68   :  { %v287_v36 = vld [vmem:[%s9169_s1 + $0x5e0] sm:$0xff]  ;;  %3287 = vmatpush1.bf16.msra.mxu1 %v5745_v40 }
  0x69   :  { %v539_v38 = vld [vmem:[%s9169_s1 + $0xdc0] sm:$0xff]  ;;  %v5754_v42 = vcombine.high %v283_v35, %v287_v36  ;;  %3408 = vmatprep.subr.bf16.mxu0 %v6002_v33  ;;  %v5753_v48 = vcombine.low %v283_v35, %v287_v36 }
  0x6a   :  { %v543_v39 = vld [vmem:[%s9169_s1 + $0xde0] sm:$0xff]  ;;  %3409 = vmatpush1.bf16.msra.mxu0 %v6001_v41 }
  0x6b   :  { %v6010_v43 = vcombine.high %v539_v38, %v543_v39  ;;  %v291_v44 = vld [vmem:[%s9169_s1 + $0x600] sm:$0xff]  ;;  %3288 = vmatprep.subr.bf16.mxu1 %v5754_v42  ;;  %v6009_v49 = vcombine.low %v539_v38, %v543_v39 }
  0x6c   :  { %v295_v45 = vld [vmem:[%s9169_s1 + $0x620] sm:$0xff]  ;;  %3289 = vmatpush1.bf16.msra.mxu1 %v5753_v48 }
  0x6d   :  { %v547_v46 = vld [vmem:[%s9169_s1 + $0xe00] sm:$0xff]  ;;  %v5762_v51 = vcombine.high %v291_v44, %v295_v45  ;;  %3410 = vmatprep.subr.bf16.mxu0 %v6010_v43  ;;  %v5761_v59 = vcombine.low %v291_v44, %v295_v45 }
  0x6e   :  { %v551_v47 = vld [vmem:[%s9169_s1 + $0xe20] sm:$0xff]  ;;  %3411 = vmatpush1.bf16.msra.mxu0 %v6009_v49 }
  0x6f   :  { %v6018_v52 = vcombine.high %v547_v46, %v551_v47  ;;  %v299_v54 = vld [vmem:[%s9169_s1 + $0x640] sm:$0xff]  ;;  %3290 = vmatprep.subr.bf16.mxu1 %v5762_v51  ;;  %v6017_v60 = vcombine.low %v547_v46, %v551_v47 }
  0x70   :  { %v303_v55 = vld [vmem:[%s9169_s1 + $0x660] sm:$0xff]  ;;  %3291 = vmatpush1.bf16.msra.mxu1 %v5761_v59 }
  0x71   :  { %v555_v56 = vld [vmem:[%s9169_s1 + $0xe40] sm:$0xff]  ;;  %v5770_v62 = vcombine.high %v299_v54, %v303_v55  ;;  %3412 = vmatprep.subr.bf16.mxu0 %v6018_v52  ;;  %v5769_v6 = vcombine.low %v299_v54, %v303_v55 }
  0x72   :  { %v559_v57 = vld [vmem:[%s9169_s1 + $0xe60] sm:$0xff]  ;;  %3413 = vmatpush1.bf16.msra.mxu0 %v6017_v60 }
  0x73   :  { %v6026_v63 = vcombine.high %v555_v56, %v559_v57  ;;  %v307_v2 = vld [vmem:[%s9169_s1 + $0x680] sm:$0xff]  ;;  %3292 = vmatprep.subr.bf16.mxu1 %v5770_v62  ;;  %v6025_v7 = vcombine.low %v555_v56, %v559_v57  ;;  %v100_v62 = vld [vmem:[%s9169_s1 + $0x8] sm:$0xff] }
  0x74   :  { %v311_v3 = vld [vmem:[%s9169_s1 + $0x6a0] sm:$0xff]  ;;  %3293 = vmatpush1.bf16.msra.mxu1 %v5769_v6  ;;  %v45_v6 = vld [vmem:[%s9170_s0 + $0x50] sm:$0xff] }
  0x75   :  { %v563_v4 = vld [vmem:[%s9169_s1 + $0xe80] sm:$0xff]  ;;  %v5778_v8 = vcombine.high %v307_v2, %v311_v3  ;;  %3414 = vmatprep.subr.bf16.mxu0 %v6026_v63  ;;  %v5777_v15 = vcombine.low %v307_v2, %v311_v3  ;;  %v104_v63 = vld [vmem:[%s9169_s1 + $0x28] sm:$0xff]  ;;  %v101_v2 = vld [vmem:[%s9169_s1 + $0x10] sm:$0xff] }
  0x76   :  { %v567_v5 = vld [vmem:[%s9169_s1 + $0xea0] sm:$0xff]  ;;  %3415 = vmatpush1.bf16.msra.mxu0 %v6025_v7  ;;  %v105_v3 = vld [vmem:[%s9169_s1 + $0x30] sm:$0xff] }
  0x77   :  { %v6034_v9 = vcombine.high %v563_v4, %v567_v5  ;;  %v315_v10 = vld [vmem:[%s9169_s1 + $0x6c0] sm:$0xff]  ;;  %3294 = vmatprep.subr.bf16.mxu1 %v5778_v8  ;;  %v6033_v17 = vcombine.low %v563_v4, %v567_v5  ;;  %v37_v5 = vld [vmem:[%s9170_s0 + $0x10] sm:$0xff]  ;;  %v5572_v8 = vcombine.high %v100_v62, %v104_v63 }
  0x78   :  { %v319_v11 = vld [vmem:[%s9169_s1 + $0x6e0] sm:$0xff]  ;;  %3295 = vmatpush1.bf16.msra.mxu1 %v5777_v15  ;;  %v109_v15 = vld [vmem:[%s9169_s1 + $0x50] sm:$0xff] }
  0x79   :  { %v571_v13 = vld [vmem:[%s9169_s1 + $0xec0] sm:$0xff]  ;;  %v5786_v18 = vcombine.high %v315_v10, %v319_v11  ;;  %3416 = vmatprep.subr.bf16.mxu0 %v6034_v9  ;;  %v5785_v27 = vcombine.low %v315_v10, %v319_v11  ;;  %v41_v9 = vld [vmem:[%s9170_s0 + $0x30] sm:$0xff]  ;;  %v5574_v11 = vcombine.high %v101_v2, %v105_v3 }
  0x7a   :  { %v575_v14 = vld [vmem:[%s9169_s1 + $0xee0] sm:$0xff]  ;;  %3417 = vmatpush1.bf16.msra.mxu0 %v6033_v17  ;;  %v49_v10 = vld [vmem:[%s9170_s0 + $0x70] sm:$0xff]  ;;  %v7321_v17 = vpack.c.bf16 %v45_v6, %v37_v5 }
  0x7b   :  { %v6042_v19 = vcombine.high %v571_v13, %v575_v14  ;;  %v323_v20 = vld [vmem:[%s9169_s1 + $0x700] sm:$0xff]  ;;  %3296 = vmatprep.subr.bf16.mxu1 %v5786_v18  ;;  %v6041_v28 = vcombine.low %v571_v13, %v575_v14  ;;  %v108_v13 = vld [vmem:[%s9169_s1 + $0x48] sm:$0xff]  ;;  %v113_v18 = vld [vmem:[%s9169_s1 + $0x70] sm:$0xff] }
  0x7c   :  { %v327_v22 = vld [vmem:[%s9169_s1 + $0x720] sm:$0xff]  ;;  %3297 = vmatpush1.bf16.msra.mxu1 %v5785_v27  ;;  %v112_v14 = vld [vmem:[%s9169_s1 + $0x68] sm:$0xff]  ;;  %v66_v27 = vld [vmem:[%s9170_s0 + $0xf8] sm:$0xff] }
  0x7d   :  { %v579_v23 = vld [vmem:[%s9169_s1 + $0xf00] sm:$0xff]  ;;  %v5794_v30 = vcombine.high %v323_v20, %v327_v22  ;;  %3418 = vmatprep.subr.bf16.mxu0 %v6042_v19  ;;  %v5793_v38 = vcombine.low %v323_v20, %v327_v22  ;;  %v54_v19 = vld [vmem:[%s9170_s0 + $0x98] sm:$0xff]  ;;  %v5571_v22 = vcombine.low %v100_v62, %v104_v63  ;;  %v133_v5 = vld [vmem:[%s9169_s1 + $0x110] sm:$0xff] }
  0x7e   :  { %v583_v24 = vld [vmem:[%s9169_s1 + $0xf20] sm:$0xff]  ;;  %3419 = vmatpush1.bf16.msra.mxu0 %v6041_v28  ;;  %v62_v20 = vld [vmem:[%s9170_s0 + $0xd8] sm:$0xff]  ;;  %v5573_v28 = vcombine.low %v101_v2, %v105_v3  ;;  %v132_v3 = vld [vmem:[%s9169_s1 + $0x108] sm:$0xff] }
  0x7f   :  { %v6050_v31 = vcombine.high %v579_v23, %v583_v24  ;;  %v331_v32 = vld [vmem:[%s9169_s1 + $0x740] sm:$0xff]  ;;  %3298 = vmatprep.subr.bf16.mxu1 %v5794_v30  ;;  %v6049_v39 = vcombine.low %v579_v23, %v583_v24  ;;  %v7332_v23 = vpack.c.bf16 %v49_v10, %v41_v9  ;;  %v58_v24 = vld [vmem:[%s9170_s0 + $0xb8] sm:$0xff]  ;;  %v5580_v30 = vcombine.high %v108_v13, %v112_v14  ;;  %v137_v6 = vld [vmem:[%s9169_s1 + $0x130] sm:$0xff] }
  0x80   :  { %v335_v33 = vld [vmem:[%s9169_s1 + $0x760] sm:$0xff]  ;;  %3299 = vmatpush1.bf16.msra.mxu1 %v5793_v38  ;;  %v121_v38 = vld [vmem:[%s9169_s1 + $0xb0] sm:$0xff] }
  0x81   :  { %v587_v35 = vld [vmem:[%s9169_s1 + $0xf40] sm:$0xff]  ;;  %v5802_v40 = vcombine.high %v331_v32, %v335_v33  ;;  %3420 = vmatprep.subr.bf16.mxu0 %v6050_v31  ;;  %v5801_v46 = vcombine.low %v331_v32, %v335_v33  ;;  %v5582_v31 = vcombine.high %v109_v15, %v113_v18  ;;  %v7340_v32 = vpack.c.bf16 %v62_v20, %v54_v19  ;;  %v116_v33 = vld [vmem:[%s9169_s1 + $0x88] sm:$0xff]  ;;  %v69_v9 = vld [vmem:[%s9170_s0 + $0x110] sm:$0xff] }
  0x82   :  { %v591_v36 = vld [vmem:[%s9169_s1 + $0xf60] sm:$0xff]  ;;  %3421 = vmatpush1.bf16.msra.mxu0 %v6049_v39  ;;  %v7355_v39 = vpack.c.bf16 %v66_v27, %v58_v24  ;;  %v7425_v19 = vpack.c.bf16 %v69_v9, %v69_v9  ;;  %v141_v20 = vld [vmem:[%s9169_s1 + $0x150] sm:$0xff] }
  0x83   :  { %v6058_v41 = vcombine.high %v587_v35, %v591_v36  ;;  %v339_v42 = vld [vmem:[%s9169_s1 + $0x780] sm:$0xff]  ;;  %3300 = vmatprep.subr.bf16.mxu1 %v5802_v40  ;;  %v6057_v47 = vcombine.low %v587_v35, %v591_v36  ;;  %v120_v35 = vld [vmem:[%s9169_s1 + $0xa8] sm:$0xff]  ;;  %v117_v36 = vld [vmem:[%s9169_s1 + $0x90] sm:$0xff]  ;;  %v5579_v40 = vcombine.low %v108_v13, %v112_v14  ;;  %v5606_v14 = vcombine.high %v133_v5, %v137_v6 }
  0x84   :  { %v343_v43 = vld [vmem:[%s9169_s1 + $0x7a0] sm:$0xff]  ;;  %3301 = vmatpush1.bf16.msra.mxu1 %v5801_v46  ;;  %v65_v46 = vld [vmem:[%s9170_s0 + $0xf0] sm:$0xff] }
  0x85   :  { %v595_v44 = vld [vmem:[%s9169_s1 + $0xf80] sm:$0xff]  ;;  %v5810_v48 = vcombine.high %v339_v42, %v343_v43  ;;  %3422 = vmatprep.subr.bf16.mxu0 %v6058_v41  ;;  %v5809_v56 = vcombine.low %v339_v42, %v343_v43  ;;  %v53_v41 = vld [vmem:[%s9170_s0 + $0x90] sm:$0xff]  ;;  %v5581_v43 = vcombine.low %v109_v15, %v113_v18  ;;  %v140_v15 = vld [vmem:[%s9169_s1 + $0x148] sm:$0xff] }
  0x86   :  { %v599_v45 = vld [vmem:[%s9169_s1 + $0xfa0] sm:$0xff]  ;;  %3423 = vmatpush1.bf16.msra.mxu0 %v6057_v47  ;;  %v61_v42 = vld [vmem:[%s9170_s0 + $0xd0] sm:$0xff]  ;;  %v5590_v47 = vcombine.high %v117_v36, %v121_v38  ;;  %v144_v18 = vld [vmem:[%s9169_s1 + $0x168] sm:$0xff] }
  0x87   :  { %v6066_v49 = vcombine.high %v595_v44, %v599_v45  ;;  %v347_v51 = vld [vmem:[%s9169_s1 + $0x7c0] sm:$0xff]  ;;  %3302 = vmatprep.subr.bf16.mxu1 %v5810_v48  ;;  %v6065_v57 = vcombine.low %v595_v44, %v599_v45  ;;  %v5588_v44 = vcombine.high %v116_v33, %v120_v35  ;;  %v57_v45 = vld [vmem:[%s9170_s0 + $0xb0] sm:$0xff]  ;;  %v124_v48 = vld [vmem:[%s9169_s1 + $0xc8] sm:$0xff] }
  0x88   :  { %v351_v52 = vld [vmem:[%s9169_s1 + $0x7e0] sm:$0xff]  ;;  %3303 = vmatpush1.bf16.msra.mxu1 %v5809_v56  ;;  %v5587_v56 = vcombine.low %v116_v33, %v120_v35  ;;  %v73_v13 = vld [vmem:[%s9170_s0 + $0x130] sm:$0xff]  ;;  %v148_v33 = vld [vmem:[%s9169_s1 + $0x188] sm:$0xff] }
  0x89   :  { %v603_v54 = vld [vmem:[%s9169_s1 + $0xfc0] sm:$0xff]  ;;  %v5818_v59 = vcombine.high %v347_v51, %v351_v52  ;;  %3424 = vmatprep.subr.bf16.mxu0 %v6066_v49  ;;  %v5817_v4 = vcombine.low %v347_v51, %v351_v52  ;;  %v128_v49 = vld [vmem:[%s9169_s1 + $0xe8] sm:$0xff]  ;;  %v7377_v51 = vpack.c.bf16 %v61_v42, %v53_v41  ;;  %v125_v52 = vld [vmem:[%s9169_s1 + $0xd0] sm:$0xff]  ;;  %v7434_v27 = vpack.c.bf16 %v73_v13, %v73_v13 }
  0x8a   :  { %v607_v55 = vld [vmem:[%s9169_s1 + $0xfe0] sm:$0xff]  ;;  %3425 = vmatpush1.bf16.msra.mxu0 %v6065_v57  ;;  %v7389_v57 = vpack.c.bf16 %v65_v46, %v57_v45  ;;  %v5596_v62 = vcombine.high %v124_v48, %v128_v49  ;;  %v152_v35 = vld [vmem:[%s9169_s1 + $0x1a8] sm:$0xff]  ;;  %v157_v46 = vld [vmem:[%s9169_s1 + $0x1d0] sm:$0xff] }
  0x8b   :  { %v6074_v60 = vcombine.high %v603_v54, %v607_v55  ;;  %3304 = vmatprep.subr.bf16.mxu1 %v5818_v59  ;;  %v6073_v7 = vcombine.low %v603_v54, %v607_v55  ;;  %v129_v54 = vld [vmem:[%s9169_s1 + $0xf0] sm:$0xff]  ;;  %v70_v55 = vld [vmem:[%s9170_s0 + $0x118] sm:$0xff]  ;;  %v5620_v42 = vcombine.high %v148_v33, %v152_v35  ;;  %v160_v45 = vld [vmem:[%s9169_s1 + $0x1e8] sm:$0xff] }
  0x8c   :  { %3305 = vmatpush1.bf16.msra.mxu1 %v5817_v4  ;;  %v74_v59 = vld [vmem:[%s9170_s0 + $0x138] sm:$0xff]  ;;  %v5598_v63 = vcombine.high %v125_v52, %v129_v54  ;;  %v7394_v2 = vpack.c.bf16 %v70_v55, %v70_v55  ;;  %v136_v4 = vld [vmem:[%s9169_s1 + $0x128] sm:$0xff]  ;;  %v5597_v10 = vcombine.low %v125_v52, %v129_v54  ;;  %v177_v9 = vld [vmem:[%s9169_s1 + $0x270] sm:$0xff] }
  0x8d   :  { %3426 = vmatprep.subr.bf16.mxu0 %v6074_v60  ;;  %3457 = vmatprep.subr.bf16.mxu1 %v5572_v8  ;;  %v5589_v60 = vcombine.low %v117_v36, %v121_v38  ;;  %v5595_v8 = vcombine.low %v124_v48, %v128_v49  ;;  %v5603_v24 = vcombine.low %v132_v3, %v136_v4  ;;  %v149_v36 = vld [vmem:[%s9169_s1 + $0x190] sm:$0xff]  ;;  %v164_v55 = vld [vmem:[%s9169_s1 + $0x208] sm:$0xff] }
  0x8e   :  { %3427 = vmatpush1.bf16.msra.mxu0 %v6073_v7  ;;  %v7409_v7 = vpack.c.bf16 %v74_v59, %v74_v59  ;;  %v153_v38 = vld [vmem:[%s9169_s1 + $0x1b0] sm:$0xff]  ;;  %v5619_v48 = vcombine.low %v148_v33, %v152_v35  ;;  %v188_v33 = vld [vmem:[%s9169_s1 + $0x2c8] sm:$0xff] }
  0x8f   :  { %3701 = vmatprep.subr.bf16.mxu0 %v5574_v11  ;;  %3307 = vmatmul.mubr.bf16.vlgmr.msra.gmra.mrb[0].mxu1 %v7321_v17  ;;  %v5604_v11 = vcombine.high %v132_v3, %v136_v4  ;;  %v5621_v49 = vcombine.low %v149_v36, %v153_v38  ;;  %v165_v59 = vld [vmem:[%s9169_s1 + $0x210] sm:$0xff]  ;;  %v192_v35 = vld [vmem:[%s9169_s1 + $0x2e8] sm:$0xff] }
  0x90   :  { %3458 = vmatpush1.bf16.msra.mxu1 %v5571_v22  ;;  %3316 = vmatprep.mubr.bf16.mxu1 %v7340_v32  ;;  %v145_v22 = vld [vmem:[%s9169_s1 + $0x170] sm:$0xff] }
  0x91   :  { %3429 = vmatmul.mubr.bf16.vlgmr.msra.gmra.mrb[0].mxu0 %v7332_v23  ;;  %3459 = vmatprep.subr.bf16.mxu1 %v5580_v30  ;;  %v5612_v30 = vcombine.high %v140_v15, %v144_v18  ;;  %v5613_v41 = vcombine.low %v141_v20, %v145_v22 }
  0x92   :  { %3702 = vmatpush1.bf16.msra.mxu0 %v5573_v28  ;;  %3438 = vmatprep.mubr.bf16.mxu0 %v7355_v39  ;;  %v5605_v28 = vcombine.low %v133_v5, %v137_v6  ;;  %v172_v5 = vld [vmem:[%s9169_s1 + $0x248] sm:$0xff] }
  0x93   :  { %3703 = vmatprep.subr.bf16.mxu0 %v5582_v31  ;;  %v5614_v31 = vcombine.high %v141_v20, %v145_v22  ;;  %v176_v6 = vld [vmem:[%s9169_s1 + $0x268] sm:$0xff]  ;;  %v181_v20 = vld [vmem:[%s9169_s1 + $0x290] sm:$0xff] }
  0x94   :  { %3460 = vmatpush1.bf16.msra.mxu1 %v5579_v40  ;;  %v5611_v40 = vcombine.low %v140_v15, %v144_v18  ;;  %v5644_v13 = vcombine.high %v172_v5, %v176_v6  ;;  %v180_v15 = vld [vmem:[%s9169_s1 + $0x288] sm:$0xff]  ;;  %v185_v22 = vld [vmem:[%s9169_s1 + $0x2b0] sm:$0xff] }
  0x95   :  { %3461 = vmatprep.subr.bf16.mxu1 %v5588_v44  ;;  %v156_v44 = vld [vmem:[%s9169_s1 + $0x1c8] sm:$0xff] }
  0x96   :  { %3704 = vmatpush1.bf16.msra.mxu0 %v5581_v43  ;;  %v5622_v43 = vcombine.high %v149_v36, %v153_v38  ;;  %v5628_v52 = vcombine.high %v156_v44, %v160_v45  ;;  %v184_v18 = vld [vmem:[%s9169_s1 + $0x2a8] sm:$0xff]  ;;  %v189_v36 = vld [vmem:[%s9169_s1 + $0x2d0] sm:$0xff] }
  0x97   :  { %3705 = vmatprep.subr.bf16.mxu0 %v5590_v47  ;;  %3317 = vmatmul.mubr.bf16.gmra.mrb[4].mxu1 %v7377_v51  ;;  %v161_v47 = vld [vmem:[%s9169_s1 + $0x1f0] sm:$0xff] }
  0x98   :  { %3462 = vmatpush1.bf16.msra.mxu1 %v5587_v56  ;;  %3326 = vmatprep.mubr.bf16.mxu1 %v7394_v2  ;;  %v5630_v54 = vcombine.high %v157_v46, %v161_v47  ;;  %v168_v56 = vld [vmem:[%s9169_s1 + $0x228] sm:$0xff]  ;;  %v193_v38 = vld [vmem:[%s9169_s1 + $0x2f0] sm:$0xff] }
  0x99   :  { %3439 = vmatmul.mubr.bf16.gmra.mrb[4].mxu0 %v7389_v57  ;;  %3463 = vmatprep.subr.bf16.mxu1 %v5596_v62  ;;  %v5627_v62 = vcombine.low %v156_v44, %v160_v45  ;;  %v5636_v3 = vcombine.high %v164_v55, %v168_v56  ;;  %v196_v44 = vld [vmem:[%s9169_s1 + $0x308] sm:$0xff] }
  0x9a   :  { %3706 = vmatpush1.bf16.msra.mxu0 %v5589_v60  ;;  %3448 = vmatprep.mubr.bf16.mxu0 %v7409_v7  ;;  %v169_v60 = vld [vmem:[%s9169_s1 + $0x230] sm:$0xff]  ;;  %v200_v45 = vld [vmem:[%s9169_s1 + $0x328] sm:$0xff] }
  0x9b   :  { %3707 = vmatprep.subr.bf16.mxu0 %v5598_v63  ;;  %v5629_v63 = vcombine.low %v157_v46, %v161_v47  ;;  %v5638_v4 = vcombine.high %v165_v59, %v169_v60  ;;  %v197_v46 = vld [vmem:[%s9169_s1 + $0x310] sm:$0xff] }
  0x9c   :  { %3464 = vmatpush1.bf16.msra.mxu1 %v5595_v8  ;;  %v173_v8 = vld [vmem:[%s9169_s1 + $0x250] sm:$0xff] }
  0x9d   :  { %3465 = vmatprep.subr.bf16.mxu1 %v5604_v11  ;;  %v5637_v11 = vcombine.low %v165_v59, %v169_v60  ;;  %v201_v47 = vld [vmem:[%s9169_s1 + $0x330] sm:$0xff] }
  0x9e   :  { %3708 = vmatpush1.bf16.msra.mxu0 %v5597_v10  ;;  %v5635_v10 = vcombine.low %v164_v55, %v168_v56  ;;  %v204_v55 = vld [vmem:[%s9169_s1 + $0x348] sm:$0xff]  ;;  %v205_v59 = vld [vmem:[%s9169_s1 + $0x350] sm:$0xff] }
  0x9f   :  { %3709 = vmatprep.subr.bf16.mxu0 %v5606_v14  ;;  %3327 = vmatmul.mubr.bf16.gmra.mrb[8].mxu1 %v7425_v19  ;;  %v5646_v14 = vcombine.high %v173_v8, %v177_v9  ;;  %v208_v56 = vld [vmem:[%s9169_s1 + $0x368] sm:$0xff]  ;;  %v209_v60 = vld [vmem:[%s9169_s1 + $0x370] sm:$0xff] }
  0xa0   :  { %3466 = vmatpush1.bf16.msra.mxu1 %v5603_v24  ;;  %3489 = vmatprep.mubr.bf16.mxu1 %v6886_v58  ;;  %v5643_v24 = vcombine.low %v172_v5, %v176_v6  ;;  %v212_v5 = vld [vmem:[%s9169_s1 + $0x388] sm:$0xff] }
  0xa1   :  { %3449 = vmatmul.mubr.bf16.gmra.mrb[8].mxu0 %v7434_v27  ;;  %3467 = vmatprep.subr.bf16.mxu1 %v5612_v30  ;;  %v5652_v30 = vcombine.high %v180_v15, %v184_v18  ;;  %v216_v6 = vld [vmem:[%s9169_s1 + $0x3a8] sm:$0xff] }
  0xa2   :  { %3710 = vmatpush1.bf16.msra.mxu0 %v5605_v28  ;;  %3733 = vmatprep.mubr.bf16.mxu0 %v6886_v58  ;;  %v5645_v28 = vcombine.low %v173_v8, %v177_v9  ;;  %v213_v8 = vld [vmem:[%s9169_s1 + $0x390] sm:$0xff] }
  0xa3   :  { %3711 = vmatprep.subr.bf16.mxu0 %v5614_v31  ;;  %v5654_v31 = vcombine.high %v181_v20, %v185_v22  ;;  %v217_v9 = vld [vmem:[%s9169_s1 + $0x3b0] sm:$0xff] }
  0xa4   :  { %3468 = vmatpush1.bf16.msra.mxu1 %v5611_v40  ;;  %v5651_v40 = vcombine.low %v180_v15, %v184_v18  ;;  %v220_v15 = vld [vmem:[%s9169_s1 + $0x3c8] sm:$0xff] }
  0xa5   :  { %3469 = vmatprep.subr.bf16.mxu1 %v5620_v42  ;;  %v5660_v42 = vcombine.high %v188_v33, %v192_v35  ;;  %v224_v18 = vld [vmem:[%s9169_s1 + $0x3e8] sm:$0xff] }
  0xa6   :  { %3712 = vmatpush1.bf16.msra.mxu0 %v5613_v41  ;;  %v5653_v41 = vcombine.low %v181_v20, %v185_v22  ;;  %v221_v20 = vld [vmem:[%s9169_s1 + $0x3d0] sm:$0xff] }
  0xa7   :  { %3713 = vmatprep.subr.bf16.mxu0 %v5622_v43  ;;  %v5662_v43 = vcombine.high %v189_v36, %v193_v38  ;;  %v225_v22 = vld [vmem:[%s9169_s1 + $0x3f0] sm:$0xff] }
  0xa8   :  { %3470 = vmatpush1.bf16.msra.mxu1 %v5619_v48  ;;  %v5659_v48 = vcombine.low %v188_v33, %v192_v35  ;;  %v228_v33 = vld [vmem:[%s9169_s1 + $0x408] sm:$0xff] }
  0xa9   :  { %3471 = vmatprep.subr.bf16.mxu1 %v5628_v52  ;;  %v5668_v52 = vcombine.high %v196_v44, %v200_v45  ;;  %v232_v35 = vld [vmem:[%s9169_s1 + $0x428] sm:$0xff] }
  0xaa   :  { %3714 = vmatpush1.bf16.msra.mxu0 %v5621_v49  ;;  %v5661_v49 = vcombine.low %v189_v36, %v193_v38  ;;  %v229_v36 = vld [vmem:[%s9169_s1 + $0x410] sm:$0xff] }
  0xab   :  { %3715 = vmatprep.subr.bf16.mxu0 %v5630_v54  ;;  %v5670_v54 = vcombine.high %v197_v46, %v201_v47  ;;  %v233_v38 = vld [vmem:[%s9169_s1 + $0x430] sm:$0xff] }
  0xac   :  { %3472 = vmatpush1.bf16.msra.mxu1 %v5627_v62  ;;  %v5667_v62 = vcombine.low %v196_v44, %v200_v45  ;;  %v236_v44 = vld [vmem:[%s9169_s1 + $0x448] sm:$0xff] }
  0xad   :  { %3473 = vmatprep.subr.bf16.mxu1 %v5636_v3  ;;  %v5676_v3 = vcombine.high %v204_v55, %v208_v56  ;;  %v240_v45 = vld [vmem:[%s9169_s1 + $0x468] sm:$0xff] }
  0xae   :  { %3716 = vmatpush1.bf16.msra.mxu0 %v5629_v63  ;;  %v5669_v63 = vcombine.low %v197_v46, %v201_v47  ;;  %v237_v46 = vld [vmem:[%s9169_s1 + $0x450] sm:$0xff] }
  0xaf   :  { %3717 = vmatprep.subr.bf16.mxu0 %v5638_v4  ;;  %v5678_v4 = vcombine.high %v205_v59, %v209_v60  ;;  %v241_v47 = vld [vmem:[%s9169_s1 + $0x470] sm:$0xff] }
  0xb0   :  { %3474 = vmatpush1.bf16.msra.mxu1 %v5635_v10  ;;  %v5675_v10 = vcombine.low %v204_v55, %v208_v56  ;;  %v244_v55 = vld [vmem:[%s9169_s1 + $0x488] sm:$0xff] }
  0xb1   :  { %3475 = vmatprep.subr.bf16.mxu1 %v5644_v13  ;;  %v5684_v13 = vcombine.high %v212_v5, %v216_v6  ;;  %v248_v56 = vld [vmem:[%s9169_s1 + $0x4a8] sm:$0xff] }
  0xb2   :  { %3718 = vmatpush1.bf16.msra.mxu0 %v5637_v11  ;;  %v5677_v11 = vcombine.low %v205_v59, %v209_v60  ;;  %v245_v59 = vld [vmem:[%s9169_s1 + $0x490] sm:$0xff] }
  0xb3   :  { %3719 = vmatprep.subr.bf16.mxu0 %v5646_v14  ;;  %v5686_v14 = vcombine.high %v213_v8, %v217_v9  ;;  %v249_v60 = vld [vmem:[%s9169_s1 + $0x4b0] sm:$0xff] }
  0xb4   :  { %3476 = vmatpush1.bf16.msra.mxu1 %v5643_v24  ;;  %v5683_v24 = vcombine.low %v212_v5, %v216_v6  ;;  %v252_v5 = vld [vmem:[%s9169_s1 + $0x4c8] sm:$0xff] }
  0xb5   :  { %3477 = vmatprep.subr.bf16.mxu1 %v5652_v30  ;;  %v5692_v30 = vcombine.high %v220_v15, %v224_v18  ;;  %v256_v6 = vld [vmem:[%s9169_s1 + $0x4e8] sm:$0xff] }
  0xb6   :  { %3720 = vmatpush1.bf16.msra.mxu0 %v5645_v28  ;;  %v5685_v28 = vcombine.low %v213_v8, %v217_v9  ;;  %v253_v8 = vld [vmem:[%s9169_s1 + $0x4d0] sm:$0xff] }
  0xb7   :  { %3721 = vmatprep.subr.bf16.mxu0 %v5654_v31  ;;  %v5694_v31 = vcombine.high %v221_v20, %v225_v22  ;;  %v257_v9 = vld [vmem:[%s9169_s1 + $0x4f0] sm:$0xff] }
  0xb8   :  { %3478 = vmatpush1.bf16.msra.mxu1 %v5651_v40  ;;  %v5691_v40 = vcombine.low %v220_v15, %v224_v18  ;;  %v260_v15 = vld [vmem:[%s9169_s1 + $0x508] sm:$0xff] }
  0xb9   :  { %3479 = vmatprep.subr.bf16.mxu1 %v5660_v42  ;;  %v5700_v42 = vcombine.high %v228_v33, %v232_v35  ;;  %v264_v18 = vld [vmem:[%s9169_s1 + $0x528] sm:$0xff] }
  0xba   :  { %3722 = vmatpush1.bf16.msra.mxu0 %v5653_v41  ;;  %v5693_v41 = vcombine.low %v221_v20, %v225_v22  ;;  %v261_v20 = vld [vmem:[%s9169_s1 + $0x510] sm:$0xff] }
  0xbb   :  { %3723 = vmatprep.subr.bf16.mxu0 %v5662_v43  ;;  %v5702_v43 = vcombine.high %v229_v36, %v233_v38  ;;  %v265_v22 = vld [vmem:[%s9169_s1 + $0x530] sm:$0xff] }
  0xbc   :  { %3480 = vmatpush1.bf16.msra.mxu1 %v5659_v48  ;;  %v5699_v48 = vcombine.low %v228_v33, %v232_v35  ;;  %v268_v33 = vld [vmem:[%s9169_s1 + $0x548] sm:$0xff] }
  0xbd   :  { %3481 = vmatprep.subr.bf16.mxu1 %v5668_v52  ;;  %v5708_v52 = vcombine.high %v236_v44, %v240_v45  ;;  %v272_v35 = vld [vmem:[%s9169_s1 + $0x568] sm:$0xff] }
  0xbe   :  { %3724 = vmatpush1.bf16.msra.mxu0 %v5661_v49  ;;  %v5701_v49 = vcombine.low %v229_v36, %v233_v38  ;;  %v269_v36 = vld [vmem:[%s9169_s1 + $0x550] sm:$0xff] }
  0xbf   :  { %3725 = vmatprep.subr.bf16.mxu0 %v5670_v54  ;;  %v5710_v54 = vcombine.high %v237_v46, %v241_v47  ;;  %v273_v38 = vld [vmem:[%s9169_s1 + $0x570] sm:$0xff] }
  0xc0   :  { %3482 = vmatpush1.bf16.msra.mxu1 %v5667_v62  ;;  %v5707_v62 = vcombine.low %v236_v44, %v240_v45  ;;  %v276_v44 = vld [vmem:[%s9169_s1 + $0x588] sm:$0xff] }
  0xc1   :  { %3483 = vmatprep.subr.bf16.mxu1 %v5676_v3  ;;  %v5716_v3 = vcombine.high %v244_v55, %v248_v56  ;;  %v280_v45 = vld [vmem:[%s9169_s1 + $0x5a8] sm:$0xff] }
  0xc2   :  { %3726 = vmatpush1.bf16.msra.mxu0 %v5669_v63  ;;  %v5709_v63 = vcombine.low %v237_v46, %v241_v47  ;;  %v277_v46 = vld [vmem:[%s9169_s1 + $0x590] sm:$0xff] }
  0xc3   :  { %3727 = vmatprep.subr.bf16.mxu0 %v5678_v4  ;;  %v5718_v4 = vcombine.high %v245_v59, %v249_v60  ;;  %v281_v47 = vld [vmem:[%s9169_s1 + $0x5b0] sm:$0xff] }
  0xc4   :  { %3484 = vmatpush1.bf16.msra.mxu1 %v5675_v10  ;;  %v5715_v10 = vcombine.low %v244_v55, %v248_v56  ;;  %v284_v55 = vld [vmem:[%s9169_s1 + $0x5c8] sm:$0xff] }
  0xc5   :  { %3485 = vmatprep.subr.bf16.mxu1 %v5684_v13  ;;  %v5724_v13 = vcombine.high %v252_v5, %v256_v6  ;;  %v288_v56 = vld [vmem:[%s9169_s1 + $0x5e8] sm:$0xff] }
  0xc6   :  { %3728 = vmatpush1.bf16.msra.mxu0 %v5677_v11  ;;  %v5717_v11 = vcombine.low %v245_v59, %v249_v60  ;;  %v285_v59 = vld [vmem:[%s9169_s1 + $0x5d0] sm:$0xff] }
  0xc7   :  { %3729 = vmatprep.subr.bf16.mxu0 %v5686_v14  ;;  %v5726_v14 = vcombine.high %v253_v8, %v257_v9  ;;  %v289_v60 = vld [vmem:[%s9169_s1 + $0x5f0] sm:$0xff] }
  0xc8   :  { %3486 = vmatpush1.bf16.msra.mxu1 %v5683_v24  ;;  %v5723_v24 = vcombine.low %v252_v5, %v256_v6  ;;  %v292_v5 = vld [vmem:[%s9169_s1 + $0x608] sm:$0xff] }
  0xc9   :  { %3487 = vmatprep.subr.bf16.mxu1 %v5692_v30  ;;  %v5732_v30 = vcombine.high %v260_v15, %v264_v18  ;;  %v296_v6 = vld [vmem:[%s9169_s1 + $0x628] sm:$0xff] }
  0xca   :  { %3730 = vmatpush1.bf16.msra.mxu0 %v5685_v28  ;;  %v5725_v28 = vcombine.low %v253_v8, %v257_v9  ;;  %v293_v8 = vld [vmem:[%s9169_s1 + $0x610] sm:$0xff] }
  0xcb   :  { %3731 = vmatprep.subr.bf16.mxu0 %v5694_v31  ;;  %v5734_v31 = vcombine.high %v261_v20, %v265_v22  ;;  %v297_v9 = vld [vmem:[%s9169_s1 + $0x630] sm:$0xff] }
  0xcc   :  { %3488 = vmatpush1.bf16.msra.mxu1 %v5691_v40  ;;  %v5731_v40 = vcombine.low %v260_v15, %v264_v18  ;;  %v300_v15 = vld [vmem:[%s9169_s1 + $0x648] sm:$0xff] }
  0xcd   :  { %3518 = vmatprep.subr.bf16.mxu1 %v5700_v42  ;;  %v5740_v42 = vcombine.high %v268_v33, %v272_v35  ;;  %v304_v18 = vld [vmem:[%s9169_s1 + $0x668] sm:$0xff] }
  0xce   :  { %3732 = vmatpush1.bf16.msra.mxu0 %v5693_v41  ;;  %v5733_v41 = vcombine.low %v261_v20, %v265_v22  ;;  %v301_v20 = vld [vmem:[%s9169_s1 + $0x650] sm:$0xff] }
  0xcf   :  { %3762 = vmatprep.subr.bf16.mxu0 %v5702_v43  ;;  %3490 = vmatmul.mubr.bf16.vlgmr.msra.gmra.mrb[12].mxu1 %v7033_v21  ;;  %v5742_v43 = vcombine.high %v269_v36, %v273_v38  ;;  %v305_v22 = vld [vmem:[%s9169_s1 + $0x670] sm:$0xff] }
  0xd0   :  { %3519 = vmatpush1.bf16.msra.mxu1 %v5699_v48  ;;  %3499 = vmatprep.mubr.bf16.mxu1 %v7058_v34  ;;  %v5739_v48 = vcombine.low %v268_v33, %v272_v35  ;;  %v308_v33 = vld [vmem:[%s9169_s1 + $0x688] sm:$0xff] }
  0xd1   :  { %3734 = vmatmul.mubr.bf16.vlgmr.msra.gmra.mrb[12].mxu0 %v7033_v21  ;;  %3520 = vmatprep.subr.bf16.mxu1 %v5708_v52  ;;  %v5748_v52 = vcombine.high %v276_v44, %v280_v45  ;;  %v312_v35 = vld [vmem:[%s9169_s1 + $0x6a8] sm:$0xff] }
  0xd2   :  { %3763 = vmatpush1.bf16.msra.mxu0 %v5701_v49  ;;  %3743 = vmatprep.mubr.bf16.mxu0 %v7058_v34  ;;  %v5741_v49 = vcombine.low %v269_v36, %v273_v38  ;;  %v309_v36 = vld [vmem:[%s9169_s1 + $0x690] sm:$0xff] }
  0xd3   :  { %3764 = vmatprep.subr.bf16.mxu0 %v5710_v54  ;;  %v5750_v54 = vcombine.high %v277_v46, %v281_v47  ;;  %v313_v38 = vld [vmem:[%s9169_s1 + $0x6b0] sm:$0xff] }
  0xd4   :  { %3521 = vmatpush1.bf16.msra.mxu1 %v5707_v62  ;;  %v5747_v62 = vcombine.low %v276_v44, %v280_v45  ;;  %v316_v44 = vld [vmem:[%s9169_s1 + $0x6c8] sm:$0xff] }
  0xd5   :  { %3522 = vmatprep.subr.bf16.mxu1 %v5716_v3  ;;  %v5756_v3 = vcombine.high %v284_v55, %v288_v56  ;;  %v320_v45 = vld [vmem:[%s9169_s1 + $0x6e8] sm:$0xff] }
  0xd6   :  { %3765 = vmatpush1.bf16.msra.mxu0 %v5709_v63  ;;  %v5749_v63 = vcombine.low %v277_v46, %v281_v47  ;;  %v317_v46 = vld [vmem:[%s9169_s1 + $0x6d0] sm:$0xff] }
  0xd7   :  { %3766 = vmatprep.subr.bf16.mxu0 %v5718_v4  ;;  %3500 = vmatmul.mubr.bf16.gmra.mrb[16].mxu1 %v7095_v50  ;;  %v5758_v4 = vcombine.high %v285_v59, %v289_v60  ;;  %v321_v47 = vld [vmem:[%s9169_s1 + $0x6f0] sm:$0xff] }
  0xd8   :  { %3523 = vmatpush1.bf16.msra.mxu1 %v5715_v10  ;;  %3509 = vmatprep.mubr.bf16.mxu1 %v7112_v61  ;;  %v5755_v10 = vcombine.low %v284_v55, %v288_v56  ;;  %v324_v55 = vld [vmem:[%s9169_s1 + $0x708] sm:$0xff] }
  0xd9   :  { %3744 = vmatmul.mubr.bf16.gmra.mrb[16].mxu0 %v7095_v50  ;;  %3524 = vmatprep.subr.bf16.mxu1 %v5724_v13  ;;  %v5764_v13 = vcombine.high %v292_v5, %v296_v6  ;;  %v328_v56 = vld [vmem:[%s9169_s1 + $0x728] sm:$0xff] }
  0xda   :  { %3767 = vmatpush1.bf16.msra.mxu0 %v5717_v11  ;;  %3753 = vmatprep.mubr.bf16.mxu0 %v7112_v61  ;;  %v5757_v11 = vcombine.low %v285_v59, %v289_v60  ;;  %v325_v59 = vld [vmem:[%s9169_s1 + $0x710] sm:$0xff] }
  0xdb   :  { %3768 = vmatprep.subr.bf16.mxu0 %v5726_v14  ;;  %v5766_v14 = vcombine.high %v293_v8, %v297_v9  ;;  %v329_v60 = vld [vmem:[%s9169_s1 + $0x730] sm:$0xff] }
  0xdc   :  { %3525 = vmatpush1.bf16.msra.mxu1 %v5723_v24  ;;  %v5763_v24 = vcombine.low %v292_v5, %v296_v6  ;;  %v332_v5 = vld [vmem:[%s9169_s1 + $0x748] sm:$0xff] }
  0xdd   :  { %3526 = vmatprep.subr.bf16.mxu1 %v5732_v30  ;;  %v5772_v30 = vcombine.high %v300_v15, %v304_v18  ;;  %v336_v6 = vld [vmem:[%s9169_s1 + $0x768] sm:$0xff] }
  0xde   :  { %3769 = vmatpush1.bf16.msra.mxu0 %v5725_v28  ;;  %v5765_v28 = vcombine.low %v293_v8, %v297_v9  ;;  %v333_v8 = vld [vmem:[%s9169_s1 + $0x750] sm:$0xff] }
  0xdf   :  { %3770 = vmatprep.subr.bf16.mxu0 %v5734_v31  ;;  %3510 = vmatmul.mubr.bf16.gmra.mrb[20].mxu1 %v7143_v12  ;;  %v5774_v31 = vcombine.high %v301_v20, %v305_v22  ;;  %v337_v9 = vld [vmem:[%s9169_s1 + $0x770] sm:$0xff] }
  0xe0   :  { %3527 = vmatpush1.bf16.msra.mxu1 %v5731_v40  ;;  %3550 = vmatprep.mubr.bf16.mxu1 %v7166_v25  ;;  %v5771_v40 = vcombine.low %v300_v15, %v304_v18  ;;  %v340_v15 = vld [vmem:[%s9169_s1 + $0x788] sm:$0xff] }
  0xe1   :  { %3754 = vmatmul.mubr.bf16.gmra.mrb[20].mxu0 %v7143_v12  ;;  %3528 = vmatprep.subr.bf16.mxu1 %v5740_v42  ;;  %v5780_v42 = vcombine.high %v308_v33, %v312_v35  ;;  %v344_v18 = vld [vmem:[%s9169_s1 + $0x7a8] sm:$0xff] }
  0xe2   :  { %3771 = vmatpush1.bf16.msra.mxu0 %v5733_v41  ;;  %3794 = vmatprep.mubr.bf16.mxu0 %v7166_v25  ;;  %v5773_v41 = vcombine.low %v301_v20, %v305_v22  ;;  %v341_v20 = vld [vmem:[%s9169_s1 + $0x790] sm:$0xff] }
  0xe3   :  { %3772 = vmatprep.subr.bf16.mxu0 %v5742_v43  ;;  %v5782_v43 = vcombine.high %v309_v36, %v313_v38  ;;  %v345_v22 = vld [vmem:[%s9169_s1 + $0x7b0] sm:$0xff] }
  0xe4   :  { %3529 = vmatpush1.bf16.msra.mxu1 %v5739_v48  ;;  %v5779_v48 = vcombine.low %v308_v33, %v312_v35  ;;  %v348_v33 = vld [vmem:[%s9169_s1 + $0x7c8] sm:$0xff] }
  0xe5   :  { %3530 = vmatprep.subr.bf16.mxu1 %v5748_v52  ;;  %v5788_v52 = vcombine.high %v316_v44, %v320_v45  ;;  %v352_v35 = vld [vmem:[%s9169_s1 + $0x7e8] sm:$0xff] }
  0xe6   :  { %3773 = vmatpush1.bf16.msra.mxu0 %v5741_v49  ;;  %v5781_v49 = vcombine.low %v309_v36, %v313_v38  ;;  %v349_v36 = vld [vmem:[%s9169_s1 + $0x7d0] sm:$0xff] }
  0xe7   :  { %3774 = vmatprep.subr.bf16.mxu0 %v5750_v54  ;;  %v5790_v54 = vcombine.high %v317_v46, %v321_v47  ;;  %v353_v38 = vld [vmem:[%s9169_s1 + $0x7f0] sm:$0xff] }
  0xe8   :  { %3531 = vmatpush1.bf16.msra.mxu1 %v5747_v62  ;;  %v5787_v62 = vcombine.low %v316_v44, %v320_v45  ;;  %v356_v44 = vld [vmem:[%s9169_s1 + $0x808] sm:$0xff] }
  0xe9   :  { %3532 = vmatprep.subr.bf16.mxu1 %v5756_v3  ;;  %v5796_v3 = vcombine.high %v324_v55, %v328_v56  ;;  %v360_v45 = vld [vmem:[%s9169_s1 + $0x828] sm:$0xff] }
  0xea   :  { %3775 = vmatpush1.bf16.msra.mxu0 %v5749_v63  ;;  %v5789_v63 = vcombine.low %v317_v46, %v321_v47  ;;  %v357_v46 = vld [vmem:[%s9169_s1 + $0x810] sm:$0xff] }
  0xeb   :  { %3776 = vmatprep.subr.bf16.mxu0 %v5758_v4  ;;  %v5798_v4 = vcombine.high %v325_v59, %v329_v60  ;;  %v361_v47 = vld [vmem:[%s9169_s1 + $0x830] sm:$0xff] }
  0xec   :  { %3533 = vmatpush1.bf16.msra.mxu1 %v5755_v10  ;;  %v5795_v10 = vcombine.low %v324_v55, %v328_v56  ;;  %v364_v55 = vld [vmem:[%s9169_s1 + $0x848] sm:$0xff] }
  0xed   :  { %3534 = vmatprep.subr.bf16.mxu1 %v5764_v13  ;;  %v5804_v13 = vcombine.high %v332_v5, %v336_v6  ;;  %v368_v56 = vld [vmem:[%s9169_s1 + $0x868] sm:$0xff] }
  0xee   :  { %3777 = vmatpush1.bf16.msra.mxu0 %v5757_v11  ;;  %v5797_v11 = vcombine.low %v325_v59, %v329_v60  ;;  %v365_v59 = vld [vmem:[%s9169_s1 + $0x850] sm:$0xff] }
  0xef   :  { %3778 = vmatprep.subr.bf16.mxu0 %v5766_v14  ;;  %v5806_v14 = vcombine.high %v333_v8, %v337_v9  ;;  %v369_v60 = vld [vmem:[%s9169_s1 + $0x870] sm:$0xff] }
  0xf0   :  { %3535 = vmatpush1.bf16.msra.mxu1 %v5763_v24  ;;  %v5803_v24 = vcombine.low %v332_v5, %v336_v6  ;;  %v376_v5 = vld [vmem:[%s9169_s1 + $0x8a8] sm:$0xff]  ;;  %v5838_v6 = vcombine.high %v365_v59, %v369_v60 }
  0xf1   :  { %3536 = vmatprep.subr.bf16.mxu1 %v5772_v30  ;;  %v5812_v30 = vcombine.high %v340_v15, %v344_v18 }
  0xf2   :  { %3779 = vmatpush1.bf16.msra.mxu0 %v5765_v28  ;;  %v5805_v28 = vcombine.low %v333_v8, %v337_v9  ;;  %v373_v8 = vld [vmem:[%s9169_s1 + $0x890] sm:$0xff] }
  0xf3   :  { %3780 = vmatprep.subr.bf16.mxu0 %v5774_v31  ;;  %v5814_v31 = vcombine.high %v341_v20, %v345_v22  ;;  %v377_v9 = vld [vmem:[%s9169_s1 + $0x8b0] sm:$0xff] }
  0xf4   :  { %3537 = vmatpush1.bf16.msra.mxu1 %v5771_v40  ;;  %v5811_v40 = vcombine.low %v340_v15, %v344_v18  ;;  %v384_v15 = vld [vmem:[%s9169_s1 + $0x8e8] sm:$0xff]  ;;  %v381_v18 = vld [vmem:[%s9169_s1 + $0x8d0] sm:$0xff] }
  0xf5   :  { %3538 = vmatprep.subr.bf16.mxu1 %v5780_v42  ;;  %v5820_v42 = vcombine.high %v348_v33, %v352_v35 }
  0xf6   :  { %3781 = vmatpush1.bf16.msra.mxu0 %v5773_v41  ;;  %v5813_v41 = vcombine.low %v341_v20, %v345_v22  ;;  %v5846_v20 = vcombine.high %v373_v8, %v377_v9  ;;  %v385_v22 = vld [vmem:[%s9169_s1 + $0x8f0] sm:$0xff] }
  0xf7   :  { %3782 = vmatprep.subr.bf16.mxu0 %v5782_v43  ;;  %v5822_v43 = vcombine.high %v349_v36, %v353_v38 }
  0xf8   :  { %3539 = vmatpush1.bf16.msra.mxu1 %v5779_v48  ;;  %v5819_v48 = vcombine.low %v348_v33, %v352_v35  ;;  %v392_v33 = vld [vmem:[%s9169_s1 + $0x928] sm:$0xff]  ;;  %v5854_v35 = vcombine.high %v381_v18, %v385_v22 }
  0xf9   :  { %3540 = vmatprep.subr.bf16.mxu1 %v5788_v52  ;;  %v5828_v52 = vcombine.high %v356_v44, %v360_v45 }
  0xfa   :  { %3783 = vmatpush1.bf16.msra.mxu0 %v5781_v49  ;;  %v5821_v49 = vcombine.low %v349_v36, %v353_v38  ;;  %v389_v36 = vld [vmem:[%s9169_s1 + $0x910] sm:$0xff] }
  0xfb   :  { %3784 = vmatprep.subr.bf16.mxu0 %v5790_v54  ;;  %v5830_v54 = vcombine.high %v357_v46, %v361_v47  ;;  %v393_v38 = vld [vmem:[%s9169_s1 + $0x930] sm:$0xff] }
  0xfc   :  { %3541 = vmatpush1.bf16.msra.mxu1 %v5787_v62  ;;  %v5827_v62 = vcombine.low %v356_v44, %v360_v45  ;;  %v400_v44 = vld [vmem:[%s9169_s1 + $0x968] sm:$0xff]  ;;  %v397_v45 = vld [vmem:[%s9169_s1 + $0x950] sm:$0xff] }
  0xfd   :  { %3542 = vmatprep.subr.bf16.mxu1 %v5796_v3  ;;  %v5836_v3 = vcombine.high %v364_v55, %v368_v56 }
  0xfe   :  { %3785 = vmatpush1.bf16.msra.mxu0 %v5789_v63  ;;  %v5829_v63 = vcombine.low %v357_v46, %v361_v47  ;;  %v5862_v46 = vcombine.high %v389_v36, %v393_v38  ;;  %v401_v47 = vld [vmem:[%s9169_s1 + $0x970] sm:$0xff] }
  0xff   :  { %3786 = vmatprep.subr.bf16.mxu0 %v5798_v4  ;;  %v372_v4 = vld [vmem:[%s9169_s1 + $0x888] sm:$0xff] }
 0x100   :  { %3543 = vmatpush1.bf16.msra.mxu1 %v5795_v10  ;;  %v5835_v10 = vcombine.low %v364_v55, %v368_v56  ;;  %v408_v55 = vld [vmem:[%s9169_s1 + $0x9a8] sm:$0xff]  ;;  %v5870_v56 = vcombine.high %v397_v45, %v401_v47 }
 0x101   :  { %3544 = vmatprep.subr.bf16.mxu1 %v5804_v13  ;;  %v5844_v13 = vcombine.high %v372_v4, %v376_v5 }
 0x102   :  { %3787 = vmatpush1.bf16.msra.mxu0 %v5797_v11  ;;  %v5837_v11 = vcombine.low %v365_v59, %v369_v60  ;;  %v405_v59 = vld [vmem:[%s9169_s1 + $0x990] sm:$0xff] }
 0x103   :  { %3788 = vmatprep.subr.bf16.mxu0 %v5806_v14  ;;  %v380_v14 = vld [vmem:[%s9169_s1 + $0x8c8] sm:$0xff]  ;;  %v409_v60 = vld [vmem:[%s9169_s1 + $0x9b0] sm:$0xff] }
 0x104   :  { %3545 = vmatpush1.bf16.msra.mxu1 %v5803_v24  ;;  %v5843_v24 = vcombine.low %v372_v4, %v376_v5  ;;  %v412_v4 = vld [vmem:[%s9169_s1 + $0x9c8] sm:$0xff] }
 0x105   :  { %3546 = vmatprep.subr.bf16.mxu1 %v5812_v30  ;;  %v5852_v30 = vcombine.high %v380_v14, %v384_v15  ;;  %v416_v5 = vld [vmem:[%s9169_s1 + $0x9e8] sm:$0xff] }
 0x106   :  { %3789 = vmatpush1.bf16.msra.mxu0 %v5805_v28  ;;  %v5845_v28 = vcombine.low %v373_v8, %v377_v9  ;;  %v413_v8 = vld [vmem:[%s9169_s1 + $0x9d0] sm:$0xff] }
 0x107   :  { %3790 = vmatprep.subr.bf16.mxu0 %v5814_v31  ;;  %v388_v31 = vld [vmem:[%s9169_s1 + $0x908] sm:$0xff]  ;;  %v417_v9 = vld [vmem:[%s9169_s1 + $0x9f0] sm:$0xff] }
 0x108   :  { %3547 = vmatpush1.bf16.msra.mxu1 %v5811_v40  ;;  %v5851_v40 = vcombine.low %v380_v14, %v384_v15  ;;  %v420_v14 = vld [vmem:[%s9169_s1 + $0xa08] sm:$0xff] }
 0x109   :  { %3548 = vmatprep.subr.bf16.mxu1 %v5820_v42  ;;  %v5860_v42 = vcombine.high %v388_v31, %v392_v33  ;;  %v424_v15 = vld [vmem:[%s9169_s1 + $0xa28] sm:$0xff] }
 0x10a   :  { %3791 = vmatpush1.bf16.msra.mxu0 %v5813_v41  ;;  %v5853_v41 = vcombine.low %v381_v18, %v385_v22  ;;  %v421_v18 = vld [vmem:[%s9169_s1 + $0xa10] sm:$0xff] }
 0x10b   :  { %3792 = vmatprep.subr.bf16.mxu0 %v5822_v43  ;;  %v396_v43 = vld [vmem:[%s9169_s1 + $0x948] sm:$0xff]  ;;  %v425_v22 = vld [vmem:[%s9169_s1 + $0xa30] sm:$0xff] }
 0x10c   :  { %3549 = vmatpush1.bf16.msra.mxu1 %v5819_v48  ;;  %v5859_v48 = vcombine.low %v388_v31, %v392_v33  ;;  %v428_v31 = vld [vmem:[%s9169_s1 + $0xa48] sm:$0xff] }
 0x10d   :  { %3579 = vmatprep.subr.bf16.mxu1 %v5828_v52  ;;  %v5868_v52 = vcombine.high %v396_v43, %v400_v44  ;;  %v432_v33 = vld [vmem:[%s9169_s1 + $0xa68] sm:$0xff] }
 0x10e   :  { %3793 = vmatpush1.bf16.msra.mxu0 %v5821_v49  ;;  %v5861_v49 = vcombine.low %v389_v36, %v393_v38  ;;  %v5894_v36 = vcombine.high %v421_v18, %v425_v22  ;;  %v433_v38 = vld [vmem:[%s9169_s1 + $0xa70] sm:$0xff] }
 0x10f   :  { %3823 = vmatprep.subr.bf16.mxu0 %v5830_v54  ;;  %3551 = vmatmul.mubr.bf16.vlgmr.msra.gmra.mrb[12].mxu1 %v7321_v17  ;;  %v404_v54 = vld [vmem:[%s9169_s1 + $0x988] sm:$0xff] }
 0x110   :  { %3580 = vmatpush1.bf16.msra.mxu1 %v5827_v62  ;;  %3560 = vmatprep.mubr.bf16.mxu1 %v7340_v32  ;;  %v5867_v62 = vcombine.low %v396_v43, %v400_v44  ;;  %v436_v43 = vld [vmem:[%s9169_s1 + $0xa88] sm:$0xff] }
 0x111   :  { %3795 = vmatmul.mubr.bf16.vlgmr.msra.gmra.mrb[12].mxu0 %v7321_v17  ;;  %3581 = vmatprep.subr.bf16.mxu1 %v5836_v3  ;;  %v5876_v3 = vcombine.high %v404_v54, %v408_v55  ;;  %v440_v44 = vld [vmem:[%s9169_s1 + $0xaa8] sm:$0xff] }
 0x112   :  { %3824 = vmatpush1.bf16.msra.mxu0 %v5829_v63  ;;  %3804 = vmatprep.mubr.bf16.mxu0 %v7340_v32  ;;  %v5869_v63 = vcombine.low %v397_v45, %v401_v47  ;;  %v437_v45 = vld [vmem:[%s9169_s1 + $0xa90] sm:$0xff] }
 0x113   :  { %3825 = vmatprep.subr.bf16.mxu0 %v5838_v6  ;;  %v5878_v6 = vcombine.high %v405_v59, %v409_v60  ;;  %v441_v47 = vld [vmem:[%s9169_s1 + $0xab0] sm:$0xff] }
 0x114   :  { %3582 = vmatpush1.bf16.msra.mxu1 %v5835_v10  ;;  %v5875_v10 = vcombine.low %v404_v54, %v408_v55  ;;  %v444_v54 = vld [vmem:[%s9169_s1 + $0xac8] sm:$0xff] }
 0x115   :  { %3583 = vmatprep.subr.bf16.mxu1 %v5844_v13  ;;  %v5884_v13 = vcombine.high %v412_v4, %v416_v5  ;;  %v448_v55 = vld [vmem:[%s9169_s1 + $0xae8] sm:$0xff] }
 0x116   :  { %3826 = vmatpush1.bf16.msra.mxu0 %v5837_v11  ;;  %v5877_v11 = vcombine.low %v405_v59, %v409_v60  ;;  %v5910_v59 = vcombine.high %v437_v45, %v441_v47  ;;  %v449_v60 = vld [vmem:[%s9169_s1 + $0xaf0] sm:$0xff] }
 0x117   :  { %3827 = vmatprep.subr.bf16.mxu0 %v5846_v20  ;;  %3561 = vmatmul.mubr.bf16.gmra.mrb[16].mxu1 %v7377_v51  ;;  %v5886_v20 = vcombine.high %v413_v8, %v417_v9 }
 0x118   :  { %3584 = vmatpush1.bf16.msra.mxu1 %v5843_v24  ;;  %3570 = vmatprep.mubr.bf16.mxu1 %v7394_v2  ;;  %v5883_v24 = vcombine.low %v412_v4, %v416_v5  ;;  %v452_v4 = vld [vmem:[%s9169_s1 + $0xb08] sm:$0xff] }
 0x119   :  { %3805 = vmatmul.mubr.bf16.gmra.mrb[16].mxu0 %v7377_v51  ;;  %3585 = vmatprep.subr.bf16.mxu1 %v5852_v30  ;;  %v5892_v30 = vcombine.high %v420_v14, %v424_v15  ;;  %v456_v5 = vld [vmem:[%s9169_s1 + $0xb28] sm:$0xff] }
 0x11a   :  { %3828 = vmatpush1.bf16.msra.mxu0 %v5845_v28  ;;  %3814 = vmatprep.mubr.bf16.mxu0 %v7394_v2  ;;  %v5885_v28 = vcombine.low %v413_v8, %v417_v9  ;;  %v457_v9 = vld [vmem:[%s9169_s1 + $0xb30] sm:$0xff] }
 0x11b   :  { %3829 = vmatprep.subr.bf16.mxu0 %v5854_v35  ;;  %v429_v35 = vld [vmem:[%s9169_s1 + $0xa50] sm:$0xff] }
 0x11c   :  { %3586 = vmatpush1.bf16.msra.mxu1 %v5851_v40  ;;  %v5891_v40 = vcombine.low %v420_v14, %v424_v15  ;;  %v460_v14 = vld [vmem:[%s9169_s1 + $0xb48] sm:$0xff] }
 0x11d   :  { %3587 = vmatprep.subr.bf16.mxu1 %v5860_v42  ;;  %v5900_v42 = vcombine.high %v428_v31, %v432_v33  ;;  %v464_v15 = vld [vmem:[%s9169_s1 + $0xb68] sm:$0xff] }
 0x11e   :  { %3830 = vmatpush1.bf16.msra.mxu0 %v5853_v41  ;;  %v5893_v41 = vcombine.low %v421_v18, %v425_v22  ;;  %v461_v18 = vld [vmem:[%s9169_s1 + $0xb50] sm:$0xff] }
 0x11f   :  { %3831 = vmatprep.subr.bf16.mxu0 %v5862_v46  ;;  %3571 = vmatmul.mubr.bf16.gmra.mrb[20].mxu1 %v7425_v19  ;;  %v5902_v46 = vcombine.high %v429_v35, %v433_v38  ;;  %v465_v22 = vld [vmem:[%s9169_s1 + $0xb70] sm:$0xff] }
 0x120   :  { %3588 = vmatpush1.bf16.msra.mxu1 %v5859_v48  ;;  %3611 = vmatprep.mubr.bf16.mxu1 %v6901_v0  ;;  %v5899_v48 = vcombine.low %v428_v31, %v432_v33  ;;  %v468_v31 = vld [vmem:[%s9169_s1 + $0xb88] sm:$0xff] }
 0x121   :  { %3815 = vmatmul.mubr.bf16.gmra.mrb[20].mxu0 %v7425_v19  ;;  %3589 = vmatprep.subr.bf16.mxu1 %v5868_v52  ;;  %v5908_v52 = vcombine.high %v436_v43, %v440_v44  ;;  %v472_v33 = vld [vmem:[%s9169_s1 + $0xba8] sm:$0xff] }
 0x122   :  { %3832 = vmatpush1.bf16.msra.mxu0 %v5861_v49  ;;  %3855 = vmatprep.mubr.bf16.mxu0 %v6901_v0  ;;  %v5901_v49 = vcombine.low %v429_v35, %v433_v38  ;;  %v469_v35 = vld [vmem:[%s9169_s1 + $0xb90] sm:$0xff] }
 0x123   :  { %3833 = vmatprep.subr.bf16.mxu0 %v5870_v56  ;;  %v445_v56 = vld [vmem:[%s9169_s1 + $0xad0] sm:$0xff] }
 0x124   :  { %3590 = vmatpush1.bf16.msra.mxu1 %v5867_v62  ;;  %v5907_v62 = vcombine.low %v436_v43, %v440_v44  ;;  %v5918_v8 = vcombine.high %v445_v56, %v449_v60  ;;  %v473_v38 = vld [vmem:[%s9169_s1 + $0xbb0] sm:$0xff]  ;;  %v476_v43 = vld [vmem:[%s9169_s1 + $0xbc8] sm:$0xff] }
 0x125   :  { %3591 = vmatprep.subr.bf16.mxu1 %v5876_v3  ;;  %v5916_v3 = vcombine.high %v444_v54, %v448_v55  ;;  %v480_v44 = vld [vmem:[%s9169_s1 + $0xbe8] sm:$0xff] }
 0x126   :  { %3834 = vmatpush1.bf16.msra.mxu0 %v5869_v63  ;;  %v5909_v63 = vcombine.low %v437_v45, %v441_v47  ;;  %v477_v45 = vld [vmem:[%s9169_s1 + $0xbd0] sm:$0xff] }
 0x127   :  { %3835 = vmatprep.subr.bf16.mxu0 %v5878_v6  ;;  %v453_v6 = vld [vmem:[%s9169_s1 + $0xb10] sm:$0xff] }
 0x128   :  { %3592 = vmatpush1.bf16.msra.mxu1 %v5875_v10  ;;  %v5915_v10 = vcombine.low %v444_v54, %v448_v55  ;;  %v481_v47 = vld [vmem:[%s9169_s1 + $0xbf0] sm:$0xff]  ;;  %v484_v54 = vld [vmem:[%s9169_s1 + $0xc08] sm:$0xff] }
 0x129   :  { %3593 = vmatprep.subr.bf16.mxu1 %v5884_v13  ;;  %v5924_v13 = vcombine.high %v452_v4, %v456_v5  ;;  %v488_v55 = vld [vmem:[%s9169_s1 + $0xc28] sm:$0xff] }
 0x12a   :  { %3836 = vmatpush1.bf16.msra.mxu0 %v5877_v11  ;;  %v5917_v11 = vcombine.low %v445_v56, %v449_v60  ;;  %v485_v56 = vld [vmem:[%s9169_s1 + $0xc10] sm:$0xff] }
 0x12b   :  { %3837 = vmatprep.subr.bf16.mxu0 %v5886_v20  ;;  %v5926_v20 = vcombine.high %v453_v6, %v457_v9  ;;  %v489_v60 = vld [vmem:[%s9169_s1 + $0xc30] sm:$0xff] }
 0x12c   :  { %3594 = vmatpush1.bf16.msra.mxu1 %v5883_v24  ;;  %v5923_v24 = vcombine.low %v452_v4, %v456_v5  ;;  %v492_v4 = vld [vmem:[%s9169_s1 + $0xc48] sm:$0xff] }
 0x12d   :  { %3595 = vmatprep.subr.bf16.mxu1 %v5892_v30  ;;  %v5932_v30 = vcombine.high %v460_v14, %v464_v15  ;;  %v496_v5 = vld [vmem:[%s9169_s1 + $0xc68] sm:$0xff] }
 0x12e   :  { %3838 = vmatpush1.bf16.msra.mxu0 %v5885_v28  ;;  %v5925_v28 = vcombine.low %v453_v6, %v457_v9  ;;  %v493_v6 = vld [vmem:[%s9169_s1 + $0xc50] sm:$0xff] }
 0x12f   :  { %3839 = vmatprep.subr.bf16.mxu0 %v5894_v36  ;;  %v5934_v36 = vcombine.high %v461_v18, %v465_v22  ;;  %v497_v9 = vld [vmem:[%s9169_s1 + $0xc70] sm:$0xff] }
 0x130   :  { %3596 = vmatpush1.bf16.msra.mxu1 %v5891_v40  ;;  %v5931_v40 = vcombine.low %v460_v14, %v464_v15  ;;  %v5966_v14 = vcombine.high %v493_v6, %v497_v9  ;;  %v500_v15 = vld [vmem:[%s9169_s1 + $0xc88] sm:$0xff] }
 0x131   :  { %3597 = vmatprep.subr.bf16.mxu1 %v5900_v42  ;;  %v5940_v42 = vcombine.high %v468_v31, %v472_v33 }
 0x132   :  { %3840 = vmatpush1.bf16.msra.mxu0 %v5893_v41  ;;  %v5933_v41 = vcombine.low %v461_v18, %v465_v22  ;;  %v504_v18 = vld [vmem:[%s9169_s1 + $0xca8] sm:$0xff]  ;;  %v505_v22 = vld [vmem:[%s9169_s1 + $0xcb0] sm:$0xff] }
 0x133   :  { %3841 = vmatprep.subr.bf16.mxu0 %v5902_v46  ;;  %v5942_v46 = vcombine.high %v469_v35, %v473_v38 }
 0x134   :  { %3598 = vmatpush1.bf16.msra.mxu1 %v5899_v48  ;;  %v5939_v48 = vcombine.low %v468_v31, %v472_v33  ;;  %v508_v33 = vld [vmem:[%s9169_s1 + $0xcc8] sm:$0xff] }
 0x135   :  { %3599 = vmatprep.subr.bf16.mxu1 %v5908_v52  ;;  %v5948_v52 = vcombine.high %v476_v43, %v480_v44 }
 0x136   :  { %3842 = vmatpush1.bf16.msra.mxu0 %v5901_v49  ;;  %v5941_v49 = vcombine.low %v469_v35, %v473_v38  ;;  %v512_v35 = vld [vmem:[%s9169_s1 + $0xce8] sm:$0xff]  ;;  %v513_v38 = vld [vmem:[%s9169_s1 + $0xcf0] sm:$0xff] }
 0x137   :  { %3843 = vmatprep.subr.bf16.mxu0 %v5910_v59  ;;  %v5950_v59 = vcombine.high %v477_v45, %v481_v47 }
 0x138   :  { %3600 = vmatpush1.bf16.msra.mxu1 %v5907_v62  ;;  %v5947_v62 = vcombine.low %v476_v43, %v480_v44  ;;  %v5980_v43 = vcombine.high %v508_v33, %v512_v35 }
 0x139   :  { %3601 = vmatprep.subr.bf16.mxu1 %v5916_v3  ;;  %v5956_v3 = vcombine.high %v484_v54, %v488_v55 }
 0x13a   :  { %3844 = vmatpush1.bf16.msra.mxu0 %v5909_v63  ;;  %v5949_v63 = vcombine.low %v477_v45, %v481_v47  ;;  %v516_v45 = vld [vmem:[%s9169_s1 + $0xd08] sm:$0xff]  ;;  %v517_v47 = vld [vmem:[%s9169_s1 + $0xd10] sm:$0xff] }
 0x13b   :  { %3845 = vmatprep.subr.bf16.mxu0 %v5918_v8  ;;  %v5958_v8 = vcombine.high %v485_v56, %v489_v60 }
 0x13c   :  { %3602 = vmatpush1.bf16.msra.mxu1 %v5915_v10  ;;  %v5955_v10 = vcombine.low %v484_v54, %v488_v55 }
 0x13d   :  { %3603 = vmatprep.subr.bf16.mxu1 %v5924_v13  ;;  %v5964_v13 = vcombine.high %v492_v4, %v496_v5 }
 0x13e   :  { %3846 = vmatpush1.bf16.msra.mxu0 %v5917_v11  ;;  %v5957_v11 = vcombine.low %v485_v56, %v489_v60  ;;  %v528_v60 = vld [vmem:[%s9169_s1 + $0xd68] sm:$0xff] }
 0x13f   :  { %3847 = vmatprep.subr.bf16.mxu0 %v5926_v20  ;;  %v501_v20 = vld [vmem:[%s9169_s1 + $0xc90] sm:$0xff] }
 0x140   :  { %3604 = vmatpush1.bf16.msra.mxu1 %v5923_v24  ;;  %v5963_v24 = vcombine.low %v492_v4, %v496_v5  ;;  %v5974_v31 = vcombine.high %v501_v20, %v505_v22  ;;  %v611_v5 = vld [vmem:[%s9172_s2] sm:$0xff] }
 0x141   :  { %3605 = vmatprep.subr.bf16.mxu1 %v5932_v30  ;;  %v5972_v30 = vcombine.high %v500_v15, %v504_v18 }
 0x142   :  { %3848 = vmatpush1.bf16.msra.mxu0 %v5925_v28  ;;  %v5965_v28 = vcombine.low %v493_v6, %v497_v9 }
 0x143   :  { %3849 = vmatprep.subr.bf16.mxu0 %v5934_v36  ;;  %v509_v36 = vld [vmem:[%s9169_s1 + $0xcd0] sm:$0xff] }
 0x144   :  { %3606 = vmatpush1.bf16.msra.mxu1 %v5931_v40  ;;  %v613_v40 = vlaneseq  ;;  %v5982_v44 = vcombine.high %v509_v36, %v513_v38  ;;  %v5981_v54 = vcombine.low %v509_v36, %v513_v38 }
 0x145   :  { %3607 = vmatprep.subr.bf16.mxu1 %v5940_v42  ;;  %v5973_v42 = vcombine.low %v501_v20, %v505_v22 }
 0x146   :  { %3850 = vmatpush1.bf16.msra.mxu0 %v5933_v41  ;;  %v5971_v41 = vcombine.low %v500_v15, %v504_v18  ;;  %v533_v15 = vld [vmem:[%s9169_s1 + $0xd90] sm:$0xff] }
 0x147   :  { %3851 = vmatprep.subr.bf16.mxu0 %v5942_v46  ;;  %v520_v46 = vld [vmem:[%s9169_s1 + $0xd28] sm:$0xff]  ;;  %v537_v18 = vld [vmem:[%s9169_s1 + $0xdb0] sm:$0xff] }
 0x148   :  { %3608 = vmatpush1.bf16.msra.mxu1 %v5939_v48  ;;  %v521_v48 = vld [vmem:[%s9169_s1 + $0xd30] sm:$0xff]  ;;  %v5988_v55 = vcombine.high %v516_v45, %v520_v46  ;;  %v5987_v4 = vcombine.low %v516_v45, %v520_v46 }
 0x149   :  { %3609 = vmatprep.subr.bf16.mxu1 %v5948_v52  ;;  %v5979_v52 = vcombine.low %v508_v33, %v512_v35  ;;  %v5990_v56 = vcombine.high %v517_v47, %v521_v48  ;;  %v540_v33 = vld [vmem:[%s9169_s1 + $0xdc8] sm:$0xff] }
 0x14a   :  { %3852 = vmatpush1.bf16.msra.mxu0 %v5941_v49  ;;  %v8032_v49 = vshrl.u32 %v613_v40, 7  ;;  %v544_v35 = vld [vmem:[%s9169_s1 + $0xde8] sm:$0xff] }
 0x14b   :  { %3853 = vmatprep.subr.bf16.mxu0 %v5950_v59  ;;  %v524_v59 = vld [vmem:[%s9169_s1 + $0xd48] sm:$0xff] }
 0x14c   :  { %3610 = vmatpush1.bf16.msra.mxu1 %v5947_v62  ;;  %v615_v62 = vsub.s32 0, %v8032_v49  ;;  %v619_v6 = vsub.s32 1, %v8032_v49  ;;  %v5996_v9 = vcombine.high %v524_v59, %v528_v60  ;;  %v5995_v22 = vcombine.low %v524_v59, %v528_v60 }
 0x14d   :  { %3640 = vmatprep.subr.bf16.mxu1 %v5956_v3  ;;  %v529_v3 = vld [vmem:[%s9169_s1 + $0xd70] sm:$0xff] }
 0x14e   :  { %3854 = vmatpush1.bf16.msra.mxu0 %v5949_v63  ;;  %v525_v63 = vld [vmem:[%s9169_s1 + $0xd50] sm:$0xff]  ;;  %v8074_v20 = vrot.slane %v611_v5, %v619_v6 }
 0x14f   :  { %3884 = vmatprep.subr.bf16.mxu0 %v5958_v8  ;;  %3612 = vmatmul.mubr.bf16.vlgmr.msra.gmra.mrb[12].mxu1 %v7044_v26  ;;  %v5989_v8 = vcombine.low %v517_v47, %v521_v48  ;;  %v6005_v47 = vcombine.low %v533_v15, %v537_v18 }
 0x150   :  { %3641 = vmatpush1.bf16.msra.mxu1 %v5955_v10  ;;  %3621 = vmatprep.mubr.bf16.mxu1 %v7067_v37  ;;  %v5998_v10 = vcombine.high %v525_v63, %v529_v3 }
 0x151   :  { %3856 = vmatmul.mubr.bf16.vlgmr.msra.gmra.mrb[12].mxu0 %v7044_v26  ;;  %3642 = vmatprep.subr.bf16.mxu1 %v5964_v13  ;;  %v536_v13 = vld [vmem:[%s9169_s1 + $0xda8] sm:$0xff] }
 0x152   :  { %3885 = vmatpush1.bf16.msra.mxu0 %v5957_v11  ;;  %3865 = vmatprep.mubr.bf16.mxu0 %v7067_v37  ;;  %v532_v11 = vld [vmem:[%s9169_s1 + $0xd88] sm:$0xff] }
 0x153   :  { %3886 = vmatprep.subr.bf16.mxu0 %v5966_v14  ;;  %v8063_v14 = vrot.slane %v611_v5, %v615_v62  ;;  %v6003_v46 = vcombine.low %v532_v11, %v536_v13  ;;  %v552_v5 = vld [vmem:[%s9169_s1 + $0xe28] sm:$0xff] }
 0x154   :  { %3643 = vmatpush1.bf16.msra.mxu1 %v5963_v24  ;;  %v5997_v24 = vcombine.low %v525_v63, %v529_v3 }
 0x155   :  { %3644 = vmatprep.subr.bf16.mxu1 %v5972_v30 }
 0x156   :  { %3887 = vmatpush1.bf16.msra.mxu0 %v5965_v28  ;;  %v6004_v28 = vcombine.high %v532_v11, %v536_v13  ;;  %v6011_v13 = vcombine.low %v540_v33, %v544_v35 }
 0x157   :  { %3888 = vmatprep.subr.bf16.mxu0 %v5974_v31  ;;  %3622 = vmatmul.mubr.bf16.gmra.mrb[16].mxu1 %v7101_v53  ;;  %v6006_v31 = vcombine.high %v533_v15, %v537_v18 }
 0x158   :  { %3645 = vmatpush1.bf16.msra.mxu1 %v5971_v41  ;;  %3631 = vmatprep.mubr.bf16.mxu1 %v7121_v1  ;;  %v541_v41 = vld [vmem:[%s9169_s1 + $0xdd0] sm:$0xff] }
 0x159   :  { %3866 = vmatmul.mubr.bf16.gmra.mrb[16].mxu0 %v7101_v53  ;;  %3646 = vmatprep.subr.bf16.mxu1 %v5980_v43 }
 0x15a   :  { %3889 = vmatpush1.bf16.msra.mxu0 %v5973_v42  ;;  %3875 = vmatprep.mubr.bf16.mxu0 %v7121_v1  ;;  %v545_v42 = vld [vmem:[%s9169_s1 + $0xdf0] sm:$0xff] }
 0x15b   :  { %3890 = vmatprep.subr.bf16.mxu0 %v5982_v44  ;;  %v6014_v3 = vcombine.high %v541_v41, %v545_v42 }
 0x15c   :  { %3647 = vmatpush1.bf16.msra.mxu1 %v5979_v52 }
 0x15d   :  { %3648 = vmatprep.subr.bf16.mxu1 %v5988_v55 }
 0x15e   :  { %3891 = vmatpush1.bf16.msra.mxu0 %v5981_v54 }
 0x15f   :  { %3892 = vmatprep.subr.bf16.mxu0 %v5990_v56  ;;  %3632 = vmatmul.mubr.bf16.gmra.mrb[20].mxu1 %v7152_v16  ;;  %v6012_v56 = vcombine.high %v540_v33, %v544_v35 }
 0x160   :  { %3649 = vmatpush1.bf16.msra.mxu1 %v5987_v4  ;;  %3672 = vmatprep.mubr.bf16.mxu1 %v7175_v29  ;;  %v548_v4 = vld [vmem:[%s9169_s1 + $0xe08] sm:$0xff] }
 0x161   :  { %3876 = vmatmul.mubr.bf16.gmra.mrb[20].mxu0 %v7152_v16  ;;  %3650 = vmatprep.subr.bf16.mxu1 %v5996_v9  ;;  %v549_v9 = vld [vmem:[%s9169_s1 + $0xe10] sm:$0xff] }
 0x162   :  { %3893 = vmatpush1.bf16.msra.mxu0 %v5989_v8  ;;  %v3308_v30 = vpop.f32.mrb[0].mxu1  ;;  %3916 = vmatprep.mubr.bf16.mxu0 %v7175_v29 }
 0x163   :  { %3894 = vmatprep.subr.bf16.mxu0 %v5998_v10  ;;  %v6283_v36 = vadd.f32 %v3308_v30, %v8063_v14  ;;  %v3310_v38 = vpop.f32.mrb[1].mxu1  ;;  %v553_v10 = vld [vmem:[%s9169_s1 + $0xe30] sm:$0xff] }
 0x164   :  { %v3430_v40 = vpop.f32.mrb[0].mxu0  ;;  %v6285_v43 = vadd.f32 %v3310_v38, %v8074_v20  ;;  %v3312_v44 = vpop.f32.mrb[2].mxu1  ;;  %3651 = vmatpush1.bf16.msra.mxu1 %v5995_v22  ;;  %v6013_v22 = vcombine.low %v541_v41, %v545_v42  ;;  %v556_v38 = vld [vmem:[%s9169_s1 + $0xe48] sm:$0xff]  ;;  %v557_v42 = vld [vmem:[%s9169_s1 + $0xe50] sm:$0xff] }
 0x165   :  { %v3432_v45 = vpop.f32.mrb[1].mxu0  ;;  %v6287_v48 = vadd.f32 %v3312_v44, %v8063_v14  ;;  %v6284_v52 = vadd.f32 %v6283_v36, %v3430_v40  ;;  %v3314_v54 = vpop.f32.mrb[3].mxu1  ;;  %3652 = vmatprep.subr.bf16.mxu1 %v6004_v28  ;;  %v6022_v36 = vcombine.high %v549_v9, %v553_v10  ;;  %v560_v40 = vld [vmem:[%s9169_s1 + $0xe68] sm:$0xff]  ;;  %v561_v44 = vld [vmem:[%s9169_s1 + $0xe70] sm:$0xff] }
 0x166   :  { %3895 = vmatpush1.bf16.msra.mxu0 %v5997_v24  ;;  %v3434_v55 = vpop.f32.mrb[2].mxu0  ;;  %v6289_v59 = vadd.f32 %v3314_v54, %v8074_v20  ;;  %v6286_v60 = vadd.f32 %v6285_v43, %v3432_v45  ;;  %v6020_v24 = vcombine.high %v548_v4, %v552_v5  ;;  %v6021_v54 = vcombine.low %v549_v9, %v553_v10  ;;  %v565_v9 = vld [vmem:[%s9169_s1 + $0xe90] sm:$0xff] }
 0x167   :  { %v3436_v63 = vpop.f32.mrb[3].mxu0  ;;  %3896 = vmatprep.subr.bf16.mxu0 %v6006_v31  ;;  %v6288_v8 = vadd.f32 %v6287_v48, %v3434_v55  ;;  %v4189_v15 = vmax.f32 %v6284_v52, 0.0  ;;  %v6019_v52 = vcombine.low %v548_v4, %v552_v5  ;;  %v568_v4 = vld [vmem:[%s9169_s1 + $0xea8] sm:$0xff]  ;;  %v569_v10 = vld [vmem:[%s9169_s1 + $0xeb0] sm:$0xff] }
 0x168   :  { %v6290_v11 = vadd.f32 %v6289_v59, %v3436_v63  ;;  %3653 = vmatpush1.bf16.msra.mxu1 %v6003_v46  ;;  %v4190_v28 = vmax.f32 %v6286_v60, 0.0  ;;  %v6028_v63 = vcombine.high %v556_v38, %v560_v40 }
 0x169   :  { %v4197_v18 = vmax.f32 %v6288_v8, 0.0  ;;  %3654 = vmatprep.subr.bf16.mxu1 %v6012_v56 }
 0x16a   :  { %3897 = vmatpush1.bf16.msra.mxu0 %v6005_v47  ;;  %v4198_v30 = vmax.f32 %v6290_v11, 0.0  ;;  %v3318_v31 = vpop.f32.mrb[4].mxu1 }
 0x16b   :  { %3898 = vmatprep.subr.bf16.mxu0 %v6014_v3  ;;  %v8113_v33 = vpack.c.bf16 %v4197_v18, %v4189_v15  ;;  %v6291_v35 = vadd.f32 %v3318_v31, %v8063_v14  ;;  %v3320_v43 = vpop.f32.mrb[5].mxu1  ;;  %v6030_v15 = vcombine.high %v557_v42, %v561_v44 }
 0x16c   :  { %v3440_v41 = vpop.f32.mrb[4].mxu0  ;;  %v8122_v45 = vpack.c.bf16 %v4198_v30, %v4190_v28  ;;  %v6293_v46 = vadd.f32 %v3320_v43, %v8074_v20  ;;  %v3322_v47 = vpop.f32.mrb[6].mxu1  ;;  %3655 = vmatpush1.bf16.msra.mxu1 %v6011_v13  ;;  %v564_v13 = vld [vmem:[%s9169_s1 + $0xe88] sm:$0xff]  ;;  %v6029_v30 = vcombine.low %v557_v42, %v561_v44  ;;  %v573_v44 = vld [vmem:[%s9169_s1 + $0xed0] sm:$0xff] }
 0x16d   :  { %v3442_v48 = vpop.f32.mrb[5].mxu0  ;;  %v6295_v55 = vadd.f32 %v3322_v47, %v8063_v14  ;;  %v6292_v56 = vadd.f32 %v6291_v35, %v3440_v41  ;;  %v3324_v59 = vpop.f32.mrb[7].mxu1  ;;  %3656 = vmatprep.subr.bf16.mxu1 %v6020_v24  ;;  %v6036_v31 = vcombine.high %v564_v13, %v568_v4  ;;  %v6038_v41 = vcombine.high %v565_v9, %v569_v10  ;;  %v576_v47 = vld [vmem:[%s9169_s1 + $0xee8] sm:$0xff] }
 0x16e   :  { %3899 = vmatpush1.bf16.msra.mxu0 %v6013_v22  ;;  %v3444_v60 = vpop.f32.mrb[6].mxu0  ;;  %v6297_v3 = vadd.f32 %v3324_v59, %v8074_v20  ;;  %v6294_v8 = vadd.f32 %v6293_v46, %v3442_v48  ;;  %v6027_v22 = vcombine.low %v556_v38, %v560_v40  ;;  %v572_v46 = vld [vmem:[%s9169_s1 + $0xec8] sm:$0xff] }
 0x16f   :  { %v3446_v11 = vpop.f32.mrb[7].mxu0  ;;  %3900 = vmatprep.subr.bf16.mxu0 %v6022_v36  ;;  %v6296_v5 = vadd.f32 %v6295_v55, %v3444_v60  ;;  %v4205_v24 = vmax.f32 %v6292_v56, 0.0  ;;  %v6035_v60 = vcombine.low %v564_v13, %v568_v4  ;;  %v584_v13 = vld [vmem:[%s9169_s1 + $0xf28] sm:$0xff] }
 0x170   :  { %v6298_v18 = vadd.f32 %v6297_v3, %v3446_v11  ;;  %3657 = vmatpush1.bf16.msra.mxu1 %v6019_v52  ;;  %v4206_v36 = vmax.f32 %v6294_v8, 0.0  ;;  %v577_v52 = vld [vmem:[%s9169_s1 + $0xef0] sm:$0xff]  ;;  %v6037_v3 = vcombine.low %v565_v9, %v569_v10  ;;  %v6044_v8 = vcombine.high %v572_v46, %v576_v47 }
 0x171   :  { %v4213_v28 = vmax.f32 %v6296_v5, 0.0  ;;  %3658 = vmatprep.subr.bf16.mxu1 %v6028_v63  ;;  %v6046_v5 = vcombine.high %v573_v44, %v577_v52  ;;  %v585_v9 = vld [vmem:[%s9169_s1 + $0xf30] sm:$0xff]  ;;  %v6043_v10 = vcombine.low %v572_v46, %v576_v47 }
 0x172   :  { %3901 = vmatpush1.bf16.msra.mxu0 %v6021_v54  ;;  %v4214_v35 = vmax.f32 %v6298_v18, 0.0  ;;  %v3328_v43 = vpop.f32.mrb[8].mxu1  ;;  %v581_v18 = vld [vmem:[%s9169_s1 + $0xf10] sm:$0xff] }
 0x173   :  { %3902 = vmatprep.subr.bf16.mxu0 %v6030_v15  ;;  %v8145_v38 = vpack.c.bf16 %v4213_v28, %v4205_v24  ;;  %v6299_v40 = vadd.f32 %v3328_v43, %v8063_v14  ;;  %v3330_v48 = vpop.f32.mrb[9].mxu1  ;;  %v6054_v28 = vcombine.high %v581_v18, %v585_v9 }
 0x174   :  { %v3450_v42 = vpop.f32.mrb[8].mxu0  ;;  %v8154_v54 = vpack.c.bf16 %v4214_v35, %v4206_v36  ;;  %v6301_v55 = vadd.f32 %v3330_v48, %v8074_v20  ;;  %v3332_v56 = vpop.f32.mrb[10].mxu1  ;;  %3659 = vmatpush1.bf16.msra.mxu1 %v6027_v22  ;;  %v580_v20 = vld [vmem:[%s9169_s1 + $0xf08] sm:$0xff]  ;;  %v6045_v22 = vcombine.low %v573_v44, %v577_v52  ;;  %v589_v36 = vld [vmem:[%s9169_s1 + $0xf50] sm:$0xff] }
 0x175   :  { %v3452_v59 = vpop.f32.mrb[9].mxu0  ;;  %v8157_v63 = vadd.f32 %v6299_v40, %v3450_v42  ;;  %v3333_v14 = vpop.f32.mrb[11].mxu1  ;;  %3660 = vmatprep.subr.bf16.mxu1 %v6036_v31  ;;  %v6052_v24 = vcombine.high %v580_v20, %v584_v13  ;;  %v592_v31 = vld [vmem:[%s9169_s1 + $0xf68] sm:$0xff]  ;;  %v593_v35 = vld [vmem:[%s9169_s1 + $0xf70] sm:$0xff]  ;;  %v6051_v43 = vcombine.low %v580_v20, %v584_v13 }
 0x176   :  { %3903 = vmatpush1.bf16.msra.mxu0 %v6029_v30  ;;  %v3454_v11 = vpop.f32.mrb[10].mxu0  ;;  %v8159_v15 = vadd.f32 %v6301_v55, %v3452_v59  ;;  %v588_v30 = vld [vmem:[%s9169_s1 + $0xf48] sm:$0xff]  ;;  %v6062_v47 = vcombine.high %v589_v36, %v593_v35  ;;  %v597_v42 = vld [vmem:[%s9169_s1 + $0xf90] sm:$0xff]  ;;  %v6061_v55 = vcombine.low %v589_v36, %v593_v35 }
 0x177   :  { %3904 = vmatprep.subr.bf16.mxu0 %v6038_v41  ;;  %v3455_v4 = vpop.f32.mrb[11].mxu0  ;;  %v6053_v41 = vcombine.low %v581_v18, %v585_v9  ;;  %v6060_v46 = vcombine.high %v588_v30, %v592_v31  ;;  %v596_v40 = vld [vmem:[%s9169_s1 + $0xf88] sm:$0xff]  ;;  %v601_v44 = vld [vmem:[%s9169_s1 + $0xfb0] sm:$0xff]  ;;  %v6059_v52 = vcombine.low %v588_v30, %v592_v31  ;;  %v106_v18 = vld [vmem:[%s9169_s1 + $0x38] sm:$0xff] }
 0x178   :  { %3661 = vmatpush1.bf16.msra.mxu1 %v6035_v60  ;;  %v600_v48 = vld [vmem:[%s9169_s1 + $0xfa8] sm:$0xff]  ;;  %v6070_v59 = vcombine.high %v597_v42, %v601_v44  ;;  %v102_v4 = vld [vmem:[%s9169_s1 + $0x18] sm:$0xff] }
 0x179   :  { %3662 = vmatprep.subr.bf16.mxu1 %v6044_v8  ;;  %v6068_v56 = vcombine.high %v596_v40, %v600_v48  ;;  %v604_v60 = vld [vmem:[%s9169_s1 + $0xfc8] sm:$0xff]  ;;  %v609_v8 = vld [vmem:[%s9169_s1 + $0xff0] sm:$0xff]  ;;  %v6067_v11 = vcombine.low %v596_v40, %v600_v48  ;;  %v114_v30 = vld [vmem:[%s9169_s1 + $0x78] sm:$0xff]  ;;  %v5575_v31 = vcombine.low %v102_v4, %v106_v18 }
 0x17a   :  { %3905 = vmatpush1.bf16.msra.mxu0 %v6037_v3  ;;  %v608_v14 = vld [vmem:[%s9169_s1 + $0xfe8] sm:$0xff]  ;;  %v605_v3 = vld [vmem:[%s9169_s1 + $0xfd0] sm:$0xff] }
 0x17b   :  { %3906 = vmatprep.subr.bf16.mxu0 %v6046_v5  ;;  %v6069_v5 = vcombine.low %v597_v42, %v601_v44  ;;  %v6076_v20 = vcombine.high %v604_v60, %v608_v14  ;;  %v6078_v13 = vcombine.high %v605_v3, %v609_v8  ;;  %v6075_v9 = vcombine.low %v604_v60, %v608_v14  ;;  %v6511_v36 = vld [vmem:[%s9171_s3] ss:$8 sps:$4 sm:$0xff]   ;;  %v6514_v40 = vld [vmem:[%s9171_s3 + $0x10] ss:$8 sps:$4 sm:$0xff]   ;;  %v6519_v42 = vld [vmem:[%s9171_s3 + $0x24] ss:$8 sps:$4 sm:$0xff]  }
 0x17c   :  { %3663 = vmatpush1.bf16.msra.mxu1 %v6043_v10  ;;  %v6077_v10 = vcombine.low %v605_v3, %v609_v8  ;;  %v126_v44 = vld [vmem:[%s9169_s1 + $0xd8] sm:$0xff] }
 0x17d   :  { %3664 = vmatprep.subr.bf16.mxu1 %v6052_v24  ;;  %v6513_v24 = vld [vmem:[%s9171_s3 + $0x4] ss:$8 sps:$4 sm:$0xff]   ;;  %v6522_v60 = vld [vmem:[%s9171_s3 + $0x34] ss:$8 sps:$4 sm:$0xff]  }
 0x17e   :  { %3907 = vmatpush1.bf16.msra.mxu0 %v6045_v22  ;;  %v5576_v22 = vcombine.high %v102_v4, %v106_v18  ;;  %v134_v14 = vld [vmem:[%s9169_s1 + $0x118] sm:$0xff] }
 0x17f   :  { %3908 = vmatprep.subr.bf16.mxu0 %v6054_v28  ;;  %v110_v28 = vld [vmem:[%s9169_s1 + $0x58] sm:$0xff] }
 0x180   :  { %3665 = vmatpush1.bf16.msra.mxu1 %v6051_v43  ;;  %v5584_v35 = vcombine.high %v110_v28, %v114_v30  ;;  %v6516_v43 = vld [vmem:[%s9171_s3 + $0x14] ss:$8 sps:$4 sm:$0xff]  }
 0x181   :  { %3666 = vmatprep.subr.bf16.mxu1 %v6060_v46  ;;  %v122_v46 = vld [vmem:[%s9169_s1 + $0xb8] sm:$0xff] }
 0x182   :  { %3909 = vmatpush1.bf16.msra.mxu0 %v6053_v41  ;;  %v118_v41 = vld [vmem:[%s9169_s1 + $0x98] sm:$0xff] }
 0x183   :  { %3910 = vmatprep.subr.bf16.mxu0 %v6062_v47  ;;  %v5583_v47 = vcombine.low %v110_v28, %v114_v30  ;;  %v5592_v48 = vcombine.high %v118_v41, %v122_v46  ;;  %v138_v3 = vld [vmem:[%s9169_s1 + $0x138] sm:$0xff] }
 0x184   :  { %3667 = vmatpush1.bf16.msra.mxu1 %v6059_v52  ;;  %v130_v52 = vld [vmem:[%s9169_s1 + $0xf8] sm:$0xff]  ;;  %v5607_v18 = vcombine.low %v134_v14, %v138_v3 }
 0x185   :  { %3668 = vmatprep.subr.bf16.mxu1 %v6068_v56  ;;  %v6517_v56 = vld [vmem:[%s9171_s3 + $0x20] ss:$8 sps:$4 sm:$0xff]   ;;  %v5599_v8 = vcombine.low %v126_v44, %v130_v52  ;;  %v146_v4 = vld [vmem:[%s9169_s1 + $0x178] sm:$0xff] }
 0x186   :  { %3911 = vmatpush1.bf16.msra.mxu0 %v6061_v55  ;;  %v5591_v55 = vcombine.low %v118_v41, %v122_v46  ;;  %v154_v28 = vld [vmem:[%s9169_s1 + $0x1b8] sm:$0xff]  ;;  %v6529_v46 = vld [vmem:[%s9171_s3 + $0x60] ss:$8 sps:$4 sm:$0xff]  }
 0x187   :  { %3912 = vmatprep.subr.bf16.mxu0 %v6070_v59  ;;  %v5600_v59 = vcombine.high %v126_v44, %v130_v52  ;;  %v162_v41 = vld [vmem:[%s9169_s1 + $0x1f8] sm:$0xff] }
 0x188   :  { %3669 = vmatpush1.bf16.msra.mxu1 %v6067_v11  ;;  %v6520_v11 = vld [vmem:[%s9171_s3 + $0x30] ss:$8 sps:$4 sm:$0xff]  }
 0x189   :  { %3670 = vmatprep.subr.bf16.mxu1 %v6076_v20  ;;  %v6525_v20 = vld [vmem:[%s9171_s3 + $0x44] ss:$8 sps:$4 sm:$0xff]   ;;  %v6532_v44 = vld [vmem:[%s9171_s3 + $0x70] ss:$8 sps:$4 sm:$0xff]  }
 0x18a   :  { %3913 = vmatpush1.bf16.msra.mxu0 %v6069_v5  ;;  %v5608_v5 = vcombine.high %v134_v14, %v138_v3  ;;  %v6535_v14 = vld [vmem:[%s9171_s3 + $0x80] ss:$8 sps:$4 sm:$0xff]  }
 0x18b   :  { %3914 = vmatprep.subr.bf16.mxu0 %v6078_v13  ;;  %v142_v13 = vld [vmem:[%s9169_s1 + $0x158] sm:$0xff] }
 0x18c   :  { %3671 = vmatpush1.bf16.msra.mxu1 %v6075_v9  ;;  %v6523_v9 = vld [vmem:[%s9171_s3 + $0x40] ss:$8 sps:$4 sm:$0xff]   ;;  %v5615_v30 = vcombine.low %v142_v13, %v146_v4 }
 0x18d   :  { %3945 = vmatprep.subr.bf16.mxu1 %v5576_v22  ;;  %v6528_v22 = vld [vmem:[%s9171_s3 + $0x54] ss:$8 sps:$4 sm:$0xff]  }
 0x18e   :  { %3915 = vmatpush1.bf16.msra.mxu0 %v6077_v10  ;;  %v5616_v10 = vcombine.high %v142_v13, %v146_v4  ;;  %v6538_v13 = vld [vmem:[%s9171_s3 + $0x90] ss:$8 sps:$4 sm:$0xff]  }
 0x18f   :  { %5033 = vmatprep.subr.bf16.mxu0 %v6513_v24  ;;  %3673 = vmatmul.mubr.bf16.vlgmr.msra.gmra.mrb[12].mxu1 %v7332_v23  ;;  %v150_v24 = vld [vmem:[%s9169_s1 + $0x198] sm:$0xff] }
 0x190   :  { %3946 = vmatpush1.bf16.msra.mxu1 %v5575_v31  ;;  %3682 = vmatprep.mubr.bf16.mxu1 %v7355_v39  ;;  %v6526_v31 = vld [vmem:[%s9171_s3 + $0x50] ss:$8 sps:$4 sm:$0xff]  }
 0x191   :  { %3917 = vmatmul.mubr.bf16.vlgmr.msra.gmra.mrb[12].mxu0 %v7332_v23  ;;  %3947 = vmatprep.subr.bf16.mxu1 %v5584_v35  ;;  %v6531_v35 = vld [vmem:[%s9171_s3 + $0x64] ss:$8 sps:$4 sm:$0xff]  }
 0x192   :  { %5034 = vmatpush1.bf16.msra.mxu0 %v6511_v36  ;;  %3926 = vmatprep.mubr.bf16.mxu0 %v7355_v39  ;;  %v5624_v36 = vcombine.high %v150_v24, %v154_v28 }
 0x193   :  { %5035 = vmatprep.subr.bf16.mxu0 %v6516_v43  ;;  %v158_v43 = vld [vmem:[%s9169_s1 + $0x1d8] sm:$0xff] }
 0x194   :  { %3948 = vmatpush1.bf16.msra.mxu1 %v5583_v47  ;;  %v5632_v47 = vcombine.high %v158_v43, %v162_v41 }
 0x195   :  { %3949 = vmatprep.subr.bf16.mxu1 %v5592_v48  ;;  %v166_v48 = vld [vmem:[%s9169_s1 + $0x218] sm:$0xff] }
 0x196   :  { %5036 = vmatpush1.bf16.msra.mxu0 %v6514_v40  ;;  %v6534_v40 = vld [vmem:[%s9171_s3 + $0x74] ss:$8 sps:$4 sm:$0xff]  }
 0x197   :  { %5037 = vmatprep.subr.bf16.mxu0 %v6519_v42  ;;  %3683 = vmatmul.mubr.bf16.gmra.mrb[16].mxu1 %v7389_v57  ;;  %v5631_v42 = vcombine.low %v158_v43, %v162_v41  ;;  %v6544_v43 = vld [vmem:[%s9171_s3 + $0xb0] ss:$8 sps:$4 sm:$0xff]  }
 0x198   :  { %3950 = vmatpush1.bf16.msra.mxu1 %v5591_v55  ;;  %3692 = vmatprep.mubr.bf16.mxu1 %v7409_v7  ;;  %v6537_v55 = vld [vmem:[%s9171_s3 + $0x84] ss:$8 sps:$4 sm:$0xff]  }
 0x199   :  { %3927 = vmatmul.mubr.bf16.gmra.mrb[16].mxu0 %v7389_v57  ;;  %3951 = vmatprep.subr.bf16.mxu1 %v5600_v59  ;;  %v178_v59 = vld [vmem:[%s9169_s1 + $0x278] sm:$0xff] }
 0x19a   :  { %5038 = vmatpush1.bf16.msra.mxu0 %v6517_v56  ;;  %3936 = vmatprep.mubr.bf16.mxu0 %v7409_v7  ;;  %v174_v56 = vld [vmem:[%s9169_s1 + $0x258] sm:$0xff] }
 0x19b   :  { %5039 = vmatprep.subr.bf16.mxu0 %v6522_v60  ;;  %v5648_v3 = vcombine.high %v174_v56, %v178_v59 }
 0x19c   :  { %3952 = vmatpush1.bf16.msra.mxu1 %v5599_v8  ;;  %v6540_v8 = vld [vmem:[%s9171_s3 + $0x94] ss:$8 sps:$4 sm:$0xff]  }
 0x19d   :  { %3953 = vmatprep.subr.bf16.mxu1 %v5608_v5  ;;  %v186_v5 = vld [vmem:[%s9169_s1 + $0x2b8] sm:$0xff] }
 0x19e   :  { %5040 = vmatpush1.bf16.msra.mxu0 %v6520_v11  ;;  %v182_v11 = vld [vmem:[%s9169_s1 + $0x298] sm:$0xff] }
 0x19f   :  { %5041 = vmatprep.subr.bf16.mxu0 %v6525_v20  ;;  %3693 = vmatmul.mubr.bf16.gmra.mrb[20].mxu1 %v7434_v27  ;;  %v5647_v20 = vcombine.low %v174_v56, %v178_v59  ;;  %v5656_v4 = vcombine.high %v182_v11, %v186_v5  ;;  %v6550_v56 = vld [vmem:[%s9171_s3 + $0xd0] ss:$8 sps:$4 sm:$0xff]  }
 0x1a0   :  { %3954 = vmatpush1.bf16.msra.mxu1 %v5607_v18  ;;  %3977 = vmatprep.mubr.bf16.mxu1 %v6886_v58  ;;  %v170_v58 = vld [vmem:[%s9169_s1 + $0x238] sm:$0xff]  ;;  %v6543_v18 = vld [vmem:[%s9171_s3 + $0xa4] ss:$8 sps:$4 sm:$0xff]  }
 0x1a1   :  { %3937 = vmatmul.mubr.bf16.gmra.mrb[20].mxu0 %v7434_v27  ;;  %3955 = vmatprep.subr.bf16.mxu1 %v5616_v10  ;;  %v5640_v52 = vcombine.high %v166_v48, %v170_v58  ;;  %v5639_v60 = vcombine.low %v166_v48, %v170_v58  ;;  %v194_v10 = vld [vmem:[%s9169_s1 + $0x2f8] sm:$0xff]  ;;  %v6547_v48 = vld [vmem:[%s9171_s3 + $0xc0] ss:$8 sps:$4 sm:$0xff]  }
 0x1a2   :  { %5042 = vmatpush1.bf16.msra.mxu0 %v6523_v9  ;;  %5065 = vmatprep.mubr.bf16.mxu0 %v8122_v45  ;;  %v5623_v45 = vcombine.low %v150_v24, %v154_v28  ;;  %v190_v9 = vld [vmem:[%s9169_s1 + $0x2d8] sm:$0xff]  ;;  %v6541_v24 = vld [vmem:[%s9171_s3 + $0xa0] ss:$8 sps:$4 sm:$0xff]  }
 0x1a3   :  { %5043 = vmatprep.subr.bf16.mxu0 %v6528_v22  ;;  %v5655_v22 = vcombine.low %v182_v11, %v186_v5  ;;  %v5664_v28 = vcombine.high %v190_v9, %v194_v10  ;;  %v6553_v11 = vld [vmem:[%s9171_s3 + $0xe0] ss:$8 sps:$4 sm:$0xff]  }
 0x1a4   :  { %3956 = vmatpush1.bf16.msra.mxu1 %v5615_v30  ;;  %v6546_v30 = vld [vmem:[%s9171_s3 + $0xb4] ss:$8 sps:$4 sm:$0xff]  }
 0x1a5   :  { %3957 = vmatprep.subr.bf16.mxu1 %v5624_v36  ;;  %v202_v36 = vld [vmem:[%s9169_s1 + $0x338] sm:$0xff] }
 0x1a6   :  { %5044 = vmatpush1.bf16.msra.mxu0 %v6526_v31  ;;  %v198_v31 = vld [vmem:[%s9169_s1 + $0x318] sm:$0xff] }
 0x1a7   :  { %5045 = vmatprep.subr.bf16.mxu0 %v6531_v35  ;;  %v5663_v35 = vcombine.low %v190_v9, %v194_v10  ;;  %v5672_v41 = vcombine.high %v198_v31, %v202_v36  ;;  %v6556_v9 = vld [vmem:[%s9171_s3 + $0xf0] ss:$8 sps:$4 sm:$0xff]  }
 0x1a8   :  { %3958 = vmatpush1.bf16.msra.mxu1 %v5623_v45  ;;  %v6549_v45 = vld [vmem:[%s9171_s3 + $0xc4] ss:$8 sps:$4 sm:$0xff]  }
 0x1a9   :  { %3959 = vmatprep.subr.bf16.mxu1 %v5632_v47  ;;  %v210_v47 = vld [vmem:[%s9169_s1 + $0x378] sm:$0xff] }
 0x1aa   :  { %5046 = vmatpush1.bf16.msra.mxu0 %v6529_v46  ;;  %v206_v46 = vld [vmem:[%s9169_s1 + $0x358] sm:$0xff] }
 0x1ab   :  { %5047 = vmatprep.subr.bf16.mxu0 %v6534_v40  ;;  %v5671_v40 = vcombine.low %v198_v31, %v202_v36  ;;  %v5680_v58 = vcombine.high %v206_v46, %v210_v47  ;;  %v246_v36 = vld [vmem:[%s9169_s1 + $0x498] sm:$0xff] }
 0x1ac   :  { %3960 = vmatpush1.bf16.msra.mxu1 %v5631_v42  ;;  %v6552_v42 = vld [vmem:[%s9171_s3 + $0xd4] ss:$8 sps:$4 sm:$0xff]  }
 0x1ad   :  { %3961 = vmatprep.subr.bf16.mxu1 %v5640_v52  ;;  %v218_v52 = vld [vmem:[%s9169_s1 + $0x3b8] sm:$0xff] }
 0x1ae   :  { %5048 = vmatpush1.bf16.msra.mxu0 %v6532_v44  ;;  %v214_v44 = vld [vmem:[%s9169_s1 + $0x398] sm:$0xff] }
 0x1af   :  { %5049 = vmatprep.subr.bf16.mxu0 %v6537_v55  ;;  %v5679_v55 = vcombine.low %v206_v46, %v210_v47  ;;  %v5688_v59 = vcombine.high %v214_v44, %v218_v52  ;;  %v254_v47 = vld [vmem:[%s9169_s1 + $0x4d8] sm:$0xff] }
 0x1b0   :  { %3962 = vmatpush1.bf16.msra.mxu1 %v5639_v60  ;;  %v6555_v60 = vld [vmem:[%s9171_s3 + $0xe4] ss:$8 sps:$4 sm:$0xff]  }
 0x1b1   :  { %3963 = vmatprep.subr.bf16.mxu1 %v5648_v3  ;;  %v226_v3 = vld [vmem:[%s9169_s1 + $0x3f8] sm:$0xff] }
 0x1b2   :  { %5050 = vmatpush1.bf16.msra.mxu0 %v6535_v14  ;;  %v222_v14 = vld [vmem:[%s9169_s1 + $0x3d8] sm:$0xff] }
 0x1b3   :  { %5051 = vmatprep.subr.bf16.mxu0 %v6540_v8  ;;  %v5687_v8 = vcombine.low %v214_v44, %v218_v52  ;;  %v5696_v5 = vcombine.high %v222_v14, %v226_v3  ;;  %v6570_v52 = vld [vmem:[%s9171_s3 + $0x134] ss:$8 sps:$4 sm:$0xff]  }
 0x1b4   :  { %3964 = vmatpush1.bf16.msra.mxu1 %v5647_v20  ;;  %v6558_v20 = vld [vmem:[%s9171_s3 + $0xf4] ss:$8 sps:$4 sm:$0xff]  }
 0x1b5   :  { %3965 = vmatprep.subr.bf16.mxu1 %v5656_v4  ;;  %v234_v4 = vld [vmem:[%s9169_s1 + $0x438] sm:$0xff] }
 0x1b6   :  { %5052 = vmatpush1.bf16.msra.mxu0 %v6538_v13  ;;  %v230_v13 = vld [vmem:[%s9169_s1 + $0x418] sm:$0xff] }
 0x1b7   :  { %5053 = vmatprep.subr.bf16.mxu0 %v6543_v18  ;;  %v5695_v18 = vcombine.low %v222_v14, %v226_v3  ;;  %v5704_v10 = vcombine.high %v230_v13, %v234_v4 }
 0x1b8   :  { %3966 = vmatpush1.bf16.msra.mxu1 %v5655_v22  ;;  %v238_v22 = vld [vmem:[%s9169_s1 + $0x458] sm:$0xff] }
 0x1b9   :  { %3967 = vmatprep.subr.bf16.mxu1 %v5664_v28  ;;  %v6561_v28 = vld [vmem:[%s9171_s3 + $0x104] ss:$8 sps:$4 sm:$0xff]  }
 0x1ba   :  { %5054 = vmatpush1.bf16.msra.mxu0 %v6541_v24  ;;  %v242_v24 = vld [vmem:[%s9169_s1 + $0x478] sm:$0xff] }
 0x1bb   :  { %5055 = vmatprep.subr.bf16.mxu0 %v6546_v30  ;;  %v5703_v30 = vcombine.low %v230_v13, %v234_v4  ;;  %v5712_v31 = vcombine.high %v238_v22, %v242_v24 }
 0x1bc   :  { %3968 = vmatpush1.bf16.msra.mxu1 %v5663_v35  ;;  %v250_v35 = vld [vmem:[%s9169_s1 + $0x4b8] sm:$0xff] }
 0x1bd   :  { %3969 = vmatprep.subr.bf16.mxu1 %v5672_v41  ;;  %v6564_v41 = vld [vmem:[%s9171_s3 + $0x114] ss:$8 sps:$4 sm:$0xff]   ;;  %v5720_v46 = vcombine.high %v246_v36, %v250_v35 }
 0x1be   :  { %5056 = vmatpush1.bf16.msra.mxu0 %v6544_v43  ;;  %v6559_v43 = vld [vmem:[%s9171_s3 + $0x100] ss:$8 sps:$4 sm:$0xff]  }
 0x1bf   :  { %5057 = vmatprep.subr.bf16.mxu0 %v6549_v45  ;;  %v5711_v45 = vcombine.low %v238_v22, %v242_v24  ;;  %v294_v24 = vld [vmem:[%s9169_s1 + $0x618] sm:$0xff] }
 0x1c0   :  { %3970 = vmatpush1.bf16.msra.mxu1 %v5671_v40  ;;  %v4222_v40 = vmax.f32 %v8159_v15, 0.0  ;;  %v6565_v15 = vld [vmem:[%s9171_s3 + $0x120] ss:$8 sps:$4 sm:$0xff]  }
 0x1c1   :  { %3971 = vmatprep.subr.bf16.mxu1 %v5680_v58 }
 0x1c2   :  { %5058 = vmatpush1.bf16.msra.mxu0 %v6547_v48  ;;  %v5719_v48 = vcombine.low %v246_v36, %v250_v35  ;;  %v4246_v44 = vpack.c.bf16 %v4222_v40, %v4222_v40  ;;  %v314_v40 = vld [vmem:[%s9169_s1 + $0x6b8] sm:$0xff] }
 0x1c3   :  { %5059 = vmatprep.subr.bf16.mxu0 %v6552_v42  ;;  %v266_v42 = vld [vmem:[%s9169_s1 + $0x538] sm:$0xff] }
 0x1c4   :  { %3972 = vmatpush1.bf16.msra.mxu1 %v5679_v55 }
 0x1c5   :  { %3973 = vmatprep.subr.bf16.mxu1 %v5688_v59  ;;  %v4221_v59 = vmax.f32 %v8157_v63, 0.0  ;;  %v6573_v63 = vld [vmem:[%s9171_s3 + $0x144] ss:$8 sps:$4 sm:$0xff]  }
 0x1c6   :  { %5060 = vmatpush1.bf16.msra.mxu0 %v6550_v56 }
 0x1c7   :  { %5061 = vmatprep.subr.bf16.mxu0 %v6555_v60  ;;  %v270_v60 = vld [vmem:[%s9169_s1 + $0x558] sm:$0xff] }
 0x1c8   :  { %3974 = vmatpush1.bf16.msra.mxu1 %v5687_v8  ;;  %v4245_v8 = vpack.c.bf16 %v4221_v59, %v4221_v59  ;;  %v326_v59 = vld [vmem:[%s9169_s1 + $0x718] sm:$0xff] }
 0x1c9   :  { %3975 = vmatprep.subr.bf16.mxu1 %v5696_v5  ;;  %v6571_v5 = vld [vmem:[%s9171_s3 + $0x140] ss:$8 sps:$4 sm:$0xff]  }
 0x1ca   :  { %5062 = vmatpush1.bf16.msra.mxu0 %v6553_v11  ;;  %v278_v11 = vld [vmem:[%s9169_s1 + $0x598] sm:$0xff] }
 0x1cb   :  { %5063 = vmatprep.subr.bf16.mxu0 %v6558_v20  ;;  %v6576_v20 = vld [vmem:[%s9171_s3 + $0x154] ss:$8 sps:$4 sm:$0xff]  }
 0x1cc   :  { %3976 = vmatpush1.bf16.msra.mxu1 %v5695_v18  ;;  %v286_v18 = vld [vmem:[%s9169_s1 + $0x5d8] sm:$0xff] }
 0x1cd   :  { %4006 = vmatprep.subr.bf16.mxu1 %v5704_v10  ;;  %v6579_v10 = vld [vmem:[%s9171_s3 + $0x164] ss:$8 sps:$4 sm:$0xff]  }
 0x1ce   :  { %5064 = vmatpush1.bf16.msra.mxu0 %v6556_v9  ;;  %v6574_v9 = vld [vmem:[%s9171_s3 + $0x150] ss:$8 sps:$4 sm:$0xff]  }
 0x1cf   :  { %5094 = vmatprep.subr.bf16.mxu0 %v6561_v28  ;;  %3978 = vmatmul.mubr.bf16.vlgmr.msra.gmra.mrb[24].mxu1 %v7033_v21  ;;  %v258_v21 = vld [vmem:[%s9169_s1 + $0x4f8] sm:$0xff] }
 0x1d0   :  { %4007 = vmatpush1.bf16.msra.mxu1 %v5703_v30  ;;  %3987 = vmatprep.mubr.bf16.mxu1 %v7058_v34  ;;  %v5728_v58 = vcombine.high %v254_v47, %v258_v21  ;;  %v262_v34 = vld [vmem:[%s9169_s1 + $0x518] sm:$0xff]  ;;  %v5727_v55 = vcombine.low %v254_v47, %v258_v21  ;;  %v6577_v30 = vld [vmem:[%s9171_s3 + $0x160] ss:$8 sps:$4 sm:$0xff]  }
 0x1d1   :  { %5066 = vmatmul.mubr.bf16.vlgmr.msra.gmra.mrb[24].mxu0 %v8113_v33  ;;  %4008 = vmatprep.subr.bf16.mxu1 %v5712_v31  ;;  %v6562_v33 = vld [vmem:[%s9171_s3 + $0x110] ss:$8 sps:$4 sm:$0xff]   ;;  %v5736_v56 = vcombine.high %v262_v34, %v266_v42  ;;  %v5735_v14 = vcombine.low %v262_v34, %v266_v42  ;;  %v6582_v31 = vld [vmem:[%s9171_s3 + $0x174] ss:$8 sps:$4 sm:$0xff]  }
 0x1d2   :  { %5075 = vmatprep.mubr.bf16.mxu0 %v8154_v54  ;;  %5095 = vmatpush1.bf16.msra.mxu0 %v6559_v43  ;;  %v6567_v54 = vld [vmem:[%s9171_s3 + $0x124] ss:$8 sps:$4 sm:$0xff]   ;;  %v298_v28 = vld [vmem:[%s9169_s1 + $0x638] sm:$0xff] }
 0x1d3   :  { %5096 = vmatprep.subr.bf16.mxu0 %v6564_v41  ;;  %v5768_v35 = vcombine.high %v294_v24, %v298_v28  ;;  %v302_v43 = vld [vmem:[%s9169_s1 + $0x658] sm:$0xff]  ;;  %v5767_v47 = vcombine.low %v294_v24, %v298_v28  ;;  %v6603_v28 = vld [vmem:[%s9171_s3 + $0x1e4] ss:$8 sps:$4 sm:$0xff]  }
 0x1d4   :  { %4009 = vmatpush1.bf16.msra.mxu1 %v5711_v45  ;;  %v306_v41 = vld [vmem:[%s9169_s1 + $0x678] sm:$0xff] }
 0x1d5   :  { %4010 = vmatprep.subr.bf16.mxu1 %v5720_v46  ;;  %v6580_v45 = vld [vmem:[%s9171_s3 + $0x170] ss:$8 sps:$4 sm:$0xff]   ;;  %v6585_v46 = vld [vmem:[%s9171_s3 + $0x184] ss:$8 sps:$4 sm:$0xff]   ;;  %v5776_v21 = vcombine.high %v302_v43, %v306_v41 }
 0x1d6   :  { %5097 = vmatpush1.bf16.msra.mxu0 %v6562_v33  ;;  %v310_v33 = vld [vmem:[%s9169_s1 + $0x698] sm:$0xff] }
 0x1d7   :  { %3988 = vmatmul.mubr.bf16.gmra.mrb[28].mxu1 %v7095_v50  ;;  %5098 = vmatprep.subr.bf16.mxu0 %v6567_v54  ;;  %v274_v50 = vld [vmem:[%s9169_s1 + $0x578] sm:$0xff]  ;;  %v6583_v54 = vld [vmem:[%s9171_s3 + $0x180] ss:$8 sps:$4 sm:$0xff]   ;;  %v5784_v34 = vcombine.high %v310_v33, %v314_v40 }
 0x1d8   :  { %4011 = vmatpush1.bf16.msra.mxu1 %v5719_v48  ;;  %3997 = vmatprep.mubr.bf16.mxu1 %v7112_v61  ;;  %v5744_v3 = vcombine.high %v270_v60, %v274_v50  ;;  %v282_v61 = vld [vmem:[%s9169_s1 + $0x5b8] sm:$0xff]  ;;  %v5743_v13 = vcombine.low %v270_v60, %v274_v50  ;;  %v6589_v50 = vld [vmem:[%s9171_s3 + $0x1a0] ss:$8 sps:$4 sm:$0xff]  }
 0x1d9   :  { %5076 = vmatmul.mubr.bf16.gmra.mrb[28].mxu0 %v8145_v38  ;;  %4012 = vmatprep.subr.bf16.mxu1 %v5728_v58  ;;  %v6568_v38 = vld [vmem:[%s9171_s3 + $0x130] ss:$8 sps:$4 sm:$0xff]   ;;  %v5752_v4 = vcombine.high %v278_v11, %v282_v61  ;;  %v6588_v48 = vld [vmem:[%s9171_s3 + $0x194] ss:$8 sps:$4 sm:$0xff]   ;;  %v5775_v58 = vcombine.low %v302_v43, %v306_v41  ;;  %v6601_v43 = vld [vmem:[%s9171_s3 + $0x1e0] ss:$8 sps:$4 sm:$0xff]  }
 0x1da   :  { %5085 = vmatprep.mubr.bf16.mxu0 %v4246_v44  ;;  %5099 = vmatpush1.bf16.msra.mxu0 %v6565_v15  ;;  %v318_v42 = vld [vmem:[%s9169_s1 + $0x6d8] sm:$0xff] }
 0x1db   :  { %5100 = vmatprep.subr.bf16.mxu0 %v6570_v52  ;;  %v322_v15 = vld [vmem:[%s9169_s1 + $0x6f8] sm:$0xff]  ;;  %v6591_v52 = vld [vmem:[%s9171_s3 + $0x1a4] ss:$8 sps:$4 sm:$0xff]  }
 0x1dc   :  { %4013 = vmatpush1.bf16.msra.mxu1 %v5727_v55  ;;  %v6586_v44 = vld [vmem:[%s9171_s3 + $0x190] ss:$8 sps:$4 sm:$0xff]   ;;  %v5783_v55 = vcombine.low %v310_v33, %v314_v40  ;;  %v6606_v41 = vld [vmem:[%s9171_s3 + $0x1f4] ss:$8 sps:$4 sm:$0xff]   ;;  %v6609_v40 = vld [vmem:[%s9171_s3 + $0x204] ss:$8 sps:$4 sm:$0xff]  }
 0x1dd   :  { %4014 = vmatprep.subr.bf16.mxu1 %v5736_v56  ;;  %v5792_v56 = vcombine.high %v318_v42, %v322_v15  ;;  %v330_v60 = vld [vmem:[%s9169_s1 + $0x738] sm:$0xff] }
 0x1de   :  { %5101 = vmatpush1.bf16.msra.mxu0 %v6568_v38  ;;  %v6594_v38 = vld [vmem:[%s9171_s3 + $0x1b4] ss:$8 sps:$4 sm:$0xff]   ;;  %v6598_v24 = vld [vmem:[%s9171_s3 + $0x1d0] ss:$8 sps:$4 sm:$0xff]  }
 0x1df   :  { %3998 = vmatmul.mubr.bf16.gmra.mrb[32].mxu1 %v7143_v12  ;;  %5102 = vmatprep.subr.bf16.mxu0 %v6573_v63  ;;  %v290_v12 = vld [vmem:[%s9169_s1 + $0x5f8] sm:$0xff]  ;;  %v5791_v63 = vcombine.low %v318_v42, %v322_v15 }
 0x1e0   :  { %4015 = vmatpush1.bf16.msra.mxu1 %v5735_v14  ;;  %4038 = vmatprep.mubr.bf16.mxu1 %v7166_v25  ;;  %v5751_v25 = vcombine.low %v278_v11, %v282_v61  ;;  %v5760_v22 = vcombine.high %v286_v18, %v290_v12  ;;  %v5759_v36 = vcombine.low %v286_v18, %v290_v12  ;;  %v6592_v11 = vld [vmem:[%s9171_s3 + $0x1b0] ss:$8 sps:$4 sm:$0xff]   ;;  %v6597_v61 = vld [vmem:[%s9171_s3 + $0x1c4] ss:$8 sps:$4 sm:$0xff]   ;;  %v6595_v18 = vld [vmem:[%s9171_s3 + $0x1c0] ss:$8 sps:$4 sm:$0xff]  }
 0x1e1   :  { %5086 = vmatmul.mubr.bf16.gmra.mrb[32].mxu0 %v4245_v8  ;;  %4016 = vmatprep.subr.bf16.mxu1 %v5744_v3  ;;  %v5800_v14 = vcombine.high %v326_v59, %v330_v60  ;;  %v334_v3 = vld [vmem:[%s9169_s1 + $0x758] sm:$0xff] }
 0x1e2   :  { %5103 = vmatpush1.bf16.msra.mxu0 %v6571_v5  ;;  %v338_v8 = vld [vmem:[%s9169_s1 + $0x778] sm:$0xff]  ;;  %v5799_v5 = vcombine.low %v326_v59, %v330_v60 }
 0x1e3   :  { %5104 = vmatprep.subr.bf16.mxu0 %v6576_v20  ;;  %v5808_v20 = vcombine.high %v334_v3, %v338_v8  ;;  %v6600_v12 = vld [vmem:[%s9171_s3 + $0x1d4] ss:$8 sps:$4 sm:$0xff]   ;;  %v6604_v33 = vld [vmem:[%s9171_s3 + $0x1f0] ss:$8 sps:$4 sm:$0xff]  }
 0x1e4   :  { %4017 = vmatpush1.bf16.msra.mxu1 %v5743_v13  ;;  %v342_v13 = vld [vmem:[%s9169_s1 + $0x798] sm:$0xff] }
 0x1e5   :  { %4018 = vmatprep.subr.bf16.mxu1 %v5752_v4  ;;  %v346_v4 = vld [vmem:[%s9169_s1 + $0x7b8] sm:$0xff] }
 0x1e6   :  { %5105 = vmatpush1.bf16.msra.mxu0 %v6574_v9  ;;  %v5807_v9 = vcombine.low %v334_v3, %v338_v8 }
 0x1e7   :  { %5106 = vmatprep.subr.bf16.mxu0 %v6579_v10  ;;  %v5816_v10 = vcombine.high %v342_v13, %v346_v4 }
 0x1e8   :  { %4019 = vmatpush1.bf16.msra.mxu1 %v5751_v25  ;;  %v350_v25 = vld [vmem:[%s9169_s1 + $0x7d8] sm:$0xff] }
 0x1e9   :  { %4020 = vmatprep.subr.bf16.mxu1 %v5760_v22  ;;  %v354_v22 = vld [vmem:[%s9169_s1 + $0x7f8] sm:$0xff] }
 0x1ea   :  { %5107 = vmatpush1.bf16.msra.mxu0 %v6577_v30  ;;  %v5815_v30 = vcombine.low %v342_v13, %v346_v4 }
 0x1eb   :  { %5108 = vmatprep.subr.bf16.mxu0 %v6582_v31  ;;  %v5824_v31 = vcombine.high %v350_v25, %v354_v22 }
 0x1ec   :  { %4021 = vmatpush1.bf16.msra.mxu1 %v5759_v36  ;;  %v358_v36 = vld [vmem:[%s9169_s1 + $0x818] sm:$0xff] }
 0x1ed   :  { %4022 = vmatprep.subr.bf16.mxu1 %v5768_v35  ;;  %v362_v35 = vld [vmem:[%s9169_s1 + $0x838] sm:$0xff] }
 0x1ee   :  { %5109 = vmatpush1.bf16.msra.mxu0 %v6580_v45  ;;  %v5823_v45 = vcombine.low %v350_v25, %v354_v22  ;;  %v438_v25 = vld [vmem:[%s9169_s1 + $0xa98] sm:$0xff] }
 0x1ef   :  { %5110 = vmatprep.subr.bf16.mxu0 %v6585_v46  ;;  %v5832_v46 = vcombine.high %v358_v36, %v362_v35  ;;  %v442_v22 = vld [vmem:[%s9169_s1 + $0xab8] sm:$0xff] }
 0x1f0   :  { %4023 = vmatpush1.bf16.msra.mxu1 %v5767_v47  ;;  %v366_v47 = vld [vmem:[%s9169_s1 + $0x858] sm:$0xff] }
 0x1f1   :  { %4024 = vmatprep.subr.bf16.mxu1 %v5776_v21  ;;  %v370_v21 = vld [vmem:[%s9169_s1 + $0x878] sm:$0xff] }
 0x1f2   :  { %5111 = vmatpush1.bf16.msra.mxu0 %v6583_v54  ;;  %v5831_v54 = vcombine.low %v358_v36, %v362_v35  ;;  %v5839_v42 = vcombine.low %v366_v47, %v370_v21  ;;  %v5911_v36 = vcombine.low %v438_v25, %v442_v22 }
 0x1f3   :  { %5112 = vmatprep.subr.bf16.mxu0 %v6588_v48  ;;  %v5840_v48 = vcombine.high %v366_v47, %v370_v21  ;;  %v462_v47 = vld [vmem:[%s9169_s1 + $0xb58] sm:$0xff] }
 0x1f4   :  { %4025 = vmatpush1.bf16.msra.mxu1 %v5775_v58  ;;  %v374_v58 = vld [vmem:[%s9169_s1 + $0x898] sm:$0xff] }
 0x1f5   :  { %4026 = vmatprep.subr.bf16.mxu1 %v5784_v34  ;;  %v378_v34 = vld [vmem:[%s9169_s1 + $0x8b8] sm:$0xff] }
 0x1f6   :  { %5113 = vmatpush1.bf16.msra.mxu0 %v6586_v44  ;;  %v5848_v15 = vcombine.high %v374_v58, %v378_v34  ;;  %v382_v44 = vld [vmem:[%s9169_s1 + $0x8d8] sm:$0xff] }
 0x1f7   :  { %5114 = vmatprep.subr.bf16.mxu0 %v6591_v52  ;;  %v386_v52 = vld [vmem:[%s9169_s1 + $0x8f8] sm:$0xff] }
 0x1f8   :  { %4027 = vmatpush1.bf16.msra.mxu1 %v5783_v55  ;;  %v5847_v55 = vcombine.low %v374_v58, %v378_v34  ;;  %v5855_v59 = vcombine.low %v382_v44, %v386_v52  ;;  %v466_v21 = vld [vmem:[%s9169_s1 + $0xb78] sm:$0xff] }
 0x1f9   :  { %4028 = vmatprep.subr.bf16.mxu1 %v5792_v56  ;;  %v5856_v56 = vcombine.high %v382_v44, %v386_v52  ;;  %v5935_v58 = vcombine.low %v462_v47, %v466_v21 }
 0x1fa   :  { %5115 = vmatpush1.bf16.msra.mxu0 %v6589_v50  ;;  %v398_v50 = vld [vmem:[%s9169_s1 + $0x958] sm:$0xff] }
 0x1fb   :  { %5116 = vmatprep.subr.bf16.mxu0 %v6594_v38  ;;  %v402_v38 = vld [vmem:[%s9169_s1 + $0x978] sm:$0xff] }
 0x1fc   :  { %4029 = vmatpush1.bf16.msra.mxu1 %v5791_v63  ;;  %v5871_v3 = vcombine.low %v398_v50, %v402_v38 }
 0x1fd   :  { %4030 = vmatprep.subr.bf16.mxu1 %v5800_v14  ;;  %v5872_v14 = vcombine.high %v398_v50, %v402_v38 }
 0x1fe   :  { %5117 = vmatpush1.bf16.msra.mxu0 %v6592_v11  ;;  %v414_v11 = vld [vmem:[%s9169_s1 + $0x9d8] sm:$0xff] }
 0x1ff   :  { %5118 = vmatprep.subr.bf16.mxu0 %v6597_v61  ;;  %v418_v61 = vld [vmem:[%s9169_s1 + $0x9f8] sm:$0xff] }
 0x200   :  { %4031 = vmatpush1.bf16.msra.mxu1 %v5799_v5  ;;  %v5887_v13 = vcombine.low %v414_v11, %v418_v61 }
 0x201   :  { %4032 = vmatprep.subr.bf16.mxu1 %v5808_v20  ;;  %v5888_v20 = vcombine.high %v414_v11, %v418_v61 }
 0x202   :  { %5119 = vmatpush1.bf16.msra.mxu0 %v6595_v18  ;;  %v430_v18 = vld [vmem:[%s9169_s1 + $0xa58] sm:$0xff] }
 0x203   :  { %5120 = vmatprep.subr.bf16.mxu0 %v6600_v12  ;;  %v434_v12 = vld [vmem:[%s9169_s1 + $0xa78] sm:$0xff] }
 0x204   :  { %4033 = vmatpush1.bf16.msra.mxu1 %v5807_v9 }
 0x205   :  { %4034 = vmatprep.subr.bf16.mxu1 %v5816_v10  ;;  %v5904_v10 = vcombine.high %v430_v18, %v434_v12 }
 0x206   :  { %5121 = vmatpush1.bf16.msra.mxu0 %v6598_v24  ;;  %v5903_v24 = vcombine.low %v430_v18, %v434_v12  ;;  %v627_v18 = vsub.s32 3, %v8032_v49 }
 0x207   :  { %5122 = vmatprep.subr.bf16.mxu0 %v6603_v28  ;;  %v5912_v28 = vcombine.high %v438_v25, %v442_v22  ;;  %v8774_v25 = vld [vmem:[%s9172_s2] sm:$0xff] }
 0x208   :  { %4035 = vmatpush1.bf16.msra.mxu1 %v5815_v30  ;;  %v446_v30 = vld [vmem:[%s9169_s1 + $0xad8] sm:$0xff] }
 0x209   :  { %4036 = vmatprep.subr.bf16.mxu1 %v5824_v31  ;;  %v450_v31 = vld [vmem:[%s9169_s1 + $0xaf8] sm:$0xff] }
 0x20a   :  { %5123 = vmatpush1.bf16.msra.mxu0 %v6601_v43  ;;  %v5920_v35 = vcombine.high %v446_v30, %v450_v31  ;;  %v454_v43 = vld [vmem:[%s9169_s1 + $0xb18] sm:$0xff] }
 0x20b   :  { %5124 = vmatprep.subr.bf16.mxu0 %v6606_v41  ;;  %v458_v41 = vld [vmem:[%s9169_s1 + $0xb38] sm:$0xff] }
 0x20c   :  { %4037 = vmatpush1.bf16.msra.mxu1 %v5823_v45  ;;  %v5919_v45 = vcombine.low %v446_v30, %v450_v31 }
 0x20d   :  { %4067 = vmatprep.subr.bf16.mxu1 %v5832_v46  ;;  %v5928_v46 = vcombine.high %v454_v43, %v458_v41 }
 0x20e   :  { %5125 = vmatpush1.bf16.msra.mxu0 %v6604_v33  ;;  %v5927_v33 = vcombine.low %v454_v43, %v458_v41  ;;  %v546_v43 = vld [vmem:[%s9169_s1 + $0xdf8] sm:$0xff] }
 0x20f   :  { %4039 = vmatmul.mubr.bf16.vlgmr.msra.gmra.mrb[24].mxu1 %v7321_v17  ;;  %5155 = vmatprep.subr.bf16.mxu0 %v6609_v40  ;;  %v390_v17 = vld [vmem:[%s9169_s1 + $0x918] sm:$0xff]  ;;  %v5936_v40 = vcombine.high %v462_v47, %v466_v21 }
 0x210   :  { %4068 = vmatpush1.bf16.msra.mxu1 %v5831_v54  ;;  %4048 = vmatprep.mubr.bf16.mxu1 %v7340_v32  ;;  %v394_v32 = vld [vmem:[%s9169_s1 + $0x938] sm:$0xff] }
 0x211   :  { %4069 = vmatprep.subr.bf16.mxu1 %v5840_v48  ;;  %v5864_v60 = vcombine.high %v390_v17, %v394_v32  ;;  %v5863_v63 = vcombine.low %v390_v17, %v394_v32  ;;  %v470_v54 = vld [vmem:[%s9169_s1 + $0xb98] sm:$0xff] }
 0x212   :  { %v474_v48 = vld [vmem:[%s9169_s1 + $0xbb8] sm:$0xff] }
 0x213   :  { %v5944_v34 = vcombine.high %v470_v54, %v474_v48  ;;  %v5943_v44 = vcombine.low %v470_v54, %v474_v48 }
 0x214   :  { %4070 = vmatpush1.bf16.msra.mxu1 %v5839_v42  ;;  %v478_v42 = vld [vmem:[%s9169_s1 + $0xbd8] sm:$0xff] }
 0x215   :  { %4071 = vmatprep.subr.bf16.mxu1 %v5848_v15  ;;  %v482_v15 = vld [vmem:[%s9169_s1 + $0xbf8] sm:$0xff] }
 0x216   :  { %v5952_v52 = vcombine.high %v478_v42, %v482_v15  ;;  %v5951_v17 = vcombine.low %v478_v42, %v482_v15 }
 0x217   :  { %4049 = vmatmul.mubr.bf16.gmra.mrb[28].mxu1 %v7377_v51  ;;  %v406_v51 = vld [vmem:[%s9169_s1 + $0x998] sm:$0xff] }
 0x218   :  { %4072 = vmatpush1.bf16.msra.mxu1 %v5847_v55  ;;  %4058 = vmatprep.mubr.bf16.mxu1 %v7394_v2  ;;  %v410_v2 = vld [vmem:[%s9169_s1 + $0x9b8] sm:$0xff] }
 0x219   :  { %4073 = vmatprep.subr.bf16.mxu1 %v5856_v56  ;;  %v5880_v8 = vcombine.high %v406_v51, %v410_v2  ;;  %v5879_v5 = vcombine.low %v406_v51, %v410_v2  ;;  %v486_v55 = vld [vmem:[%s9169_s1 + $0xc18] sm:$0xff] }
 0x21a   :  { %v490_v56 = vld [vmem:[%s9169_s1 + $0xc38] sm:$0xff] }
 0x21b   :  { %v5960_v32 = vcombine.high %v486_v55, %v490_v56  ;;  %v5959_v50 = vcombine.low %v486_v55, %v490_v56  ;;  %v550_v56 = vld [vmem:[%s9169_s1 + $0xe18] sm:$0xff] }
 0x21c   :  { %4074 = vmatpush1.bf16.msra.mxu1 %v5855_v59  ;;  %v494_v59 = vld [vmem:[%s9169_s1 + $0xc58] sm:$0xff] }
 0x21d   :  { %4075 = vmatprep.subr.bf16.mxu1 %v5864_v60  ;;  %v498_v60 = vld [vmem:[%s9169_s1 + $0xc78] sm:$0xff] }
 0x21e   :  { %v5968_v38 = vcombine.high %v494_v59, %v498_v60  ;;  %v5967_v51 = vcombine.low %v494_v59, %v498_v60 }
 0x21f   :  { %4059 = vmatmul.mubr.bf16.gmra.mrb[32].mxu1 %v7425_v19  ;;  %v422_v19 = vld [vmem:[%s9169_s1 + $0xa18] sm:$0xff] }
 0x220   :  { %4076 = vmatpush1.bf16.msra.mxu1 %v5863_v63  ;;  %4099 = vmatprep.mubr.bf16.mxu1 %v6901_v0  ;;  %v426_v0 = vld [vmem:[%s9169_s1 + $0xa38] sm:$0xff] }
 0x221   :  { %4077 = vmatprep.subr.bf16.mxu1 %v5872_v14  ;;  %v5896_v4 = vcombine.high %v422_v19, %v426_v0  ;;  %v5895_v9 = vcombine.low %v422_v19, %v426_v0  ;;  %v502_v63 = vld [vmem:[%s9169_s1 + $0xc98] sm:$0xff] }
 0x222   :  { %v506_v14 = vld [vmem:[%s9169_s1 + $0xcb8] sm:$0xff] }
 0x223   :  { %v5976_v2 = vcombine.high %v502_v63, %v506_v14  ;;  %v5975_v11 = vcombine.low %v502_v63, %v506_v14  ;;  %v526_v19 = vld [vmem:[%s9169_s1 + $0xd58] sm:$0xff] }
 0x224   :  { %4078 = vmatpush1.bf16.msra.mxu1 %v5871_v3  ;;  %v510_v3 = vld [vmem:[%s9169_s1 + $0xcd8] sm:$0xff] }
 0x225   :  { %4079 = vmatprep.subr.bf16.mxu1 %v5880_v8  ;;  %v514_v8 = vld [vmem:[%s9169_s1 + $0xcf8] sm:$0xff] }
 0x226   :  { %v5984_v61 = vcombine.high %v510_v3, %v514_v8  ;;  %v530_v0 = vld [vmem:[%s9169_s1 + $0xd78] sm:$0xff] }
 0x227   :  { %v6000_v12 = vcombine.high %v526_v19, %v530_v0  ;;  %v5999_v30 = vcombine.low %v526_v19, %v530_v0 }
 0x228   :  { %4080 = vmatpush1.bf16.msra.mxu1 %v5879_v5  ;;  %v5983_v5 = vcombine.low %v510_v3, %v514_v8 }
 0x229   :  { %4081 = vmatprep.subr.bf16.mxu1 %v5888_v20 }
 0x22c   :  { %4082 = vmatpush1.bf16.msra.mxu1 %v5887_v13  ;;  %v623_v13 = vsub.s32 2, %v8032_v49 }
 0x22d   :  { %4083 = vmatprep.subr.bf16.mxu1 %v5896_v4 }
 0x22e   :  { %v8777_v22 = vrot.slane %v8774_v25, %v623_v13 }
 0x230   :  { %4084 = vmatpush1.bf16.msra.mxu1 %v5895_v9  ;;  %v534_v9 = vld [vmem:[%s9169_s1 + $0xd98] sm:$0xff] }
 0x231   :  { %4085 = vmatprep.subr.bf16.mxu1 %v5904_v10  ;;  %v538_v10 = vld [vmem:[%s9169_s1 + $0xdb8] sm:$0xff] }
 0x234   :  { %4086 = vmatpush1.bf16.msra.mxu1 %v5903_v24 }
 0x235   :  { %4087 = vmatprep.subr.bf16.mxu1 %v5912_v28  ;;  %v8784_v28 = vrot.slane %v8774_v25, %v627_v18 }
 0x238   :  { %4088 = vmatpush1.bf16.msra.mxu1 %v5911_v36  ;;  %v6008_v36 = vcombine.high %v534_v9, %v538_v10 }
 0x239   :  { %4089 = vmatprep.subr.bf16.mxu1 %v5920_v35 }
 0x23c   :  { %4090 = vmatpush1.bf16.msra.mxu1 %v5919_v45 }
 0x23d   :  { %4091 = vmatprep.subr.bf16.mxu1 %v5928_v46 }
 0x240   :  { %4092 = vmatpush1.bf16.msra.mxu1 %v5927_v33 }
 0x241   :  { %4093 = vmatprep.subr.bf16.mxu1 %v5936_v40  ;;  %v6007_v40 = vcombine.low %v534_v9, %v538_v10 }
 0x244   :  { %4094 = vmatpush1.bf16.msra.mxu1 %v5935_v58 }
 0x245   :  { %4095 = vmatprep.subr.bf16.mxu1 %v5944_v34 }
 0x248   :  { %4096 = vmatpush1.bf16.msra.mxu1 %v5943_v44 }
 0x249   :  { %4097 = vmatprep.subr.bf16.mxu1 %v5952_v52 }
 0x24c   :  { %4098 = vmatpush1.bf16.msra.mxu1 %v5951_v17  ;;  %v554_v17 = vld [vmem:[%s9169_s1 + $0xe38] sm:$0xff] }
 0x24d   :  { %4128 = vmatprep.subr.bf16.mxu1 %v5960_v32  ;;  %v6024_v8 = vcombine.high %v550_v56, %v554_v17 }
 0x24f   :  { %4100 = vmatmul.mubr.bf16.vlgmr.msra.gmra.mrb[24].mxu1 %v7044_v26  ;;  %v518_v26 = vld [vmem:[%s9169_s1 + $0xd18] sm:$0xff] }
 0x250   :  { %4129 = vmatpush1.bf16.msra.mxu1 %v5959_v50  ;;  %4109 = vmatprep.mubr.bf16.mxu1 %v7067_v37  ;;  %v522_v37 = vld [vmem:[%s9169_s1 + $0xd38] sm:$0xff] }
 0x251   :  { %4130 = vmatprep.subr.bf16.mxu1 %v5968_v38  ;;  %v5992_v20 = vcombine.high %v518_v26, %v522_v37  ;;  %v5991_v4 = vcombine.low %v518_v26, %v522_v37  ;;  %v6607_v37 = vld [vmem:[%s9171_s3 + $0x200] ss:$8 sps:$4 sm:$0xff]  }
 0x254   :  { %4131 = vmatpush1.bf16.msra.mxu1 %v5967_v51 }
 0x255   :  { %4132 = vmatprep.subr.bf16.mxu1 %v5976_v2 }
 0x257   :  { %4110 = vmatmul.mubr.bf16.gmra.mrb[28].mxu1 %v7101_v53  ;;  %v631_v53 = vsub.s32 4, %v8032_v49 }
 0x258   :  { %4133 = vmatpush1.bf16.msra.mxu1 %v5975_v11  ;;  %4119 = vmatprep.mubr.bf16.mxu1 %v7121_v1  ;;  %v635_v1 = vsub.s32 5, %v8032_v49 }
 0x259   :  { %4134 = vmatprep.subr.bf16.mxu1 %v5984_v61  ;;  %v8781_v24 = vrot.slane %v8774_v25, %v631_v53 }
 0x25a   :  { %v8788_v31 = vrot.slane %v8774_v25, %v635_v1 }
 0x25c   :  { %4135 = vmatpush1.bf16.msra.mxu1 %v5983_v5  ;;  %v558_v5 = vld [vmem:[%s9169_s1 + $0xe58] sm:$0xff] }
 0x25d   :  { %4136 = vmatprep.subr.bf16.mxu1 %v5992_v20  ;;  %v562_v20 = vld [vmem:[%s9169_s1 + $0xe78] sm:$0xff] }
 0x25f   :  { %4120 = vmatmul.mubr.bf16.gmra.mrb[32].mxu1 %v7152_v16  ;;  %v542_v16 = vld [vmem:[%s9169_s1 + $0xdd8] sm:$0xff] }
 0x260   :  { %4137 = vmatpush1.bf16.msra.mxu1 %v5991_v4  ;;  %4160 = vmatprep.mubr.bf16.mxu1 %v7175_v29  ;;  %v6016_v42 = vcombine.high %v542_v16, %v546_v43  ;;  %v6015_v51 = vcombine.low %v542_v16, %v546_v43  ;;  %v6612_v4 = vld [vmem:[%s9171_s3 + $0x214] ss:$8 sps:$4 sm:$0xff]  }
 0x261   :  { %4138 = vmatprep.subr.bf16.mxu1 %v6000_v12  ;;  %v6023_v12 = vcombine.low %v550_v56, %v554_v17 }
 0x262   :  { %v3674_v35 = vpop.f32.mrb[12].mxu1 }
 0x263   :  { %v6303_v41 = vadd.f32 %v3674_v35, %v8777_v22  ;;  %v3676_v46 = vpop.f32.mrb[13].mxu1  ;;  %v6032_v35 = vcombine.high %v558_v5, %v562_v20 }
 0x264   :  { %v3918_v45 = vpop.f32.mrb[12].mxu0  ;;  %v6304_v47 = vadd.f32 %v3676_v46, %v8784_v28  ;;  %v3678_v33 = vpop.f32.mrb[14].mxu1  ;;  %4139 = vmatpush1.bf16.msra.mxu1 %v5999_v30  ;;  %v566_v46 = vld [vmem:[%s9169_s1 + $0xe98] sm:$0xff] }
 0x265   :  { %v6313_v29 = vadd.f32 %v3918_v45, %v8781_v24  ;;  %v3920_v21 = vpop.f32.mrb[13].mxu0  ;;  %v6305_v48 = vadd.f32 %v3678_v33, %v8777_v22  ;;  %v3680_v34 = vpop.f32.mrb[15].mxu1  ;;  %4140 = vmatprep.subr.bf16.mxu1 %v6008_v36  ;;  %v4191_v32 = vmax.f32 %v6303_v41, 0.0  ;;  %v6610_v45 = vld [vmem:[%s9171_s3 + $0x210] ss:$8 sps:$4 sm:$0xff]  }
 0x266   :  { %v6314_v54 = vadd.f32 %v3920_v21, %v8788_v31  ;;  %v3922_v58 = vpop.f32.mrb[14].mxu0  ;;  %v6306_v52 = vadd.f32 %v3680_v34, %v8784_v28  ;;  %v4192_v38 = vmax.f32 %v6304_v47, 0.0 }
 0x267   :  { %v4193_v15 = vmax.f32 %v6313_v29, 0.0  ;;  %v6315_v44 = vadd.f32 %v3922_v58, %v8781_v24  ;;  %v3924_v55 = vpop.f32.mrb[15].mxu0  ;;  %v4199_v60 = vmax.f32 %v6305_v48, 0.0  ;;  %v570_v29 = vld [vmem:[%s9169_s1 + $0xeb8] sm:$0xff]  ;;  %v6615_v48 = vld [vmem:[%s9171_s3 + $0x224] ss:$8 sps:$4 sm:$0xff]  }
 0x268   :  { %v4194_v59 = vmax.f32 %v6314_v54, 0.0  ;;  %v6316_v50 = vadd.f32 %v3924_v55, %v8788_v31  ;;  %v4200_v14 = vmax.f32 %v6306_v52, 0.0  ;;  %4141 = vmatpush1.bf16.msra.mxu1 %v6007_v40  ;;  %v6040_v56 = vcombine.high %v566_v46, %v570_v29 }
 0x269   :  { %v4201_v63 = vmax.f32 %v6315_v44, 0.0  ;;  %v4231_v2 = vpack.c.bf16 %v4199_v60, %v4191_v32  ;;  %4142 = vmatprep.subr.bf16.mxu1 %v6016_v42  ;;  %v6031_v44 = vcombine.low %v558_v5, %v562_v20  ;;  %v6613_v60 = vld [vmem:[%s9171_s3 + $0x220] ss:$8 sps:$4 sm:$0xff]  }
 0x26a   :  { %v4202_v3 = vmax.f32 %v6316_v50, 0.0  ;;  %v4232_v61 = vpack.c.bf16 %v4200_v14, %v4192_v38  ;;  %v3684_v26 = vpop.f32.mrb[16].mxu1  ;;  %v574_v50 = vld [vmem:[%s9169_s1 + $0xed8] sm:$0xff] }
 0x26b   :  { %v8810_v11 = vpack.c.bf16 %v4201_v63, %v4193_v15  ;;  %v6307_v0 = vadd.f32 %v3684_v26, %v8777_v22  ;;  %v3686_v13 = vpop.f32.mrb[17].mxu1  ;;  %v578_v38 = vld [vmem:[%s9169_s1 + $0xef8] sm:$0xff] }
 0x26c   :  { %v8821_v19 = vpack.c.bf16 %v4202_v3, %v4194_v59  ;;  %v3928_v53 = vpop.f32.mrb[16].mxu0  ;;  %v6308_v18 = vadd.f32 %v3686_v13, %v8784_v28  ;;  %v3688_v1 = vpop.f32.mrb[18].mxu1  ;;  %4143 = vmatpush1.bf16.msra.mxu1 %v6015_v51  ;;  %5126 = vmatprep.mubr.bf16.mxu0 %v4232_v61 }
 0x26d   :  { %v6317_v9 = vadd.f32 %v3928_v53, %v8781_v24  ;;  %v3930_v10 = vpop.f32.mrb[17].mxu0  ;;  %v6309_v30 = vadd.f32 %v3688_v1, %v8777_v22  ;;  %v3690_v36 = vpop.f32.mrb[19].mxu1  ;;  %5127 = vmatmul.mubr.bf16.vlgmr.msra.gmra.mrb[24].mxu0 %v4231_v2  ;;  %4144 = vmatprep.subr.bf16.mxu1 %v6024_v8  ;;  %v4207_v40 = vmax.f32 %v6307_v0, 0.0  ;;  %v6618_v2 = vld [vmem:[%s9171_s3 + $0x234] ss:$8 sps:$4 sm:$0xff]  }
 0x26e   :  { %v6318_v16 = vadd.f32 %v3930_v10, %v8788_v31  ;;  %v3932_v43 = vpop.f32.mrb[18].mxu0  ;;  %v6310_v41 = vadd.f32 %v3690_v36, %v8784_v28  ;;  %5156 = vmatpush1.bf16.msra.mxu0 %v6607_v37  ;;  %v4208_v42 = vmax.f32 %v6308_v18, 0.0  ;;  %v6039_v37 = vcombine.low %v566_v46, %v570_v29  ;;  %v586_v53 = vld [vmem:[%s9169_s1 + $0xf38] sm:$0xff]  ;;  %v6619_v36 = vld [vmem:[%s9171_s3 + $0x240] ss:$8 sps:$4 sm:$0xff]  }
 0x26f   :  { %v4209_v47 = vmax.f32 %v6317_v9, 0.0  ;;  %v6319_v21 = vadd.f32 %v3932_v43, %v8781_v24  ;;  %v3934_v33 = vpop.f32.mrb[19].mxu0  ;;  %v4215_v54 = vmax.f32 %v6309_v30, 0.0  ;;  %5157 = vmatprep.subr.bf16.mxu0 %v6612_v4  ;;  %v6616_v4 = vld [vmem:[%s9171_s3 + $0x230] ss:$8 sps:$4 sm:$0xff]   ;;  %v6047_v10 = vcombine.low %v574_v50, %v578_v38 }
 0x270   :  { %v4210_v58 = vmax.f32 %v6318_v16, 0.0  ;;  %v6320_v34 = vadd.f32 %v3934_v33, %v8788_v31  ;;  %v4216_v15 = vmax.f32 %v6310_v41, 0.0  ;;  %4145 = vmatpush1.bf16.msra.mxu1 %v6023_v12  ;;  %v6621_v12 = vld [vmem:[%s9171_s3 + $0x244] ss:$8 sps:$4 sm:$0xff]   ;;  %v594_v16 = vld [vmem:[%s9169_s1 + $0xf78] sm:$0xff] }
 0x271   :  { %v4217_v52 = vmax.f32 %v6319_v21, 0.0  ;;  %v4239_v55 = vpack.c.bf16 %v4215_v54, %v4207_v40  ;;  %4146 = vmatprep.subr.bf16.mxu1 %v6032_v35  ;;  %v590_v35 = vld [vmem:[%s9169_s1 + $0xf58] sm:$0xff]  ;;  %v6627_v33 = vld [vmem:[%s9171_s3 + $0x264] ss:$8 sps:$4 sm:$0xff]   ;;  %v6625_v54 = vld [vmem:[%s9171_s3 + $0x260] ss:$8 sps:$4 sm:$0xff]  }
 0x272   :  { %v4218_v17 = vmax.f32 %v6320_v34, 0.0  ;;  %v4240_v32 = vpack.c.bf16 %v4216_v15, %v4208_v42  ;;  %5158 = vmatpush1.bf16.msra.mxu0 %v6610_v45  ;;  %v3694_v59 = vpop.f32.mrb[20].mxu1  ;;  %v6624_v41 = vld [vmem:[%s9171_s3 + $0x254] ss:$8 sps:$4 sm:$0xff]   ;;  %v6064_v46 = vcombine.high %v590_v35, %v594_v16  ;;  %v6622_v29 = vld [vmem:[%s9171_s3 + $0x250] ss:$8 sps:$4 sm:$0xff]   ;;  %v6063_v40 = vcombine.low %v590_v35, %v594_v16 }
 0x273   :  { %v8855_v63 = vpack.c.bf16 %v4217_v52, %v4209_v47  ;;  %v6311_v14 = vadd.f32 %v3694_v59, %v8777_v22  ;;  %v3696_v51 = vpop.f32.mrb[21].mxu1  ;;  %5159 = vmatprep.subr.bf16.mxu0 %v6615_v48  ;;  %v6048_v22 = vcombine.high %v574_v50, %v578_v38  ;;  %v598_v47 = vld [vmem:[%s9169_s1 + $0xf98] sm:$0xff]  ;;  %v6633_v52 = vld [vmem:[%s9171_s3 + $0x284] ss:$8 sps:$4 sm:$0xff]   ;;  %v6643_v38 = vld [vmem:[%s9171_s3 + $0x2c0] ss:$8 sps:$4 sm:$0xff]  }
 0x274   :  { %v8861_v3 = vpack.c.bf16 %v4218_v17, %v4210_v58  ;;  %v8863_v8 = vpop.f32.mrb[20].mxu0  ;;  %v6312_v61 = vadd.f32 %v3696_v51, %v8784_v28  ;;  %v3698_v26 = vpop.f32.mrb[22].mxu1  ;;  %4147 = vmatpush1.bf16.msra.mxu1 %v6031_v44  ;;  %5136 = vmatprep.mubr.bf16.mxu0 %v4240_v32  ;;  %v582_v28 = vld [vmem:[%s9169_s1 + $0xf18] sm:$0xff]  ;;  %v6639_v59 = vld [vmem:[%s9171_s3 + $0x2a4] ss:$8 sps:$4 sm:$0xff]  }
 0x275   :  { %v8866_v5 = vpop.f32.mrb[21].mxu0  ;;  %v3699_v20 = vpop.f32.mrb[23].mxu1  ;;  %5137 = vmatmul.mubr.bf16.gmra.mrb[28].mxu0 %v4239_v55  ;;  %4148 = vmatprep.subr.bf16.mxu1 %v6040_v56  ;;  %v4223_v1 = vmax.f32 %v6311_v14, 0.0  ;;  %v6056_v30 = vcombine.high %v582_v28, %v586_v53  ;;  %v6055_v45 = vcombine.low %v582_v28, %v586_v53  ;;  %v602_v21 = vld [vmem:[%s9169_s1 + $0xfb8] sm:$0xff]  ;;  %v6631_v56 = vld [vmem:[%s9171_s3 + $0x280] ss:$8 sps:$4 sm:$0xff]  }
 0x276   :  { %v3942_v0 = vpop.f32.mrb[22].mxu0  ;;  %v4224_v13 = vmax.f32 %v6312_v61, 0.0  ;;  %5160 = vmatpush1.bf16.msra.mxu0 %v6613_v60  ;;  %v606_v48 = vld [vmem:[%s9169_s1 + $0xfd8] sm:$0xff]  ;;  %v6071_v42 = vcombine.low %v598_v47, %v602_v21  ;;  %v6637_v60 = vld [vmem:[%s9171_s3 + $0x2a0] ss:$8 sps:$4 sm:$0xff]   ;;  %v6322_v20 = vadd.f32 %v8866_v5, %v8788_v31 }
 0x277   :  { %v3943_v18 = vpop.f32.mrb[23].mxu0  ;;  %5161 = vmatprep.subr.bf16.mxu0 %v6618_v2  ;;  %v4247_v43 = vpack.c.bf16 %v4223_v1, %v4223_v1  ;;  %v610_v58 = vld [vmem:[%s9169_s1 + $0xff8] sm:$0xff]  ;;  %v6649_v51 = vld [vmem:[%s9171_s3 + $0x2e0] ss:$8 sps:$4 sm:$0xff]   ;;  %v6657_v61 = vld [vmem:[%s9171_s3 + $0x304] ss:$8 sps:$4 sm:$0xff]  }
 0x278   :  { %v4248_v9 = vpack.c.bf16 %v4224_v13, %v4224_v13  ;;  %4149 = vmatpush1.bf16.msra.mxu1 %v6039_v37  ;;  %v6630_v34 = vld [vmem:[%s9171_s3 + $0x274] ss:$8 sps:$4 sm:$0xff]   ;;  %v6080_v15 = vcombine.high %v606_v48, %v610_v58  ;;  %v6628_v44 = vld [vmem:[%s9171_s3 + $0x270] ss:$8 sps:$4 sm:$0xff]   ;;  %v6079_v55 = vcombine.low %v606_v48, %v610_v58  ;;  %v6655_v26 = vld [vmem:[%s9171_s3 + $0x300] ss:$8 sps:$4 sm:$0xff]  }
 0x279   :  { %4150 = vmatprep.subr.bf16.mxu1 %v6048_v22  ;;  %v6636_v17 = vld [vmem:[%s9171_s3 + $0x294] ss:$8 sps:$4 sm:$0xff]   ;;  %v6634_v32 = vld [vmem:[%s9171_s3 + $0x290] ss:$8 sps:$4 sm:$0xff]   ;;  %v6663_v0 = vld [vmem:[%s9171_s3 + $0x324] ss:$8 sps:$4 sm:$0xff]  }
 0x27a   :  { %5162 = vmatpush1.bf16.msra.mxu0 %v6616_v4  ;;  %5146 = vmatprep.mubr.bf16.mxu0 %v4248_v9  ;;  %v6642_v50 = vld [vmem:[%s9171_s3 + $0x2b4] ss:$8 sps:$4 sm:$0xff]   ;;  %v6658_v22 = vld [vmem:[%s9171_s3 + $0x310] ss:$8 sps:$4 sm:$0xff]   ;;  %v4226_v13 = vmax.f32 %v6322_v20, 0.0  ;;  %v6703_v58 = vld [vmem:[%s9173_s5 + $0x40] sm:$0xff]  }
 0x27b   :  { %5163 = vmatprep.subr.bf16.mxu0 %v6621_v12  ;;  %v6648_v14 = vld [vmem:[%s9171_s3 + $0x2d4] ss:$8 sps:$4 sm:$0xff]   ;;  %v6661_v31 = vld [vmem:[%s9171_s3 + $0x320] ss:$8 sps:$4 sm:$0xff]   ;;  %v6664_v4 = vld [vmem:[%s9171_s3 + $0x330] ss:$8 sps:$4 sm:$0xff]  }
 0x27c   :  { %4151 = vmatpush1.bf16.msra.mxu1 %v6047_v10  ;;  %v6654_v2 = vld [vmem:[%s9171_s3 + $0x2f4] ss:$8 sps:$4 sm:$0xff]   ;;  %v4250_v5 = vpack.c.bf16 %v4226_v13, %v4226_v13  ;;  %v6670_v18 = vld [vmem:[%s9171_s3 + $0x350] ss:$8 sps:$4 sm:$0xff]   ;;  %v6675_v1 = vld [vmem:[%s9171_s3 + $0x364] ss:$8 sps:$4 sm:$0xff]  }
 0x27d   :  { %5147 = vmatmul.mubr.bf16.gmra.mrb[32].mxu0 %v4247_v43  ;;  %4152 = vmatprep.subr.bf16.mxu1 %v6056_v30  ;;  %v6660_v37 = vld [vmem:[%s9171_s3 + $0x314] ss:$8 sps:$4 sm:$0xff]   ;;  %v6673_v12 = vld [vmem:[%s9171_s3 + $0x360] ss:$8 sps:$4 sm:$0xff]   ;;  %v6676_v10 = vld [vmem:[%s9171_s3 + $0x370] ss:$8 sps:$4 sm:$0xff]  }
 0x27e   :  { %5164 = vmatpush1.bf16.msra.mxu0 %v6619_v36  ;;  %5187 = vmatprep.mubr.bf16.mxu0 %v8821_v19  ;;  %v6072_v19 = vcombine.high %v598_v47, %v602_v21  ;;  %v6678_v9 = vld [vmem:[%s9171_s3 + $0x374] ss:$8 sps:$4 sm:$0xff]   ;;  %v6681_v30 = vld [vmem:[%s9171_s3 + $0x384] ss:$8 sps:$4 sm:$0xff]   ;;  %v6679_v36 = vld [vmem:[%s9171_s3 + $0x380] ss:$8 sps:$4 sm:$0xff]  }
 0x27f   :  { %5165 = vmatprep.subr.bf16.mxu0 %v6624_v41  ;;  %v6684_v35 = vld [vmem:[%s9171_s3 + $0x394] ss:$8 sps:$4 sm:$0xff]   ;;  %v6682_v16 = vld [vmem:[%s9171_s3 + $0x390] ss:$8 sps:$4 sm:$0xff]   ;;  %v6687_v43 = vld [vmem:[%s9171_s3 + $0x3a4] ss:$8 sps:$4 sm:$0xff]  }
 0x280   :  { %4153 = vmatpush1.bf16.msra.mxu1 %v6055_v45  ;;  %v6685_v41 = vld [vmem:[%s9171_s3 + $0x3a0] ss:$8 sps:$4 sm:$0xff]   ;;  %v6690_v45 = vld [vmem:[%s9171_s3 + $0x3b4] ss:$8 sps:$4 sm:$0xff]   ;;  %v6700_v48 = vld [vmem:[%s9171_s3 + $0x3f0] ss:$8 sps:$4 sm:$0xff]  }
 0x281   :  { %4154 = vmatprep.subr.bf16.mxu1 %v6064_v46  ;;  %v6688_v46 = vld [vmem:[%s9171_s3 + $0x3b0] ss:$8 sps:$4 sm:$0xff]   ;;  %v6691_v47 = vld [vmem:[%s9171_s3 + $0x3c0] ss:$8 sps:$4 sm:$0xff]   ;;  %v6696_v21 = vld [vmem:[%s9171_s3 + $0x3d4] ss:$8 sps:$4 sm:$0xff]  }
 0x282   :  { %5166 = vmatpush1.bf16.msra.mxu0 %v6622_v29  ;;  %v6693_v29 = vld [vmem:[%s9171_s3 + $0x3c4] ss:$8 sps:$4 sm:$0xff]  }
 0x283   :  { %5167 = vmatprep.subr.bf16.mxu0 %v6627_v33  ;;  %v6694_v33 = vld [vmem:[%s9171_s3 + $0x3d0] ss:$8 sps:$4 sm:$0xff]  }
 0x284   :  { %4155 = vmatpush1.bf16.msra.mxu1 %v6063_v40  ;;  %v6699_v40 = vld [vmem:[%s9171_s3 + $0x3e4] ss:$8 sps:$4 sm:$0xff]  }
 0x285   :  { %4156 = vmatprep.subr.bf16.mxu1 %v6072_v19  ;;  %v6697_v19 = vld [vmem:[%s9171_s3 + $0x3e0] ss:$8 sps:$4 sm:$0xff]  }
 0x286   :  { %5168 = vmatpush1.bf16.msra.mxu0 %v6625_v54  ;;  %v6702_v54 = vld [vmem:[%s9171_s3 + $0x3f4] ss:$8 sps:$4 sm:$0xff]  }
 0x287   :  { %5169 = vmatprep.subr.bf16.mxu0 %v6630_v34  ;;  %v6704_v34 = vld [vmem:[%s9173_s5] sm:$0xff]  }
 0x288   :  { %4157 = vmatpush1.bf16.msra.mxu1 %v6071_v42  ;;  %v6705_v42 = vld [vmem:[%s9173_s5 + $0x48] sm:$0xff]  }
 0x289   :  { %4158 = vmatprep.subr.bf16.mxu1 %v6080_v15  ;;  %v6706_v15 = vld [vmem:[%s9173_s5 + $0x8] sm:$0xff]  }
 0x28a   :  { %5170 = vmatpush1.bf16.msra.mxu0 %v6628_v44  ;;  %v6707_v44 = vld [vmem:[%s9173_s5 + $0x50] sm:$0xff]  }
 0x28b   :  { %5171 = vmatprep.subr.bf16.mxu0 %v6633_v52  ;;  %v6708_v52 = vld [vmem:[%s9173_s5 + $0x10] sm:$0xff]  }
 0x28c   :  { %4159 = vmatpush1.bf16.msra.mxu1 %v6079_v55  ;;  %v6709_v55 = vld [vmem:[%s9173_s5 + $0x58] sm:$0xff]  }
 0x28d   :  { %6267 = vmatprep.subr.bf16.mxu1 %v6703_v58 }
 0x28e   :  { %5172 = vmatpush1.bf16.msra.mxu0 %v6631_v56  ;;  %v6710_v56 = vld [vmem:[%s9173_s5 + $0x18] sm:$0xff]  }
 0x28f   :  { %4161 = vmatmul.mubr.bf16.vlgmr.msra.gmra.mrb[24].mxu1 %v7332_v23  ;;  %5173 = vmatprep.subr.bf16.mxu0 %v6636_v17  ;;  %v6640_v23 = vld [vmem:[%s9171_s3 + $0x2b0] ss:$8 sps:$4 sm:$0xff]   ;;  %v6711_v17 = vld [vmem:[%s9173_s5 + $0x60] sm:$0xff]  }
 0x290   :  { %4170 = vmatprep.mubr.bf16.mxu1 %v7355_v39  ;;  %v6645_v39 = vld [vmem:[%s9171_s3 + $0x2c4] ss:$8 sps:$4 sm:$0xff]   ;;  %6275 = vmatpush3.bf16.msra.mxu1 %v6704_v34 }
 0x291   :  { %6268 = vmatprep.subr.bf16.mxu1 %v6705_v42 }
 0x292   :  { %5174 = vmatpush1.bf16.msra.mxu0 %v6634_v32  ;;  %v6712_v32 = vld [vmem:[%s9173_s5 + $0x20] sm:$0xff]  }
 0x293   :  { %5175 = vmatprep.subr.bf16.mxu0 %v6639_v59  ;;  %v6713_v59 = vld [vmem:[%s9173_s5 + $0x68] sm:$0xff]  }
 0x294   :  { %6276 = vmatpush3.bf16.msra.mxu1 %v6706_v15 }
 0x295   :  { %6269 = vmatprep.subr.bf16.mxu1 %v6707_v44 }
 0x296   :  { %5176 = vmatpush1.bf16.msra.mxu0 %v6637_v60  ;;  %v639_v60 = vsub.s32 6, %v8032_v49 }
 0x297   :  { %4171 = vmatmul.mubr.bf16.gmra.mrb[28].mxu1 %v7389_v57  ;;  %5177 = vmatprep.subr.bf16.mxu0 %v6642_v50  ;;  %v6646_v57 = vld [vmem:[%s9171_s3 + $0x2d0] ss:$8 sps:$4 sm:$0xff]   ;;  %v643_v50 = vsub.s32 7, %v8032_v49 }
 0x298   :  { %4180 = vmatprep.mubr.bf16.mxu1 %v7409_v7  ;;  %v6651_v7 = vld [vmem:[%s9171_s3 + $0x2e4] ss:$8 sps:$4 sm:$0xff]   ;;  %6277 = vmatpush3.bf16.msra.mxu1 %v6708_v52 }
 0x299   :  { %6270 = vmatprep.subr.bf16.mxu1 %v6709_v55 }
 0x29a   :  { %5178 = vmatpush1.bf16.msra.mxu0 %v6640_v23  ;;  %v640_v23 = vrot.slane %v8774_v25, %v639_v60 }
 0x29b   :  { %5179 = vmatprep.subr.bf16.mxu0 %v6645_v39  ;;  %v644_v39 = vrot.slane %v8774_v25, %v643_v50 }
 0x29c   :  { %6278 = vmatpush3.bf16.msra.mxu1 %v6710_v56 }
 0x29d   :  { %6271 = vmatprep.subr.bf16.mxu1 %v6711_v17 }
 0x29e   :  { %5180 = vmatpush1.bf16.msra.mxu0 %v6643_v38 }
 0x29f   :  { %4181 = vmatmul.mubr.bf16.gmra.mrb[32].mxu1 %v7434_v27  ;;  %5181 = vmatprep.subr.bf16.mxu0 %v6648_v14  ;;  %v6652_v27 = vld [vmem:[%s9171_s3 + $0x2f0] ss:$8 sps:$4 sm:$0xff]  }
 0x2a0   :  { %6279 = vmatpush3.bf16.msra.mxu1 %v6712_v32 }
 0x2a1   :  { %6272 = vmatprep.subr.bf16.mxu1 %v6713_v59 }
 0x2a2   :  { %5182 = vmatpush1.bf16.msra.mxu0 %v6646_v57 }
 0x2a3   :  { %5183 = vmatprep.subr.bf16.mxu0 %v6651_v7 }
 0x2a6   :  { %5184 = vmatpush1.bf16.msra.mxu0 %v6649_v51 }
 0x2a7   :  { %5185 = vmatprep.subr.bf16.mxu0 %v6654_v2 }
 0x2aa   :  { %5186 = vmatpush1.bf16.msra.mxu0 %v6652_v27 }
 0x2ab   :  { %5216 = vmatprep.subr.bf16.mxu0 %v6657_v61 }
 0x2ad   :  { %5188 = vmatmul.mubr.bf16.vlgmr.msra.gmra.mrb[24].mxu0 %v8810_v11  ;;  %v6321_v11 = vadd.f32 %v8863_v8, %v8781_v24  ;;  %v6669_v24 = vld [vmem:[%s9171_s3 + $0x344] ss:$8 sps:$4 sm:$0xff]   ;;  %v6667_v8 = vld [vmem:[%s9171_s3 + $0x340] ss:$8 sps:$4 sm:$0xff]  }
 0x2ae   :  { %5197 = vmatprep.mubr.bf16.mxu0 %v8861_v3  ;;  %5217 = vmatpush1.bf16.msra.mxu0 %v6655_v26  ;;  %v6666_v3 = vld [vmem:[%s9171_s3 + $0x334] ss:$8 sps:$4 sm:$0xff]  }
 0x2af   :  { %5218 = vmatprep.subr.bf16.mxu0 %v6660_v37  ;;  %v4225_v28 = vmax.f32 %v6321_v11, 0.0 }
 0x2b1   :  { %v4249_v53 = vpack.c.bf16 %v4225_v28, %v4225_v28 }
 0x2b2   :  { %5219 = vmatpush1.bf16.msra.mxu0 %v6658_v22 }
 0x2b3   :  { %5220 = vmatprep.subr.bf16.mxu0 %v6663_v0 }
 0x2b5   :  { %5198 = vmatmul.mubr.bf16.gmra.mrb[28].mxu0 %v8855_v63  ;;  %v6672_v63 = vld [vmem:[%s9171_s3 + $0x354] ss:$8 sps:$4 sm:$0xff]  }
 0x2b6   :  { %5207 = vmatprep.mubr.bf16.mxu0 %v4250_v5  ;;  %5221 = vmatpush1.bf16.msra.mxu0 %v6661_v31 }
 0x2b7   :  { %5222 = vmatprep.subr.bf16.mxu0 %v6666_v3 }
 0x2ba   :  { %5223 = vmatpush1.bf16.msra.mxu0 %v6664_v4 }
 0x2bb   :  { %5224 = vmatprep.subr.bf16.mxu0 %v6669_v24 }
 0x2bd   :  { %5208 = vmatmul.mubr.bf16.gmra.mrb[32].mxu0 %v4249_v53 }
 0x2be   :  { %5225 = vmatpush1.bf16.msra.mxu0 %v6667_v8 }
 0x2bf   :  { %5226 = vmatprep.subr.bf16.mxu0 %v6672_v63 }
 0x2c2   :  { %5227 = vmatpush1.bf16.msra.mxu0 %v6670_v18 }
 0x2c3   :  { %5228 = vmatprep.subr.bf16.mxu0 %v6675_v1 }
 0x2c6   :  { %5229 = vmatpush1.bf16.msra.mxu0 %v6673_v12 }
 0x2c7   :  { %5230 = vmatprep.subr.bf16.mxu0 %v6678_v9 }
 0x2ca   :  { %5231 = vmatpush1.bf16.msra.mxu0 %v6676_v10 }
 0x2cb   :  { %5232 = vmatprep.subr.bf16.mxu0 %v6681_v30 }
 0x2ce   :  { %5233 = vmatpush1.bf16.msra.mxu0 %v6679_v36 }
 0x2cf   :  { %5234 = vmatprep.subr.bf16.mxu0 %v6684_v35 }
 0x2d2   :  { %5235 = vmatpush1.bf16.msra.mxu0 %v6682_v16 }
 0x2d3   :  { %5236 = vmatprep.subr.bf16.mxu0 %v6687_v43 }
 0x2d6   :  { %5237 = vmatpush1.bf16.msra.mxu0 %v6685_v41 }
 0x2d7   :  { %5238 = vmatprep.subr.bf16.mxu0 %v6690_v45 }
 0x2da   :  { %5239 = vmatpush1.bf16.msra.mxu0 %v6688_v46 }
 0x2db   :  { %5240 = vmatprep.subr.bf16.mxu0 %v6693_v29  ;;  %v6714_v29 = vld [vmem:[%s9173_s5 + $0x28] sm:$0xff]  }
 0x2dc   :  { %6280 = vmatpush3.bf16.msra.mxu1 %v6714_v29 }
 0x2de   :  { %5241 = vmatpush1.bf16.msra.mxu0 %v6691_v47  ;;  %v6715_v47 = vld [vmem:[%s9173_s5 + $0x70] sm:$0xff]  }
 0x2df   :  { %5242 = vmatprep.subr.bf16.mxu0 %v6696_v21  ;;  %v6716_v21 = vld [vmem:[%s9173_s5 + $0x30] sm:$0xff]   ;;  %6273 = vmatprep.subr.bf16.mxu1 %v6715_v47 }
 0x2e0   :  { %6281 = vmatpush3.bf16.msra.mxu1 %v6716_v21 }
 0x2e2   :  { %5243 = vmatpush1.bf16.msra.mxu0 %v6694_v33  ;;  %v6717_v33 = vld [vmem:[%s9173_s5 + $0x78] sm:$0xff]  }
 0x2e3   :  { %5244 = vmatprep.subr.bf16.mxu0 %v6699_v40  ;;  %v6718_v40 = vld [vmem:[%s9173_s5 + $0x38] sm:$0xff]   ;;  %6274 = vmatprep.subr.bf16.mxu1 %v6717_v33 }
 0x2e4   :  { %6282 = vmatpush3.bf16.msra.mxu1 %v6718_v40 }
 0x2e6   :  { %5245 = vmatpush1.bf16.msra.mxu0 %v6697_v19  ;;  %v4381_v19 = vld [vmem:[%s9174_s4] sm:$0x3] }
 0x2e7   :  { %5246 = vmatprep.subr.bf16.mxu0 %v6702_v54  ;;  %v4386_v54 = vrot.slane %v4381_v19, %v615_v62 }
 0x2ea   :  { %5247 = vmatpush1.bf16.msra.mxu0 %v6700_v48  ;;  %v4390_v48 = vrot.slane %v4381_v19, %v619_v6 }
 0x2eb   :  { %6233 = vmatprep.subr.bf16.mxu0 %v6703_v58 }
 0x362   :  { %v4162_v38 = vpop.f32.mrb[24].mxu1 }
 0x363   :  { %v6323_v14 = vadd.f32 %v4162_v38, %v640_v23  ;;  %v4164_v57 = vpop.f32.mrb[25].mxu1 }
 0x364   :  { %v6324_v7 = vadd.f32 %v4164_v57, %v644_v39  ;;  %v4166_v51 = vpop.f32.mrb[26].mxu1 }
 0x365   :  { %v6325_v2 = vadd.f32 %v4166_v51, %v640_v23  ;;  %v4168_v27 = vpop.f32.mrb[27].mxu1  ;;  %v4195_v26 = vmax.f32 %v6323_v14, 0.0 }
 0x366   :  { %v6326_v61 = vadd.f32 %v4168_v27, %v644_v39  ;;  %v4196_v20 = vmax.f32 %v6324_v7, 0.0 }
 0x367   :  { %v4203_v37 = vmax.f32 %v6325_v2, 0.0 }
 0x368   :  { %v4204_v22 = vmax.f32 %v6326_v61, 0.0 }
 0x369   :  { %v4235_v0 = vpack.c.bf16 %v4203_v37, %v4195_v26 }
 0x36a   :  { %v4236_v13 = vpack.c.bf16 %v4204_v22, %v4196_v20  ;;  %v4172_v31 = vpop.f32.mrb[28].mxu1 }
 0x36b   :  { %v6327_v11 = vadd.f32 %v4172_v31, %v640_v23  ;;  %v4174_v3 = vpop.f32.mrb[29].mxu1 }
 0x36c   :  { %v6328_v5 = vadd.f32 %v4174_v3, %v644_v39  ;;  %v4176_v4 = vpop.f32.mrb[30].mxu1  ;;  %5248 = vmatprep.mubr.bf16.mxu0 %v4236_v13 }
 0x36d   :  { %v6329_v25 = vadd.f32 %v4176_v4, %v640_v23  ;;  %v4178_v28 = vpop.f32.mrb[31].mxu1  ;;  %5249 = vmatmul.mubr.bf16.vlgmr.msra.gmra.mrb[24].mxu0 %v4235_v0  ;;  %v4211_v8 = vmax.f32 %v6327_v11, 0.0 }
 0x36e   :  { %v6330_v24 = vadd.f32 %v4178_v28, %v644_v39  ;;  %6234 = vmatpush3.bf16.msra.mxu0 %v6704_v34  ;;  %v4212_v63 = vmax.f32 %v6328_v5, 0.0  ;;  %v14_v28 = vstv %s9175_s8 }
 0x36f   :  { %v4219_v53 = vmax.f32 %v6329_v25, 0.0  ;;  %6235 = vmatprep.subr.bf16.mxu0 %v6705_v42  ;;  %15 = vst [vmem:[#allocation2] sm:$0x1] %v14_v28 }
 0x370   :  { %v4220_v18 = vmax.f32 %v6330_v24, 0.0 }
 0x371   :  { %v4243_v1 = vpack.c.bf16 %v4219_v53, %v4211_v8  ;;  %v6209_v8 = vld [vmem:[%s9176_s6] ss:$0 sm:$0xff] }
 0x372   :  { %v4244_v12 = vpack.c.bf16 %v4220_v18, %v4212_v63  ;;  %v4182_v9 = vpop.f32.mrb[32].mxu1  ;;  %6236 = vmatpush3.bf16.msra.mxu0 %v6706_v15 }
 0x373   :  { %v6331_v10 = vadd.f32 %v4182_v9, %v640_v23  ;;  %v4184_v30 = vpop.f32.mrb[33].mxu1  ;;  %6237 = vmatprep.subr.bf16.mxu0 %v6707_v44 }
 0x374   :  { %v6332_v36 = vadd.f32 %v4184_v30, %v644_v39  ;;  %v4186_v35 = vpop.f32.mrb[34].mxu1  ;;  %5258 = vmatprep.mubr.bf16.mxu0 %v4244_v12 }
 0x375   :  { %v4187_v16 = vpop.f32.mrb[35].mxu1  ;;  %5259 = vmatmul.mubr.bf16.gmra.mrb[28].mxu0 %v4243_v1  ;;  %v4227_v41 = vmax.f32 %v6331_v10, 0.0  ;;  %v6226_v10 = vld [vmem:[%s9177_s7] ss:$0 sm:$0xff] }
 0x376   :  { %v4228_v43 = vmax.f32 %v6332_v36, 0.0  ;;  %6238 = vmatpush3.bf16.msra.mxu0 %v6708_v52 }
 0x377   :  { %6239 = vmatprep.subr.bf16.mxu0 %v6709_v55  ;;  %v4251_v46 = vpack.c.bf16 %v4227_v41, %v4227_v41 }
 0x378   :  { %v4252_v45 = vpack.c.bf16 %v4228_v43, %v4228_v43 }
 0x37a   :  { %5268 = vmatprep.mubr.bf16.mxu0 %v4252_v45  ;;  %6240 = vmatpush3.bf16.msra.mxu0 %v6710_v56 }
 0x37b   :  { %6241 = vmatprep.subr.bf16.mxu0 %v6711_v17 }
 0x37d   :  { %5269 = vmatmul.mubr.bf16.gmra.mrb[32].mxu0 %v4251_v46 }
 0x37e   :  { %6242 = vmatpush3.bf16.msra.mxu0 %v6712_v32 }
 0x37f   :  { %6243 = vmatprep.subr.bf16.mxu0 %v6713_v59 }
 0x382   :  { %6244 = vmatpush3.bf16.msra.mxu0 %v6714_v29 }
 0x383   :  { %6245 = vmatprep.subr.bf16.mxu0 %v6715_v47 }
 0x386   :  { %6246 = vmatpush3.bf16.msra.mxu0 %v6716_v21 }
 0x387   :  { %6247 = vmatprep.subr.bf16.mxu0 %v6717_v33 }
 0x38a   :  { %6248 = vmatpush3.bf16.msra.mxu0 %v6718_v40 }
 0x440   :  { %v5250_v58 = vpop.f32.mrb[24].mxu0 }
 0x441   :  { %v6333_v34 = vadd.f32 %v5250_v58, %v4386_v54  ;;  %v5252_v42 = vpop.f32.mrb[25].mxu0 }
 0x442   :  { %v6334_v15 = vadd.f32 %v5252_v42, %v4390_v48  ;;  %v5254_v44 = vpop.f32.mrb[26].mxu0 }
 0x443   :  { %v6335_v52 = vadd.f32 %v5254_v44, %v4386_v54  ;;  %v5256_v55 = vpop.f32.mrb[27].mxu0  ;;  %v5277_v17 = vmax.f32 %v6333_v34, 0.0 }
 0x444   :  { %v6336_v56 = vadd.f32 %v5256_v55, %v4390_v48  ;;  %v5278_v59 = vmax.f32 %v6334_v15, 0.0 }
 0x445   :  { %v5279_v32 = vmax.f32 %v6335_v52, 0.0 }
 0x446   :  { %v5280_v60 = vmax.f32 %v6336_v56, 0.0 }
 0x447   :  { %v5287_v50 = vpack.c.bf16 %v5279_v32, %v5277_v17 }
 0x448   :  { %v5288_v23 = vpack.c.bf16 %v5280_v60, %v5278_v59  ;;  %v5260_v39 = vpop.f32.mrb[28].mxu0 }
 0x449   :  { %v6337_v38 = vadd.f32 %v5260_v39, %v4386_v54  ;;  %v5262_v62 = vpop.f32.mrb[29].mxu0  ;;  %v6227_v39 = vld [vmem:[#allocation2] ss:$0 sm:$0xff] }
 0x44a   :  { %v6338_v14 = vadd.f32 %v5262_v62, %v4390_v48  ;;  %v5264_v49 = vpop.f32.mrb[30].mxu0  ;;  %5460 = vmatprep.mubr.bf16.mxu0 %v5288_v23 }
 0x44b   :  { %v6339_v6 = vadd.f32 %v5264_v49, %v4386_v54  ;;  %v5266_v57 = vpop.f32.mrb[31].mxu0  ;;  %5461 = vmatmul.mubr.bf16.vlgmr.msra.gmra.mrb[36].mxu0 %v5287_v50  ;;  %v5281_v51 = vmax.f32 %v6337_v38, 0.0 }
 0x44c   :  { %v6340_v7 = vadd.f32 %v5266_v57, %v4390_v48  ;;  %v5282_v27 = vmax.f32 %v6338_v14, 0.0 }
 0x44d   :  { %v5283_v2 = vmax.f32 %v6339_v6, 0.0 }
 0x44e   :  { %v5284_v61 = vmax.f32 %v6340_v7, 0.0 }
 0x44f   :  { %v5289_v26 = vpack.c.bf16 %v5283_v2, %v5281_v51 }
 0x450   :  { %v5290_v37 = vpack.c.bf16 %v5284_v61, %v5282_v27  ;;  %v5270_v20 = vpop.f32.mrb[32].mxu0 }
 0x451   :  { %v6341_v22 = vadd.f32 %v5270_v20, %v4386_v54  ;;  %v5272_v0 = vpop.f32.mrb[33].mxu0 }
 0x452   :  { %v6342_v13 = vadd.f32 %v5272_v0, %v4390_v48  ;;  %v5274_v31 = vpop.f32.mrb[34].mxu0  ;;  %5468 = vmatprep.mubr.bf16.mxu0 %v5290_v37 }
 0x453   :  { %v5285_v11 = vmax.f32 %v6341_v22, 0.0  ;;  %v5275_v3 = vpop.f32.mrb[35].mxu0  ;;  %5469 = vmatmul.mubr.bf16.gmra.mrb[40].mxu0 %v5289_v26 }
 0x454   :  { %v5286_v5 = vmax.f32 %v6342_v13, 0.0 }
 0x455   :  { %v5291_v25 = vpack.c.bf16 %v5285_v11, %v5285_v11 }
 0x456   :  { %v5292_v4 = vpack.c.bf16 %v5286_v5, %v5286_v5 }
 0x458   :  { %5476 = vmatprep.mubr.bf16.mxu1 %v5292_v4 }
 0x459   :  { %5477 = vmatmul.mubr.bf16.vlgmr.msra.gmra.mrb[36].mxu1 %v5291_v25 }
 0x51e   :  { %v6249_v24 = vpop.f32.mrb[36].mxu0 }
 0x51f   :  { %v6250_v53 = vpop.f32.mrb[37].mxu0 }
 0x520   :  { %v6251_v63 = vadd.f32 %v6250_v53, %v6249_v24  ;;  %v6252_v18 = vpop.f32.mrb[38].mxu0 }
 0x521   :  { %v6253_v1 = vpop.f32.mrb[39].mxu0 }
 0x522   :  { %v5463_v12 = vadd.f32 %v6251_v63, %v6209_v8  ;;  %v6254_v9 = vadd.f32 %v6253_v1, %v6252_v18 }
 0x524   :  { %v5484_v30 = vmax.f32 %v5463_v12, 0.0  ;;  %v5466_v36 = vadd.f32 %v6254_v9, %v6209_v8 }
 0x526   :  { %v5485_v35 = vmax.f32 %v5466_v36, 0.0  ;;  %v6255_v16 = vpop.f32.mrb[40].mxu0  ;;  %v5496_v43 = vmul.f32 %v6226_v10, %v5484_v30 }
 0x527   :  { %v6256_v41 = vpop.f32.mrb[41].mxu0 }
 0x528   :  { %v6257_v45 = vadd.f32 %v6256_v41, %v6255_v16  ;;  %v6258_v46 = vpop.f32.mrb[42].mxu0  ;;  %v5502_v29 = vsel %vm5501_vm0, %v5496_v43, 0.0  ;;  %v5497_v47 = vmul.f32 %v6226_v10, %v5485_v35 }
 0x529   :  { %v6259_v21 = vpop.f32.mrb[43].mxu0  ;;  %5503 = vadd.xlane.f32.xlu0 %v5502_v29 }
 0x52a   :  { %v5471_v33 = vadd.f32 %v6257_v45, %v6209_v8  ;;  %v6260_v40 = vadd.f32 %v6259_v21, %v6258_v46  ;;  %v5505_v58 = vsel %vm5501_vm0, %v5497_v47, 0.0 }
 0x52c   :  { %v5486_v19 = vmax.f32 %v5471_v33, 0.0  ;;  %v5474_v54 = vadd.f32 %v6260_v40, %v6209_v8  ;;  %v6261_v48 = vpop.f32.mrb[36].mxu1 }
 0x52d   :  { %v6262_v34 = vpop.f32.mrb[37].mxu1  ;;  %5506 = vadd.xlane.f32.xlu0 %v5505_v58 }
 0x52e   :  { %v5487_v42 = vmax.f32 %v5474_v54, 0.0  ;;  %v6263_v15 = vadd.f32 %v6262_v34, %v6261_v48  ;;  %v6264_v44 = vpop.f32.mrb[38].mxu1  ;;  %v5498_v52 = vmul.f32 %v6226_v10, %v5486_v19 }
 0x52f   :  { %v6265_v55 = vpop.f32.mrb[39].mxu1 }
 0x530   :  { %v5479_v56 = vadd.f32 %v6263_v15, %v6209_v8  ;;  %v5508_v17 = vsel %vm5501_vm0, %v5498_v52, 0.0  ;;  %v5499_v32 = vmul.f32 %v6226_v10, %v5487_v42 }
 0x531   :  { %5509 = vadd.xlane.f32.xlu1 %v5508_v17 }
 0x532   :  { %v5488_v59 = vmax.f32 %v5479_v56, 0.0  ;;  %v5511_v60 = vsel %vm5501_vm0, %v5499_v32, 0.0 }
 0x534   :  { %v5500_v50 = vmul.f32 %v6226_v10, %v5488_v59 }
 0x535   :  { %5512 = vadd.xlane.f32.xlu1 %v5511_v60 }
 0x536   :  { %v5514_v23 = vsel %vm5501_vm0, %v5500_v50, 0.0 }
 0x537   :  { %5515 = vadd.xlane.f32.xlu0 %v5514_v23 }
 0x5b6   :  { %v5504_v38 = vpop.xlane.xlu0 %5503 }
 0x5b7   :  { %v5524_v62 = vadd.f32 %v6227_v39, %v5504_v38 }
 0x5b9   :  { %v6228_v14 = vmul.f32 -1.442695, %v5524_v62 }
 0x5ba   :  { %v5507_v49 = vpop.xlane.xlu0 %5506 }
 0x5bb   :  { %6719 = vpow2.f32 %v6228_v14  ;;  %v5525_v6 = vadd.f32 %v6227_v39, %v5507_v49 }
 0x5bd   :  { %v6229_v57 = vmul.f32 -1.442695, %v5525_v6 }
 0x5be   :  { %v5510_v7 = vpop.xlane.xlu1 %5509 }
 0x5bf   :  { %6721 = vpow2.f32 %v6229_v57  ;;  %v5526_v51 = vadd.f32 %v6227_v39, %v5510_v7 }
 0x5c1   :  { %v6230_v2 = vmul.f32 -1.442695, %v5526_v51 }
 0x5c2   :  { %v5513_v27 = vpop.xlane.xlu1 %5512 }
 0x5c3   :  { %6723 = vpow2.f32 %v6230_v2  ;;  %v5527_v61 = vadd.f32 %v6227_v39, %v5513_v27 }
 0x5c4   :  { %v5516_v26 = vpop.xlane.xlu0 %5515 }
 0x5c5   :  { %v6720_v37 = vpop.eup %6719  ;;  %v6231_v20 = vmul.f32 -1.442695, %v5527_v61  ;;  %v5528_v22 = vadd.f32 %v6227_v39, %v5516_v26 }
 0x5c6   :  { %v5544_v0 = vadd.f32 1.0, %v6720_v37 }
 0x5c7   :  { %6725 = vpow2.f32 %v6231_v20  ;;  %v6232_v13 = vmul.f32 -1.442695, %v5528_v22 }
 0x5c8   :  { %6727 = vrcp.f32 %v5544_v0 }
 0x5c9   :  { %v6722_v31 = vpop.eup %6721  ;;  %6729 = vpow2.f32 %v6232_v13 }
 0x5ca   :  { %v5545_v11 = vadd.f32 1.0, %v6722_v31 }
 0x5cc   :  { %6731 = vrcp.f32 %v5545_v11 }
 0x5cd   :  { %v6724_v3 = vpop.eup %6723 }
 0x5ce   :  { %v5546_v5 = vadd.f32 1.0, %v6724_v3 }
 0x5d0   :  { %6733 = vrcp.f32 %v5546_v5 }
 0x5d1   :  { %v6726_v4 = vpop.eup %6725 }
 0x5d2   :  { %v6728_v25 = vpop.eup %6727  ;;  %v5547_v28 = vadd.f32 1.0, %v6726_v4 }
 0x5d3   :  { %v6730_v24 = vpop.eup %6729  ;;  %5560 = vst.msk [vmem:[%s9178_s9] sm:$0xff] %vm5559_vm1, %v6728_v25 }
 0x5d4   :  { %6735 = vrcp.f32 %v5547_v28  ;;  %v5548_v8 = vadd.f32 1.0, %v6730_v24 }
 0x5d6   :  { %v6732_v53 = vpop.eup %6731  ;;  %6737 = vrcp.f32 %v5548_v8 }
 0x5d7   :  { %5561 = vst.msk [vmem:[%s9178_s9 + $0x8] sm:$0xff] %vm5559_vm1, %v6732_v53 }
 0x5da   :  { %v6734_v63 = vpop.eup %6733 }
 0x5db   :  { %5562 = vst.msk [vmem:[%s9178_s9 + $0x10] sm:$0xff] %vm5559_vm1, %v6734_v63 }
 0x5de   :  { %v6736_v18 = vpop.eup %6735 }
 0x5df   :  { %5563 = vst.msk [vmem:[%s9178_s9 + $0x18] sm:$0xff] %vm5559_vm1, %v6736_v18 }
 0x5e0   :  { %v6738_v1 = vpop.eup %6737 }
 0x5e1   :  { %5564 = vst.msk [vmem:[%s9178_s9 + $0x20] sm:$0xff] %vm5559_vm1, %v6738_v1 }

</bundles_post_ra>
